<compile_context>
chip_gen: v5e
topology: v5e:2x2
jax: 0.10.0
libtpu: 0.0.40
codegen_flags: <defaults>
</compile_context>

<pallas_src>
import functools

import jax
import jax.numpy as jnp
from jax.experimental import pallas as pl
from jax.experimental.pallas import tpu as pltpu

IN_DIM = 784
HID_DIM = 256
NEG_SLOPE = 0.2
_HIGHEST = jax.lax.Precision.HIGHEST


def _disc_kernel(scal_ref, x_ref, w1t_ref, b1_ref, w2t_ref, b2_ref, w3_ref, o_ref):
    # scal_ref: SMEM (4,) = [1/sigma1, 1/sigma2, 1/sigma3, b3]
    inv_s1 = scal_ref[0]
    inv_s2 = scal_ref[1]
    inv_s3 = scal_ref[2]
    b3 = scal_ref[3]

    x = x_ref[...]                                                     # (TB, 784)

    # fc1 (spectral-normalized) + LeakyReLU(0.2)
    h1 = jnp.dot(x, w1t_ref[...],
                 preferred_element_type=jnp.float32, precision=_HIGHEST)
    h1 = h1 * inv_s1 + b1_ref[...]                                     # (TB, 256)
    h1 = jnp.maximum(h1, NEG_SLOPE * h1)

    # fc2 (spectral-normalized) + LeakyReLU(0.2)
    h2 = jnp.dot(h1, w2t_ref[...],
                 preferred_element_type=jnp.float32, precision=_HIGHEST)
    h2 = h2 * inv_s2 + b2_ref[...]
    h2 = jnp.maximum(h2, NEG_SLOPE * h2)

    # fc3 (spectral-normalized, output width 1) -> lane reduction, then sigmoid.
    logit = jnp.sum(h2 * w3_ref[...], axis=-1, keepdims=True) * inv_s3 + b3   # (TB, 1)
    o_ref[...] = pl.reciprocal(1.0 + jnp.exp(-logit), approx=False)


def _inv_sigma(w, u, power_iterations=1, eps=1e-12):
    """1/sigma with sigma from SpectralNorm._update_u_v (one power iteration)."""
    w2d = w.reshape(w.shape[0], -1)
    v = None
    for _ in range(power_iterations):
        v = jnp.dot(w2d.T, u, precision=_HIGHEST)
        v = v / jnp.maximum(jnp.linalg.norm(v), eps)        # F.normalize(dim=0, eps)
        u = jnp.dot(w2d, v, precision=_HIGHEST)
        u = u / jnp.maximum(jnp.linalg.norm(u), eps)
    sigma = jnp.dot(u, jnp.dot(w2d, v, precision=_HIGHEST), precision=_HIGHEST)
    return 1.0 / sigma


def discriminator_forward(x, params, *, block_b=256):
    """Pallas forward for DiscriminatorWithSpectralNorm. Returns (B, 1) probabilities."""
    x2 = x.reshape(-1, IN_DIM).astype(jnp.float32)          # torch: x.view(-1, 784)
    b_full = x2.shape[0]

    # Batch-independent spectral-norm scalars, hoisted out of the kernel body.
    inv_s1 = _inv_sigma(params["w1"], params["u1"])
    inv_s2 = _inv_sigma(params["w2"], params["u2"])
    inv_s3 = _inv_sigma(params["w3"], params["u3"])
    scal = jnp.stack([inv_s1, inv_s2, inv_s3,
                      params["b3"].reshape(())]).astype(jnp.float32)          # (4,)

    w1t = params["w1"].T.astype(jnp.float32)                 # (784, 256)
    w2t = params["w2"].T.astype(jnp.float32)                 # (256, 256)
    b1 = params["b1"].reshape(1, HID_DIM).astype(jnp.float32)
    b2 = params["b2"].reshape(1, HID_DIM).astype(jnp.float32)
    w3 = params["w3"].reshape(1, HID_DIM).astype(jnp.float32)

    if b_full <= block_b:
        tb = b_full                                          # single full-dim tile (always legal)
    else:
        tb = max(8, (block_b // 8) * 8)                      # sublane-aligned batch tile
    pad = (-b_full) % tb
    if pad:
        x2 = jnp.pad(x2, ((0, pad), (0, 0)))
    b_pad = b_full + pad
    grid = (b_pad // tb,)

    out = pl.pallas_call(
        _disc_kernel,
        out_shape=jax.ShapeDtypeStruct((b_pad, 1), jnp.float32),
        grid=grid,
        in_specs=[
            pl.BlockSpec(memory_space=pltpu.MemorySpace.SMEM),        # [1/s1,1/s2,1/s3,b3]
            pl.BlockSpec((tb, IN_DIM), lambda i: (i, 0)),             # x batch tile
            pl.BlockSpec((IN_DIM, HID_DIM), lambda i: (0, 0)),        # W1^T (VMEM resident)
            pl.BlockSpec((1, HID_DIM), lambda i: (0, 0)),             # b1
            pl.BlockSpec((HID_DIM, HID_DIM), lambda i: (0, 0)),       # W2^T (VMEM resident)
            pl.BlockSpec((1, HID_DIM), lambda i: (0, 0)),             # b2
            pl.BlockSpec((1, HID_DIM), lambda i: (0, 0)),             # W3 row
        ],
        out_specs=pl.BlockSpec((tb, 1), lambda i: (i, 0)),
        compiler_params=pltpu.CompilerParams(
            dimension_semantics=("parallel",),
            vmem_limit_bytes=64 << 20),
    )(scal, x2, w1t, b1, w2t, b2, w3)
    return out[:b_full]


def discriminator_ref(x, params):
    """Pure-JAX reference mirroring the PyTorch forward."""
    def sn_linear(h, w, b, u):
        sigma = 1.0 / _inv_sigma(w, u)
        w_sn = w / sigma
        return jnp.dot(h, w_sn.T, precision=_HIGHEST) + b

    h = x.reshape(-1, IN_DIM).astype(jnp.float32)
    h = jax.nn.leaky_relu(sn_linear(h, params["w1"], params["b1"], params["u1"]), NEG_SLOPE)
    h = jax.nn.leaky_relu(sn_linear(h, params["w2"], params["b2"], params["u2"]), NEG_SLOPE)
    z = sn_linear(h, params["w3"], params["b3"], params["u3"])
    return 1.0 / (1.0 + jnp.exp(-z))


if __name__ == "__main__":
    key = jax.random.PRNGKey(0)
    k = jax.random.split(key, 10)

    def linear_init(kw, kb, fan_out, fan_in):
        bound = float(fan_in) ** -0.5
        w = jax.random.uniform(kw, (fan_out, fan_in), jnp.float32, minval=-bound, maxval=bound)
        b = jax.random.uniform(kb, (fan_out,), jnp.float32, minval=-bound, maxval=bound)
        return w, b

    def unit_vec(kk, n):
        v = jax.random.normal(kk, (n,), jnp.float32)
        return v / jnp.maximum(jnp.linalg.norm(v), 1e-12)

    w1, b1 = linear_init(k[0], k[1], HID_DIM, IN_DIM)
    w2, b2 = linear_init(k[2], k[3], HID_DIM, HID_DIM)
    w3, b3 = linear_init(k[4], k[5], 1, HID_DIM)
    params = {
        "w1": w1, "b1": b1, "u1": unit_vec(k[6], HID_DIM),
        "w2": w2, "b2": b2, "u2": unit_vec(k[7], HID_DIM),
        "w3": w3, "b3": b3, "u3": unit_vec(k[8], 1),
    }

    batch = 64
    x = jax.random.normal(k[9], (batch, 1, 28, 28), jnp.float32)   # flattened to (-1, 784)

    # block_b=16 -> grid of 4 batch tiles (exercises the pipelined/parallel path
    # at demo size; production would use block_b in the 256-1024 range).
    fwd = jax.jit(functools.partial(discriminator_forward, block_b=16))
    y = fwd(x, params)
    jax.block_until_ready(y)

    y_ref = discriminator_ref(x, params)
    assert y.shape == (batch, 1)
    assert bool(jnp.all(jnp.isfinite(y)))
    assert jnp.allclose(y, y_ref, atol=1e-5, rtol=1e-4), float(jnp.max(jnp.abs(y - y_ref)))

    print("KERNEL_OK")
</pallas_src>

<mosaic_0001>
module attributes {stable_mosaic.version = 11 : i64} {
  func.func @_disc_kernel(%arg0: i32, %arg1: memref<4xf32, #tpu.memory_space<smem>>, %arg2: memref<16x784xf32, #tpu.memory_space<vmem>>, %arg3: memref<784x256xf32, #tpu.memory_space<vmem>>, %arg4: memref<1x256xf32, #tpu.memory_space<vmem>>, %arg5: memref<256x256xf32, #tpu.memory_space<vmem>>, %arg6: memref<1x256xf32, #tpu.memory_space<vmem>>, %arg7: memref<1x256xf32, #tpu.memory_space<vmem>>, %arg8: memref<16x1xf32, #tpu.memory_space<vmem>>) attributes {dimension_semantics = [#tpu.dimension_semantics<parallel>], iteration_bounds = array<i64: 4>, scalar_prefetch = 0 : i64, scratch_operands = 0 : i64, tpu.core_type = #tpu.core_type<tc>, window_params = [{transform_indices = @transform_0, window_bounds = array<i64: 4>}, {transform_indices = @transform_1, window_bounds = array<i64: 16, 784>}, {pipeline_mode = #tpu.pipeline_mode<synchronous>, transform_indices = @transform_2, window_bounds = array<i64: 784, 256>}, {pipeline_mode = #tpu.pipeline_mode<synchronous>, transform_indices = @transform_3, window_bounds = array<i64: 1, 256>}, {pipeline_mode = #tpu.pipeline_mode<synchronous>, transform_indices = @transform_4, window_bounds = array<i64: 256, 256>}, {pipeline_mode = #tpu.pipeline_mode<synchronous>, transform_indices = @transform_5, window_bounds = array<i64: 1, 256>}, {pipeline_mode = #tpu.pipeline_mode<synchronous>, transform_indices = @transform_6, window_bounds = array<i64: 1, 256>}, {transform_indices = @transform_7, window_bounds = array<i64: 16, 1>}]} {
    %c0 = arith.constant 0 : index
    %0 = memref.load %arg1[%c0] : memref<4xf32, #tpu.memory_space<smem>>
    %c1 = arith.constant 1 : index
    %1 = memref.load %arg1[%c1] : memref<4xf32, #tpu.memory_space<smem>>
    %c2 = arith.constant 2 : index
    %2 = memref.load %arg1[%c2] : memref<4xf32, #tpu.memory_space<smem>>
    %c3 = arith.constant 3 : index
    %3 = memref.load %arg1[%c3] : memref<4xf32, #tpu.memory_space<smem>>
    %c0_0 = arith.constant 0 : index
    %c0_1 = arith.constant 0 : index
    %4 = vector.load %arg2[%c0_0, %c0_1] : memref<16x784xf32, #tpu.memory_space<vmem>>, vector<16x784xf32>
    %c0_2 = arith.constant 0 : index
    %c0_3 = arith.constant 0 : index
    %5 = vector.load %arg3[%c0_2, %c0_3] : memref<784x256xf32, #tpu.memory_space<vmem>>, vector<784x256xf32>
    %cst = arith.constant dense<0.000000e+00> : vector<16x256xf32>
    %6 = tpu.matmul %4, %5, %cst {dimension_numbers = #tpu.dot_dimension_numbers<[1], [0], [0], [1], [0, 0, 1, 1], [], []>, precision = #tpu.contract_precision<fp32>} : vector<16x784xf32>, vector<784x256xf32>, vector<16x256xf32> -> vector<16x256xf32>
    %7 = vector.broadcast %0 : f32 to vector<16x256xf32>
    %8 = arith.mulf %6, %7 : vector<16x256xf32>
    %c0_4 = arith.constant 0 : index
    %c0_5 = arith.constant 0 : index
    %9 = vector.load %arg4[%c0_4, %c0_5] : memref<1x256xf32, #tpu.memory_space<vmem>>, vector<1x256xf32>
    %10 = vector.broadcast %9 : vector<1x256xf32> to vector<16x256xf32>
    %11 = arith.addf %8, %10 : vector<16x256xf32>
    %cst_6 = arith.constant 2.000000e-01 : f32
    %12 = vector.broadcast %cst_6 : f32 to vector<16x256xf32>
    %13 = arith.mulf %12, %11 : vector<16x256xf32>
    %14 = arith.maximumf %11, %13 : vector<16x256xf32>
    %c0_7 = arith.constant 0 : index
    %c0_8 = arith.constant 0 : index
    %15 = vector.load %arg5[%c0_7, %c0_8] : memref<256x256xf32, #tpu.memory_space<vmem>>, vector<256x256xf32>
    %cst_9 = arith.constant dense<0.000000e+00> : vector<16x256xf32>
    %16 = tpu.matmul %14, %15, %cst_9 {dimension_numbers = #tpu.dot_dimension_numbers<[1], [0], [0], [1], [0, 0, 1, 1], [], []>, precision = #tpu.contract_precision<fp32>} : vector<16x256xf32>, vector<256x256xf32>, vector<16x256xf32> -> vector<16x256xf32>
    %17 = vector.broadcast %1 : f32 to vector<16x256xf32>
    %18 = arith.mulf %16, %17 : vector<16x256xf32>
    %c0_10 = arith.constant 0 : index
    %c0_11 = arith.constant 0 : index
    %19 = vector.load %arg6[%c0_10, %c0_11] : memref<1x256xf32, #tpu.memory_space<vmem>>, vector<1x256xf32>
    %20 = vector.broadcast %19 : vector<1x256xf32> to vector<16x256xf32>
    %21 = arith.addf %18, %20 : vector<16x256xf32>
    %cst_12 = arith.constant 2.000000e-01 : f32
    %22 = vector.broadcast %cst_12 : f32 to vector<16x256xf32>
    %23 = arith.mulf %22, %21 : vector<16x256xf32>
    %24 = arith.maximumf %21, %23 : vector<16x256xf32>
    %c0_13 = arith.constant 0 : index
    %c0_14 = arith.constant 0 : index
    %25 = vector.load %arg7[%c0_13, %c0_14] : memref<1x256xf32, #tpu.memory_space<vmem>>, vector<1x256xf32>
    %26 = vector.broadcast %25 : vector<1x256xf32> to vector<16x256xf32>
    %27 = arith.mulf %24, %26 : vector<16x256xf32>
    %cst_15 = arith.constant dense<0.000000e+00> : vector<16xf32>
    %28 = vector.multi_reduction <add>, %27, %cst_15 [1] : vector<16x256xf32> to vector<16xf32>
    %29 = vector.shape_cast %28 : vector<16xf32> to vector<16x1xf32>
    %30 = vector.broadcast %2 : f32 to vector<16x1xf32>
    %31 = arith.mulf %29, %30 : vector<16x1xf32>
    %32 = vector.broadcast %3 : f32 to vector<16x1xf32>
    %33 = arith.addf %31, %32 : vector<16x1xf32>
    %cst_16 = arith.constant 0.000000e+00 : f32
    %34 = vector.broadcast %cst_16 : f32 to vector<16x1xf32>
    %35 = arith.subf %34, %33 : vector<16x1xf32>
    %36 = math.exp %35 : vector<16x1xf32>
    %cst_17 = arith.constant 1.000000e+00 : f32
    %37 = vector.broadcast %cst_17 : f32 to vector<16x1xf32>
    %38 = arith.addf %37, %36 : vector<16x1xf32>
    %39 = tpu.reciprocal %38 : vector<16x1xf32> -> vector<16x1xf32>
    %c0_18 = arith.constant 0 : index
    %c0_19 = arith.constant 0 : index
    %40 = vector.load %arg8[%c0_18, %c0_19] : memref<16x1xf32, #tpu.memory_space<vmem>>, vector<16x1xf32>
    tpu.vector_store %arg8[%c0_18, %c0_19], %39 {strides = array<i32>} : memref<16x1xf32, #tpu.memory_space<vmem>>, vector<16x1xf32>,
    return
  }
  func.func @transform_0(%arg0: i32) -> i32 {
    %c0_i32 = arith.constant 0 : i32
    %c0_i32_0 = arith.constant 0 : i32
    return %c0_i32 : i32
  }
  func.func @transform_1(%arg0: i32) -> (i32, i32) {
    %c0_i32 = arith.constant 0 : i32
    %c0_i32_0 = arith.constant 0 : i32
    return %arg0, %c0_i32 : i32, i32
  }
  func.func @transform_2(%arg0: i32) -> (i32, i32) {
    %c0_i32 = arith.constant 0 : i32
    %c0_i32_0 = arith.constant 0 : i32
    %c0_i32_1 = arith.constant 0 : i32
    return %c0_i32, %c0_i32_0 : i32, i32
  }
  func.func @transform_3(%arg0: i32) -> (i32, i32) {
    %c0_i32 = arith.constant 0 : i32
    %c0_i32_0 = arith.constant 0 : i32
    %c0_i32_1 = arith.constant 0 : i32
    return %c0_i32, %c0_i32_0 : i32, i32
  }
  func.func @transform_4(%arg0: i32) -> (i32, i32) {
    %c0_i32 = arith.constant 0 : i32
    %c0_i32_0 = arith.constant 0 : i32
    %c0_i32_1 = arith.constant 0 : i32
    return %c0_i32, %c0_i32_0 : i32, i32
  }
  func.func @transform_5(%arg0: i32) -> (i32, i32) {
    %c0_i32 = arith.constant 0 : i32
    %c0_i32_0 = arith.constant 0 : i32
    %c0_i32_1 = arith.constant 0 : i32
    return %c0_i32, %c0_i32_0 : i32, i32
  }
  func.func @transform_6(%arg0: i32) -> (i32, i32) {
    %c0_i32 = arith.constant 0 : i32
    %c0_i32_0 = arith.constant 0 : i32
    %c0_i32_1 = arith.constant 0 : i32
    return %c0_i32, %c0_i32_0 : i32, i32
  }
  func.func @transform_7(%arg0: i32) -> (i32, i32) {
    %c0_i32 = arith.constant 0 : i32
    %c0_i32_0 = arith.constant 0 : i32
    return %arg0, %c0_i32 : i32, i32
  }
}

</mosaic_0001>

<bundles_post_ra>
// kernel: discriminator_forward.1
= control target key start
LH: loop header
LB: loop body
LE: loop exit
PB: predicated region body
PF: predicated region fallthrough
CT: control target
= control target key end

     0   :  { %12 = vsyncpa [#allocation3], 0  ;;  %s7204_s24 = smov 0   ;;  %s12823_s0 = inlined_call_operand.vmem [shape: f32[4], index: 0, kind: input, shape index: {}]   ;;  %s12824_s1 = inlined_call_operand.vmem [shape: f32[64,784], index: 1, kind: input, shape index: {}]   ;;  %s12825_s2 = inlined_call_operand.vmem [shape: f32[784,256], index: 2, kind: input, shape index: {}]   ;;  %s12826_s3 = inlined_call_operand.vmem [shape: f32[1,256], index: 3, kind: input, shape index: {}]   ;;  %s12827_s4 = inlined_call_operand.vmem [shape: f32[256,256], index: 4, kind: input, shape index: {}]   ;;  %s12828_s5 = inlined_call_operand.vmem [shape: f32[1,256], index: 5, kind: input, shape index: {}]   ;;  %s12829_s6 = inlined_call_operand.vmem [shape: f32[1,256], index: 6, kind: input, shape index: {}]   ;;  %s12830_s7 = inlined_call_operand.vmem [shape: f32[64,1], index: 7, kind: output, shape index: {}]  }
   0x1 LB: > { %s7091_s25 = sadd.s32 4294967295, %s7161_s24   ;;  %p7093_p0 = scmp.ge.s32.totalorder %s7161_s24, 1  ;;  %s7161_s24 = sphi %s7204_s24, %s18_s24  }
   0x2   : > { %p201_p1 = scmp.lt.s32.totalorder %s7161_s24, 5  ;;  %s213_s28 = sshll.u32 %s12823_s0, 4  ;;  %s214_s28 = int_to_ptr.vmem [resolvable:$true] %s213_s28 }
   0x3   : > { %p7116_p3 = scmp.eq.s32.totalorder %s7091_s25, 0  ;;  %s7163_s29 = smov [#allocation2]  }
   0x4   : > { %p202_p2 = pnand %p7093_p0, %p201_p1 }
   0x6   : > { %p7112_p4 = pneg %p202_p2  ;;  %251 = sbr.rel (%p202_p2) target bundleno = 1276 (0x4fc), region = 48 }
   0x8   : > { %p7113_p5 = pnand %p7116_p3, %p7112_p4 }
   0xa   : > { %7115 = dma.vmem_to_smem (!%p7113_p5), %s214_s28, 16, %s7163_s29, [#allocation3]  }
   0xb   : > { %7156 = dma.done.wait (%p7116_p3), [#allocation3], 16  }
   0xc   : > { %7158 = vsyncadd (%p7116_p3), [#allocation3], 4294967280 }
   0xd   : > { %258 = sfence }
   0xe   : > { %v347_v0 = vld [vmem:[%s12825_s2 + $0xf0] sm:$0xff]  ;;  %v345_v1 = vld [vmem:[%s12825_s2 + $0xe0] sm:$0xff]  ;;  %s7441_s30 = sshll.u32 %s7091_s25, 1  ;;  %vm513_vm0 = vcmask 130048   ;;  %s11308_s15 = sld [smem:[#allocation2]]  ;;  %vm7020_vm3 = vcmask 7168  }
   0xf   : > { %v343_v2 = vld [vmem:[%s12825_s2 + $0xd0] sm:$0xff]  ;;  %v7226_v3 = vand.u32 4294901760, %v347_v0  ;;  %v7228_v4 = vand.u32 4294901760, %v345_v1  ;;  %v341_v6 = vld [vmem:[%s12825_s2 + $0xc0] sm:$0xff]  ;;  %p287_p6 = scmp.lt.s32.totalorder %s7441_s30, 7  ;;  %s7102_s18 = sld [smem:[#allocation2 + $0x1]] }
  0x10   : > { %v7230_v5 = vand.u32 4294901760, %v343_v2  ;;  %v339_v7 = vld [vmem:[%s12825_s2 + $0xb0] sm:$0xff]  ;;  %v337_v8 = vld [vmem:[%s12825_s2 + $0xa0] sm:$0xff]  ;;  %v7241_v9 = vand.u32 4294901760, %v341_v6  ;;  %s7103_s23 = sld [smem:[#allocation2 + $0x2]] }
  0x11   : > { %v7243_v10 = vand.u32 4294901760, %v339_v7  ;;  %v7245_v11 = vand.u32 4294901760, %v337_v8  ;;  %v335_v12 = vld [vmem:[%s12825_s2 + $0x90] sm:$0xff]  ;;  %v333_v13 = vld [vmem:[%s12825_s2 + $0x80] sm:$0xff]  ;;  %521 = vmatpush.msra.mxu0 %v7226_v3  ;;  %734 = vmatpush.msra.mxu3 %v7226_v3  ;;  %v7256_v14 = vsub.f32 %v347_v0, %v7226_v3  ;;  %v7259_v15 = vsub.f32 %v345_v1, %v7228_v4  ;;  %s13555_s30 = smov (!%p287_p6, %s7441_s30), 7 }
  0x12   : > { %v7262_v16 = vsub.f32 %v343_v2, %v7230_v5  ;;  %v7264_v17 = vand.u32 4294901760, %v335_v12  ;;  %v331_v18 = vld [vmem:[%s12825_s2 + $0x70] sm:$0xff]  ;;  %v7270_v19 = vsub.f32 %v341_v6, %v7241_v9  ;;  %v7275_v21 = vand.u32 4294901760, %v333_v13  ;;  %v329_v26 = vld [vmem:[%s12825_s2 + $0x60] sm:$0xff]  ;;  %s7107_s19 = smul.u32 56, %s13555_s30  ;;  %s7101_s26 = sshll.u32 %s13555_s30, 3 }
  0x13   : > { %v7273_v20 = vsub.f32 %v339_v7, %v7243_v10  ;;  %523 = vmatpush.msra.mxu0 %v7228_v4  ;;  %676 = vmatpush.msra.mxu2 %v7256_v14  ;;  %v12845_v22 = vand.u32 4294901760, %v7256_v14  ;;  %v12844_v23 = vand.u32 4294901760, %v7259_v15  ;;  %v7283_v25 = vsub.f32 %v337_v8, %v7245_v11  ;;  %v327_v36 = vld [vmem:[%s12825_s2 + $0x50] sm:$0xff]  ;;  %v325_v42 = vld [vmem:[%s12825_s2 + $0x40] sm:$0xff]  ;;  %s297_s8 = scalar_lea.vmem %s12830_s7, %s7101_s26 }
  0x14   : > { %v12843_v24 = vand.u32 4294901760, %v7262_v16  ;;  %736 = vmatpush.msra.mxu3 %v7228_v4  ;;  %v12840_v27 = vand.u32 4294901760, %v7270_v19  ;;  %v7291_v28 = vsub.f32 %v335_v12, %v7264_v17  ;;  %v7293_v29 = vand.u32 4294901760, %v331_v18  ;;  %v323_v52 = vld [vmem:[%s12825_s2 + $0x30] sm:$0xff]  ;;  %v321_v54 = vld [vmem:[%s12825_s2 + $0x20] sm:$0xff]  ;;  %s7586_s28 = scalar_lea.vmem %s12824_s1, %s7107_s19 }
  0x15   : > { %525 = vmatpush.msra.mxu0 %v7230_v5  ;;  %679 = vmatpush.msra.mxu2 %v7259_v15  ;;  %v572_v30 = vsub.f32 %v7256_v14, %v12845_v22  ;;  %v578_v31 = vsub.f32 %v7259_v15, %v12844_v23  ;;  %v12839_v33 = vand.u32 4294901760, %v7273_v20  ;;  %v7309_v34 = vsub.f32 %v333_v13, %v7275_v21  ;;  %v379_v55 = vld [vmem:[%s12825_s2 + $0x1f0] sm:$0xff]  ;;  %v377_v59 = vld [vmem:[%s12825_s2 + $0x1e0] sm:$0xff] }
  0x16   : > { %v584_v32 = vsub.f32 %v7262_v16, %v12843_v24  ;;  %738 = vmatpush.msra.mxu3 %v7230_v5  ;;  %v7311_v35 = vand.u32 4294901760, %v329_v26  ;;  %v590_v39 = vsub.f32 %v7270_v19, %v12840_v27  ;;  %v12838_v40 = vand.u32 4294901760, %v7283_v25  ;;  %v319_v63 = vld [vmem:[%s12825_s2 + $0x10] sm:$0xff]  ;;  %v317_v12 = vld [vmem:[%s12825_s2] sm:$0xff] }
  0x17   : > { %527 = vmatpush.msra.mxu0 %v7241_v9  ;;  %682 = vmatpush.msra.mxu2 %v7262_v16  ;;  %v573_v37 = vand.u32 4294901760, %v572_v30  ;;  %v579_v38 = vand.u32 4294901760, %v578_v31  ;;  %v7324_v41 = vsub.f32 %v331_v18, %v7293_v29  ;;  %v596_v44 = vsub.f32 %v7273_v20, %v12839_v33  ;;  %v375_v7 = vld [vmem:[%s12825_s2 + $0x1d0] sm:$0xff]  ;;  %v373_v18 = vld [vmem:[%s12825_s2 + $0x1c0] sm:$0xff] }
  0x18   : > { %740 = vmatpush.msra.mxu3 %v7241_v9  ;;  %v585_v43 = vand.u32 4294901760, %v584_v32  ;;  %v7333_v45 = vand.u32 4294901760, %v327_v36  ;;  %v12836_v46 = vand.u32 4294901760, %v7291_v28  ;;  %v7339_v47 = vsub.f32 %v329_v26, %v7311_v35 }
  0x19   : > { %529 = vmatpush.msra.mxu0 %v7243_v10  ;;  %574 = vmatpush.msra.mxu1 %v573_v37  ;;  %v12835_v48 = vand.u32 4294901760, %v7309_v34  ;;  %v591_v49 = vand.u32 4294901760, %v590_v39  ;;  %v602_v50 = vsub.f32 %v7283_v25, %v12838_v40  ;;  %v7346_v51 = vand.u32 4294901760, %v325_v42 }
  0x1a   : > { %685 = vmatpush.msra.mxu2 %v7270_v19  ;;  %742 = vmatpush.msra.mxu3 %v7243_v10  ;;  %v12833_v53 = vand.u32 4294901760, %v7324_v41  ;;  %v597_v56 = vand.u32 4294901760, %v596_v44  ;;  %v608_v57 = vsub.f32 %v7291_v28, %v12836_v46  ;;  %v7365_v58 = vsub.f32 %v327_v36, %v7333_v45  ;;  %v365_v46 = vld [vmem:[%s12825_s2 + $0x180] sm:$0xff] }
  0x1b   : > { %531 = vmatpush.msra.mxu0 %v7245_v11  ;;  %580 = vmatpush.msra.mxu1 %v579_v38  ;;  %v614_v60 = vsub.f32 %v7309_v34, %v12835_v48  ;;  %v7375_v61 = vand.u32 4294901760, %v323_v52  ;;  %v12832_v62 = vand.u32 4294901760, %v7339_v47  ;;  %v603_v0 = vand.u32 4294901760, %v602_v50 }
  0x1c   : > { %688 = vmatpush.msra.mxu2 %v7273_v20  ;;  %744 = vmatpush.msra.mxu3 %v7245_v11  ;;  %v7383_v1 = vsub.f32 %v325_v42, %v7346_v51  ;;  %v7385_v2 = vand.u32 4294901760, %v321_v54  ;;  %v7387_v6 = vand.u32 4294901760, %v379_v55  ;;  %v620_v8 = vsub.f32 %v7324_v41, %v12833_v53  ;;  %v371_v42 = vld [vmem:[%s12825_s2 + $0x1b0] sm:$0xff] }
  0x1d   : > { %533 = vmatpush.msra.mxu0 %v7264_v17  ;;  %586 = vmatpush.msra.mxu1 %v585_v43  ;;  %v7400_v13 = vand.u32 4294901760, %v377_v59  ;;  %v609_v26 = vand.u32 4294901760, %v608_v57  ;;  %v7406_v30 = vand.u32 4294901760, %v319_v63  ;;  %v12831_v31 = vand.u32 4294901760, %v7365_v58 }
  0x1e   : > { %691 = vmatpush.msra.mxu2 %v7283_v25  ;;  %746 = vmatpush.msra.mxu3 %v7264_v17  ;;  %13084 = vst [vmem:[#allocation5_spill] sm:$0xff] %v7385_v2  ;;  %v7410_v32 = vsub.f32 %v379_v55, %v7387_v6  ;;  %v615_v36 = vand.u32 4294901760, %v614_v60  ;;  %v626_v37 = vsub.f32 %v7339_v47, %v12832_v62  ;;  %v7420_v39 = vand.u32 4294901760, %v375_v7 }
  0x1f   : > { %535 = vmatpush.msra.mxu0 %v7275_v21  ;;  %592 = vmatpush.msra.mxu1 %v591_v49  ;;  %13085 = vst [vmem:[#allocation6_spill] sm:$0xff] %v7406_v30  ;;  %v7418_v38 = vsub.f32 %v323_v52, %v7375_v61  ;;  %v7427_v43 = vsub.f32 %v321_v54, %v7385_v2  ;;  %v7429_v44 = vand.u32 4294901760, %v317_v12  ;;  %v12834_v49 = vand.u32 4294901760, %v7383_v1 }
  0x20   : > { %694 = vmatpush.msra.mxu2 %v7291_v28  ;;  %748 = vmatpush.msra.mxu3 %v7275_v21  ;;  %v7432_v50 = vand.u32 4294901760, %v373_v18  ;;  %v621_v52 = vand.u32 4294901760, %v620_v8  ;;  %v7437_v55 = vsub.f32 %v377_v59, %v7400_v13  ;;  %v632_v54 = vsub.f32 %v7365_v58, %v12831_v31  ;;  %v369_v59 = vld [vmem:[%s12825_s2 + $0x1a0] sm:$0xff] }
  0x21   : > { %537 = vmatpush.msra.mxu0 %v7293_v29  ;;  %598 = vmatpush.msra.mxu1 %v597_v56  ;;  %13086 = vst [vmem:[#allocation7_spill] sm:$0xff] %v7429_v44  ;;  %v7448_v56 = vsub.f32 %v319_v63, %v7406_v30  ;;  %v12837_v57 = vand.u32 4294901760, %v7410_v32  ;;  %v7451_v60 = vand.u32 4294901760, %v371_v42  ;;  %v12841_v8 = vand.u32 4294901760, %v7418_v38 }
  0x22   : > { %697 = vmatpush.msra.mxu2 %v7309_v34  ;;  %750 = vmatpush.msra.mxu3 %v7293_v29  ;;  %v638_v63 = vsub.f32 %v7383_v1, %v12834_v49  ;;  %v7467_v31 = vsub.f32 %v317_v12, %v7429_v44  ;;  %v12842_v62 = vand.u32 4294901760, %v7427_v43  ;;  %v7471_v53 = vsub.f32 %v373_v18, %v7432_v50 }
  0x23   : > { %539 = vmatpush.msra.mxu0 %v7311_v35  ;;  %604 = vmatpush.msra.mxu1 %v603_v0  ;;  %v627_v0 = vand.u32 4294901760, %v626_v37  ;;  %v7480_v37 = vand.u32 4294901760, %v369_v59  ;;  %v633_v12 = vand.u32 4294901760, %v632_v54  ;;  %v944_v18 = vsub.f32 %v7410_v32, %v12837_v57 }
  0x24   : > { %700 = vmatpush.msra.mxu2 %v7324_v41  ;;  %752 = vmatpush.msra.mxu3 %v7311_v35  ;;  %13088 = vst [vmem:[#allocation9_spill] sm:$0xff] %v7471_v53  ;;  %v12847_v49 = vand.u32 4294901760, %v7448_v56  ;;  %v7488_v48 = vsub.f32 %v371_v42, %v7451_v60  ;;  %v639_v42 = vand.u32 4294901760, %v638_v63  ;;  %v650_v40 = vsub.f32 %v7427_v43, %v12842_v62 }
  0x25   : > { %541 = vmatpush.msra.mxu0 %v7333_v45  ;;  %610 = vmatpush.msra.mxu1 %v609_v26  ;;  %v7460_v26 = vsub.f32 %v375_v7, %v7420_v39  ;;  %v367_v7 = vld [vmem:[%s12825_s2 + $0x190] sm:$0xff]  ;;  %v12850_v33 = vand.u32 4294901760, %v7471_v53  ;;  %v7521_v63 = vsub.f32 %v369_v59, %v7480_v37  ;;  %v7523_v62 = vand.u32 4294901760, %v365_v46 }
  0x26   : > { %703 = vmatpush.msra.mxu2 %v7339_v47  ;;  %754 = vmatpush.msra.mxu3 %v7333_v45  ;;  %v7499_v57 = vand.u32 4294901760, %v367_v7  ;;  %v945_v24 = vand.u32 4294901760, %v944_v18  ;;  %v656_v23 = vsub.f32 %v7448_v56, %v12847_v49  ;;  %v651_v49 = vand.u32 4294901760, %v650_v40 }
  0x27   : > { %13087 = vst [vmem:[#allocation8_spill] sm:$0xff] %v7460_v26  ;;  %543 = vmatpush.msra.mxu0 %v7346_v51  ;;  %616 = vmatpush.msra.mxu1 %v615_v36  ;;  %v12846_v36 = vand.u32 4294901760, %v7437_v55  ;;  %v12849_v54 = vand.u32 4294901760, %v7460_v26  ;;  %v962_v22 = vsub.f32 %v7471_v53, %v12850_v33  ;;  %v13090_v53 = vand.u32 4294901760, %v7256_v14 }
  0x28   : > { %706 = vmatpush.msra.mxu2 %v7365_v58  ;;  %756 = vmatpush.msra.mxu3 %v7346_v51  ;;  %v7539_v18 = vsub.f32 %v367_v7, %v7499_v57 }
  0x29   : > { %545 = vmatpush.msra.mxu0 %v7375_v61  ;;  %622 = vmatpush.msra.mxu1 %v621_v52  ;;  %v644_v52 = vsub.f32 %v7418_v38, %v12841_v8  ;;  %v363_v8 = vld [vmem:[%s12825_s2 + $0x170] sm:$0xff] }
  0x2a   : > { %709 = vmatpush.msra.mxu2 %v7383_v1  ;;  %758 = vmatpush.msra.mxu3 %v7375_v61  ;;  %v7541_v27 = vand.u32 4294901760, %v363_v8  ;;  %v12857_v40 = vand.u32 4294901760, %v7539_v18 }
  0x2b   : > { %547 = vmatpush.msra.mxu0 %v7385_v2  ;;  %628 = vmatpush.msra.mxu1 %v627_v0  ;;  %v950_v0 = vsub.f32 %v7437_v55, %v12846_v36  ;;  %v361_v36 = vld [vmem:[%s12825_s2 + $0x160] sm:$0xff]  ;;  %v645_v59 = vand.u32 4294901760, %v644_v52 }
  0x2c   : > { %712 = vmatpush.msra.mxu2 %v7418_v38  ;;  %760 = vmatpush.msra.mxu3 %v7385_v2  ;;  %v7560_v33 = vand.u32 4294901760, %v361_v36 }
  0x2d   : > { %549 = vmatpush.msra.mxu0 %v7406_v30  ;;  %634 = vmatpush.msra.mxu1 %v633_v12  ;;  %v956_v12 = vsub.f32 %v7460_v26, %v12849_v54  ;;  %v359_v54 = vld [vmem:[%s12825_s2 + $0x150] sm:$0xff]  ;;  %v951_v7 = vand.u32 4294901760, %v950_v0  ;;  %v13091_v26 = vand.u32 4294901760, %v7488_v48  ;;  %v357_v0 = vld [vmem:[%s12825_s2 + $0x140] sm:$0xff] }
  0x2e   : > { %715 = vmatpush.msra.mxu2 %v7427_v43  ;;  %762 = vmatpush.msra.mxu3 %v7406_v30  ;;  %v13089_v30 = vand.u32 4294901760, %v7467_v31  ;;  %v7575_v14 = vand.u32 4294901760, %v359_v54 }
  0x2f   : > { %551 = vmatpush.msra.mxu0 %v7429_v44  ;;  %640 = vmatpush.msra.mxu1 %v639_v42  ;;  %v7558_v42 = vsub.f32 %v365_v46, %v7523_v62  ;;  %v968_v2 = vsub.f32 %v7488_v48, %v13091_v26  ;;  %v957_v46 = vand.u32 4294901760, %v956_v12  ;;  %v355_v26 = vld [vmem:[%s12825_s2 + $0x130] sm:$0xff]  ;;  %v7595_v12 = vand.u32 4294901760, %v357_v0 }
  0x30   : > { %v662_v52 = vsub.f32 %v7467_v31, %v13089_v30  ;;  %718 = vmatpush.msra.mxu2 %v7448_v56  ;;  %764 = vmatpush.msra.mxu3 %v7429_v44  ;;  %v657_v30 = vand.u32 4294901760, %v656_v23  ;;  %v7573_v44 = vsub.f32 %v363_v8, %v7541_v27  ;;  %v13092_v23 = vand.u32 4294901760, %v7259_v15 }
  0x31   : > { %781 = vmatpush.msrb.mxu0 %v13090_v53  ;;  %646 = vmatpush.msra.mxu1 %v645_v59  ;;  %v13093_v8 = vand.u32 4294901760, %v7521_v63  ;;  %v303_v59 = vld [vmem:[%s7586_s28] sm:$0xff] }
  0x32   : > { %946 = vmatpush.msrb.mxu3 %v945_v24  ;;  %721 = vmatpush.msra.mxu2 %v7467_v31  ;;  %v963_v24 = vand.u32 4294901760, %v962_v22  ;;  %v663_v53 = vand.u32 4294901760, %v662_v52  ;;  %v7593_v22 = vsub.f32 %v361_v36, %v7560_v33  ;;  %v13094_v52 = vand.u32 4294901760, %v7262_v16  ;;  %v353_v16 = vld [vmem:[%s12825_s2 + $0x120] sm:$0xff] }
  0x33   : > { %785 = vmatpush.msrb.mxu0 %v13092_v23  ;;  %652 = vmatpush.msra.mxu1 %v651_v49  ;;  %v974_v15 = vsub.f32 %v7521_v63, %v13093_v8  ;;  %v969_v23 = vand.u32 4294901760, %v968_v2  ;;  %v980_v49 = vsub.f32 %v7539_v18, %v12857_v40  ;;  %v7605_v8 = vsub.f32 %v359_v54, %v7575_v14 }
  0x34   : > { %893 = vmatpush.msrb.mxu2 %v7387_v6  ;;  %952 = vmatpush.msrb.mxu3 %v951_v7  ;;  %v7607_v36 = vand.u32 4294901760, %v355_v26  ;;  %v13095_v2 = vand.u32 4294901760, %v7270_v19  ;;  %v7621_v40 = vsub.f32 %v357_v0, %v7595_v12  ;;  %v13097_v7 = vand.u32 4294901760, %v7273_v20 }
  0x35   : > { %789 = vmatpush.msrb.mxu0 %v13094_v52  ;;  %658 = vmatpush.msra.mxu1 %v657_v30  ;;  %v975_v30 = vand.u32 4294901760, %v974_v15  ;;  %v997_v52 = vand.u32 4294901760, %v7593_v22  ;;  %v7626_v19 = vand.u32 4294901760, %v303_v59  ;;  %v13099_v0 = vand.u32 4294901760, %v7573_v44 }
  0x36   : > { %895 = vmatpush.msrb.mxu2 %v7400_v13  ;;  %958 = vmatpush.msrb.mxu3 %v957_v46  ;;  %v13096_v46 = vand.u32 4294901760, %v7558_v42  ;;  %v12858_v20 = vand.u32 4294901760, %v7605_v8 }
  0x37   : > { %793 = vmatpush.msrb.mxu0 %v13095_v2  ;;  %664 = vmatpush.msra.mxu1 %v663_v53  ;;  %13098 = vst [vmem:[#allocation10_spill] sm:$0xff] %v7626_v19  ;;  %v7628_v2 = vand.u32 4294901760, %v353_v16  ;;  %v981_v53 = vand.u32 4294901760, %v980_v49  ;;  %v992_v15 = vsub.f32 %v7573_v44, %v13099_v0  ;;  %v998_v49 = vsub.f32 %v7593_v22, %v997_v52 }
  0x38   : > { %897 = vmatpush.msrb.mxu2 %v7420_v39  ;;  %964 = vmatpush.msrb.mxu3 %v963_v24  ;;  %v986_v54 = vsub.f32 %v7558_v42, %v13096_v46  ;;  %v351_v24 = vld [vmem:[%s12825_s2 + $0x110] sm:$0xff]  ;;  %v349_v46 = vld [vmem:[%s12825_s2 + $0x100] sm:$0xff] }
  0x39   : > { %797 = vmatpush.msrb.mxu0 %v13097_v7  ;;  %852 = vmatpush.msrb.mxu1 %v7226_v3  ;;  %v7639_v3 = vsub.f32 %v355_v26, %v7607_v36  ;;  %v13100_v7 = vand.u32 4294901760, %v7283_v25  ;;  %v1009_v26 = vand.u32 4294901760, %v7621_v40  ;;  %v7652_v0 = vand.u32 4294901760, %v351_v24 }
  0x3a   : > { %899 = vmatpush.msrb.mxu2 %v7432_v50  ;;  %970 = vmatpush.msrb.mxu3 %v969_v23  ;;  %v987_v23 = vand.u32 4294901760, %v986_v54  ;;  %v13101_v25 = vand.u32 4294901760, %v7291_v28  ;;  %v993_v54 = vand.u32 4294901760, %v992_v15  ;;  %v310_v15 = vld [vmem:[%s7586_s28 + $0x38] sm:$0xff] }
  0x3b   : > { %801 = vmatpush.msrb.mxu0 %v13100_v7  ;;  %854 = vmatpush.msrb.mxu1 %v7228_v4  ;;  %v7658_v4 = vsub.f32 %v303_v59, %v7626_v19  ;;  %v1004_v7 = vsub.f32 %v7605_v8, %v12858_v20  ;;  %v1015_v28 = vand.u32 4294901760, %v7639_v3  ;;  %v999_v59 = vand.u32 4294901760, %v998_v49 }
  0x3c   : > { %901 = vmatpush.msrb.mxu2 %v7451_v60  ;;  %976 = vmatpush.msrb.mxu3 %v975_v30  ;;  %v7661_v30 = vsub.f32 %v353_v16, %v7628_v2  ;;  %v1010_v16 = vsub.f32 %v7621_v40, %v1009_v26  ;;  %v13104_v20 = vand.u32 4294901760, %v7324_v41  ;;  %v13106_v41 = vand.u32 4294901760, %v7339_v47 }
  0x3d   : > { %805 = vmatpush.msrb.mxu0 %v13101_v25  ;;  %856 = vmatpush.msrb.mxu1 %v7230_v5  ;;  %13102 = vst [vmem:[#allocation11_spill] sm:$0xff] %v7658_v4  ;;  %v7668_v25 = vand.u32 4294901760, %v349_v46  ;;  %v13103_v5 = vand.u32 4294901760, %v7309_v34 }
  0x3e   : > { %903 = vmatpush.msrb.mxu2 %v7480_v37  ;;  %982 = vmatpush.msrb.mxu3 %v981_v53  ;;  %v7678_v53 = vsub.f32 %v351_v24, %v7652_v0  ;;  %v1021_v34 = vand.u32 4294901760, %v7661_v30  ;;  %v1016_v24 = vsub.f32 %v7639_v3, %v1015_v28 }
  0x3f   : > { %809 = vmatpush.msrb.mxu0 %v13103_v5  ;;  %858 = vmatpush.msrb.mxu1 %v7241_v9  ;;  %v7686_v9 = vand.u32 4294901760, %v7658_v4  ;;  %v7693_v49 = vsub.f32 %v349_v46, %v7668_v25 }
  0x40   : > { %905 = vmatpush.msrb.mxu2 %v7499_v57  ;;  %988 = vmatpush.msrb.mxu3 %v987_v23  ;;  %v1005_v23 = vand.u32 4294901760, %v1004_v7  ;;  %v13108_v7 = vand.u32 4294901760, %v7365_v58  ;;  %v1022_v47 = vsub.f32 %v7661_v30, %v1021_v34  ;;  %v1017_v46 = vand.u32 4294901760, %v1016_v24 }
  0x41   : > { %813 = vmatpush.msrb.mxu0 %v13104_v20  ;;  %860 = vmatpush.msrb.mxu1 %v7243_v10  ;;  %13105 = vst [vmem:[#allocation12_spill] sm:$0xff] %v7686_v9  ;;  %v7698_v10 = vand.u32 4294901760, %v310_v15  ;;  %v1011_v20 = vand.u32 4294901760, %v1010_v16  ;;  %v1033_v5 = vand.u32 4294901760, %v7693_v49  ;;  %v304_v16 = vld [vmem:[%s7586_s28 + $0x8] sm:$0xff] }
  0x42   : > { %907 = vmatpush.msrb.mxu2 %v7523_v62  ;;  %994 = vmatpush.msrb.mxu3 %v993_v54  ;;  %v1027_v54 = vand.u32 4294901760, %v7678_v53 }
  0x43   : > { %817 = vmatpush.msrb.mxu0 %v13106_v41  ;;  %862 = vmatpush.msrb.mxu1 %v7245_v11  ;;  %13107 = vst [vmem:[#allocation13_spill] sm:$0xff] %v7698_v10  ;;  %v555_v11 = vsub.f32 %v7658_v4, %v7686_v9  ;;  %v7738_v41 = vand.u32 4294901760, %v304_v16 }
  0x44   : > { %909 = vmatpush.msrb.mxu2 %v7541_v27  ;;  %1000 = vmatpush.msrb.mxu3 %v999_v59  ;;  %v13109_v59 = vand.u32 4294901760, %v7383_v1  ;;  %v1028_v58 = vsub.f32 %v7678_v53, %v1027_v54  ;;  %v1023_v1 = vand.u32 4294901760, %v1022_v47  ;;  %v13118_v47 = vand.u32 4294901760, %v7467_v31  ;;  %v13122_v31 = vld [vmem:[#allocation5_spill] sm:$0xff] }
  0x45   : > { %821 = vmatpush.msrb.mxu0 %v13108_v7  ;;  %864 = vmatpush.msrb.mxu1 %v7264_v17  ;;  %v7716_v17 = vsub.f32 %v310_v15, %v7698_v10  ;;  %v7726_v24 = vand.u32 4294901760, %v555_v11  ;;  %v13113_v15 = vand.u32 4294901760, %v7427_v43  ;;  %13115 = vst [vmem:[#allocation17_spill] sm:$0xff] %v7738_v41 }
  0x46   : > { %911 = vmatpush.msrb.mxu2 %v7560_v33  ;;  %1006 = vmatpush.msrb.mxu3 %v1005_v23  ;;  %v13111_v23 = vand.u32 4294901760, %v7418_v38 }
  0x47   : > { %825 = vmatpush.msrb.mxu0 %v13109_v59  ;;  %866 = vmatpush.msrb.mxu1 %v7275_v21  ;;  %13110 = vst [vmem:[#allocation14_spill] sm:$0xff] %v7716_v17  ;;  %v1034_v21 = vsub.f32 %v7693_v49, %v1033_v5  ;;  %v7736_v38 = vand.u32 4294901760, %v7716_v17  ;;  %v13126_v59 = vld [vmem:[#allocation9_spill] sm:$0xff] }
  0x48   : > { %913 = vmatpush.msrb.mxu2 %v7575_v14  ;;  %1012 = vmatpush.msrb.mxu3 %v1011_v20  ;;  %13112 = vst [vmem:[#allocation15_spill] sm:$0xff] %v7726_v24  ;;  %v13116_v20 = vand.u32 4294901760, %v7448_v56 }
  0x49   : > { %829 = vmatpush.msrb.mxu0 %v13111_v23  ;;  %868 = vmatpush.msrb.mxu1 %v7293_v29  ;;  %13114 = vst [vmem:[#allocation16_spill] sm:$0xff] %v7736_v38  ;;  %v1029_v29 = vand.u32 4294901760, %v1028_v58  ;;  %v1035_v43 = vand.u32 4294901760, %v1034_v21  ;;  %v563_v7 = vsub.f32 %v7716_v17, %v7736_v38  ;;  %v13129_v23 = vld [vmem:[#allocation7_spill] sm:$0xff] }
  0x4a   : > { %915 = vmatpush.msrb.mxu2 %v7595_v12  ;;  %1018 = vmatpush.msrb.mxu3 %v1017_v46  ;;  %v13124_v46 = vand.u32 4294901760, %v7437_v55 }
  0x4b   : > { %724 = vmatmul.f32.vlgmr.msra.gmra.mxu2 %v7658_v4  ;;  %833 = vmatpush.msrb.mxu0 %v13113_v15  ;;  %v13132_v15 = vand.u32 4294901760, %v7488_v48 }
  0x4c   : > { %870 = vmatpush.msrb.mxu1 %v7311_v35  ;;  %917 = vmatpush.msrb.mxu2 %v7607_v36  ;;  %v7751_v35 = vsub.f32 %v304_v16, %v7738_v41 }
  0x4d   : > { %1024 = vmatpush.msrb.mxu3 %v1023_v1  ;;  %557 = vmatmul.f32.vlgmr.msra.gmra.mxu0 %v7726_v24  ;;  %v311_v1 = vld [vmem:[%s7586_s28 + $0x40] sm:$0xff] }
  0x4e   : > { %768 = vmatmul.f32.vlgmr.msra.gmra.mxu3 %v7686_v9  ;;  %837 = vmatpush.msrb.mxu0 %v13116_v20  ;;  %13117 = vst [vmem:[#allocation18_spill] sm:$0xff] %v7751_v35  ;;  %v7763_v56 = vand.u32 4294901760, %v7751_v35  ;;  %v7798_v21 = vand.u32 4294901760, %v311_v1 }
  0x4f   : > { %872 = vmatpush.msrb.mxu1 %v7333_v45  ;;  %919 = vmatpush.msrb.mxu2 %v7628_v2  ;;  %v7760_v45 = vand.u32 4294901760, %v563_v7 }
  0x50   : > { %1030 = vmatpush.msrb.mxu3 %v1029_v29  ;;  %666 = vmatmul.f32.vlgmr.msra.gmra.mxu1 %v7626_v19  ;;  %13120 = vst [vmem:[#allocation20_spill] sm:$0xff] %v7763_v56  ;;  %v927_v11 = vsub.f32 %v7751_v35, %v7763_v56  ;;  %v7811_v29 = vsub.f32 %v311_v1, %v7798_v21 }
  0x51   : > { %841 = vmatpush.msrb.mxu0 %v13118_v47  ;;  %874 = vmatpush.msrb.mxu1 %v7346_v51  ;;  %13119 = vst [vmem:[#allocation19_spill] sm:$0xff] %v7760_v45  ;;  %v13121_v51 = vand.u32 4294901760, %v7410_v32 }
  0x52   : > { %921 = vmatpush.msrb.mxu2 %v7652_v0  ;;  %1036 = vmatpush.msrb.mxu3 %v1035_v43  ;;  %v7786_v16 = vand.u32 4294901760, %v927_v11 }
  0x53   : > { %1048 = vmatpush.msra.mxu0 %v7410_v32  ;;  %876 = vmatpush.msrb.mxu1 %v7375_v61  ;;  %v13123_v61 = vld [vmem:[#allocation8_spill] sm:$0xff]  ;;  %v13125_v32 = vld [vmem:[#allocation6_spill] sm:$0xff] }
  0x54   : > { %1224 = vmatpush.msra.mxu3 %v7387_v6  ;;  %923 = vmatpush.msrb.mxu2 %v7668_v25  ;;  %v13127_v58 = vand.u32 4294901760, %v13123_v61  ;;  %13128 = vst [vmem:[#allocation5_spill] sm:$0xff] %v7786_v16 }
  0x55   : > { %729 = vmatmul.f32.gmra.mxu2 %v7716_v17  ;;  %1051 = vmatpush.msra.mxu0 %v7437_v55  ;;  %v13130_v55 = vand.u32 4294901760, %v13126_v59  ;;  %13131 = vst [vmem:[#allocation8_spill] sm:$0xff] %v7798_v21 }
  0x56   : > { %1153 = vmatpush.msra.mxu2 %v13121_v51  ;;  %1226 = vmatpush.msra.mxu3 %v7400_v13  ;;  %13134 = vst [vmem:[#allocation6_spill] sm:$0xff] %v7811_v29 }
  0x57   : > { %878 = vmatpush.msrb.mxu1 %v13122_v31  ;;  %565 = vmatmul.f32.gmra.mxu0 %v7760_v45 }
  0x58   : > { %774 = vmatmul.f32.gmra.mxu3 %v7736_v38  ;;  %1054 = vmatpush.msra.mxu0 %v13123_v61  ;;  %v393_v61 = vld [vmem:[%s12825_s2 + $0x260] sm:$0xff] }
  0x59   : > { %1157 = vmatpush.msra.mxu2 %v13124_v46  ;;  %1228 = vmatpush.msra.mxu3 %v7420_v39 }
  0x5a   : > { %880 = vmatpush.msrb.mxu1 %v13125_v32  ;;  %1057 = vmatpush.msra.mxu0 %v13126_v59  ;;  %v391_v59 = vld [vmem:[%s12825_s2 + $0x250] sm:$0xff] }
  0x5b   : > { %670 = vmatmul.f32.gmra.mxu1 %v7698_v10  ;;  %1161 = vmatpush.msra.mxu2 %v13127_v58 }
  0x5c   : > { %1230 = vmatpush.msra.mxu3 %v7432_v50  ;;  %882 = vmatpush.msrb.mxu1 %v13129_v23 }
  0x5d   : > { %1060 = vmatpush.msra.mxu0 %v7488_v48  ;;  %1165 = vmatpush.msra.mxu2 %v13130_v55  ;;  %v13135_v48 = vand.u32 4294901760, %v7539_v18  ;;  %v7986_v55 = vand.u32 4294901760, %v393_v61 }
  0x5e   : > { %1106 = vmatpush.msra.mxu1 %v7387_v6  ;;  %1232 = vmatpush.msra.mxu3 %v7451_v60  ;;  %v13133_v6 = vand.u32 4294901760, %v7521_v63 }
  0x5f   : > { %929 = vmatmul.f32.vlgmr.msrb.gmra.mxu2 %v7786_v16  ;;  %1063 = vmatpush.msra.mxu0 %v7521_v63  ;;  %v409_v63 = vld [vmem:[%s12825_s2 + $0x2e0] sm:$0xff] }
  0x60   : > { %1108 = vmatpush.msra.mxu1 %v7400_v13  ;;  %1169 = vmatpush.msra.mxu2 %v13132_v15  ;;  %v7823_v13 = vand.u32 4294901760, %v7811_v29 }
  0x61   : > { %1234 = vmatpush.msra.mxu3 %v7480_v37  ;;  %843 = vmatmul.f32.vlgmr.msrb.gmra.mxu0 %v7626_v19 }
  0x62   : > { %1038 = vmatmul.f32.vlgmr.msrb.gmra.mxu3 %v7738_v41  ;;  %1066 = vmatpush.msra.mxu0 %v7539_v18  ;;  %13136 = vst [vmem:[#allocation9_spill] sm:$0xff] %v7823_v13  ;;  %v7868_v18 = vand.u32 4294901760, %v409_v63 }
  0x63   : > { %1110 = vmatpush.msra.mxu1 %v7420_v39  ;;  %1173 = vmatpush.msra.mxu2 %v13133_v6  ;;  %v13137_v39 = vand.u32 4294901760, %v7558_v42  ;;  %v7990_v6 = vand.u32 4294901760, %v391_v59 }
  0x64   : > { %1236 = vmatpush.msra.mxu3 %v7499_v57  ;;  %884 = vmatmul.f32.vlgmr.msrb.gmra.mxu1 %v7626_v19  ;;  %v429_v19 = vld [vmem:[%s12825_s2 + $0x380] sm:$0xff] }
  0x65   : > { %1069 = vmatpush.msra.mxu0 %v7558_v42  ;;  %1112 = vmatpush.msra.mxu1 %v7432_v50  ;;  %v13138_v50 = vand.u32 4294901760, %v7573_v44  ;;  %v405_v42 = vld [vmem:[%s12825_s2 + $0x2c0] sm:$0xff] }
  0x66   : > { %1177 = vmatpush.msra.mxu2 %v13135_v48  ;;  %1238 = vmatpush.msra.mxu3 %v7523_v62  ;;  %v389_v48 = vld [vmem:[%s12825_s2 + $0x240] sm:$0xff] }
  0x67   : > { %1072 = vmatpush.msra.mxu0 %v7573_v44  ;;  %1114 = vmatpush.msra.mxu1 %v7451_v60  ;;  %v935_v60 = vsub.f32 %v7811_v29, %v7823_v13  ;;  %v411_v44 = vld [vmem:[%s12825_s2 + $0x2f0] sm:$0xff] }
  0x68   : > { %1181 = vmatpush.msra.mxu2 %v13137_v39  ;;  %1240 = vmatpush.msra.mxu3 %v7541_v27 }
  0x69   : > { %1075 = vmatpush.msra.mxu0 %v7593_v22  ;;  %1116 = vmatpush.msra.mxu1 %v7480_v37  ;;  %v13139_v37 = vand.u32 4294901760, %v7605_v8  ;;  %v403_v22 = vld [vmem:[%s12825_s2 + $0x2b0] sm:$0xff] }
  0x6a   : > { %1185 = vmatpush.msra.mxu2 %v13138_v50  ;;  %1242 = vmatpush.msra.mxu3 %v7560_v33 }
  0x6b   : > { %1078 = vmatpush.msra.mxu0 %v7605_v8  ;;  %1118 = vmatpush.msra.mxu1 %v7499_v57  ;;  %v7850_v57 = vand.u32 4294901760, %v935_v60  ;;  %v7896_v8 = vand.u32 4294901760, %v405_v42 }
  0x6c   : > { %1189 = vmatpush.msra.mxu2 %v997_v52  ;;  %1244 = vmatpush.msra.mxu3 %v7575_v14 }
  0x6d   : > { %1081 = vmatpush.msra.mxu0 %v7621_v40  ;;  %1120 = vmatpush.msra.mxu1 %v7523_v62  ;;  %13140 = vst [vmem:[#allocation7_spill] sm:$0xff] %v7850_v57  ;;  %v7858_v62 = vand.u32 4294901760, %v411_v44 }
  0x6e   : > { %1193 = vmatpush.msra.mxu2 %v13139_v37  ;;  %1246 = vmatpush.msra.mxu3 %v7595_v12  ;;  %v443_v37 = vld [vmem:[%s12825_s2 + $0x3f0] sm:$0xff] }
  0x6f   : > { %847 = vmatmul.f32.gmra.mxu0 %v7698_v10  ;;  %1122 = vmatpush.msra.mxu1 %v7541_v27  ;;  %v407_v27 = vld [vmem:[%s12825_s2 + $0x2d0] sm:$0xff] }
  0x70   : > { %1084 = vmatpush.msra.mxu0 %v7639_v3  ;;  %1197 = vmatpush.msra.mxu2 %v1009_v26  ;;  %v7877_v40 = vand.u32 4294901760, %v407_v27  ;;  %v401_v26 = vld [vmem:[%s12825_s2 + $0x2a0] sm:$0xff] }
  0x71   : > { %1248 = vmatpush.msra.mxu3 %v7607_v36  ;;  %1124 = vmatpush.msra.mxu1 %v7560_v33  ;;  %v7875_v33 = vsub.f32 %v411_v44, %v7858_v62  ;;  %v305_v44 = vld [vmem:[%s7586_s28 + $0x10] sm:$0xff] }
  0x72   : > { %1087 = vmatpush.msra.mxu0 %v7661_v30  ;;  %1201 = vmatpush.msra.mxu2 %v1015_v28  ;;  %v7901_v52 = vsub.f32 %v407_v27, %v7877_v40  ;;  %v399_v28 = vld [vmem:[%s12825_s2 + $0x290] sm:$0xff] }
  0x73   : > { %1250 = vmatpush.msra.mxu3 %v7628_v2  ;;  %937 = vmatmul.f32.gmra.mxu2 %v7850_v57  ;;  %v12866_v3 = vand.u32 4294901760, %v7875_v33  ;;  %v7939_v20 = vand.u32 4294901760, %v399_v28  ;;  %v387_v27 = vld [vmem:[%s12825_s2 + $0x230] sm:$0xff] }
  0x74   : > { %1090 = vmatpush.msra.mxu0 %v7678_v53  ;;  %1126 = vmatpush.msra.mxu1 %v7575_v14  ;;  %v7888_v14 = vsub.f32 %v409_v63, %v7868_v18  ;;  %v7921_v53 = vsub.f32 %v405_v42, %v7896_v8 }
  0x75   : > { %1205 = vmatpush.msra.mxu2 %v1021_v34  ;;  %1252 = vmatpush.msra.mxu3 %v7652_v0  ;;  %v7923_v34 = vand.u32 4294901760, %v401_v26 }
  0x76   : > { %1042 = vmatmul.f32.gmra.mxu3 %v7798_v21  ;;  %1093 = vmatpush.msra.mxu0 %v7693_v49  ;;  %v12865_v30 = vand.u32 4294901760, %v7888_v14  ;;  %v1316_v49 = vsub.f32 %v7875_v33, %v12866_v3  ;;  %v12863_v51 = vand.u32 4294901760, %v7921_v53 }
  0x77   : > { %1128 = vmatpush.msra.mxu1 %v7595_v12  ;;  %1209 = vmatpush.msra.mxu2 %v1027_v54  ;;  %v7909_v12 = vand.u32 4294901760, %v403_v22  ;;  %v12864_v54 = vand.u32 4294901760, %v7901_v52  ;;  %v7954_v47 = vsub.f32 %v401_v26, %v7923_v34  ;;  %v8019_v26 = vsub.f32 %v393_v61, %v7986_v55 }
  0x78   : > { %1254 = vmatpush.msra.mxu3 %v7668_v25  ;;  %888 = vmatmul.f32.gmra.mxu1 %v7698_v10  ;;  %v1322_v43 = vsub.f32 %v7888_v14, %v12865_v30  ;;  %v1317_v31 = vand.u32 4294901760, %v1316_v49  ;;  %v1334_v1 = vsub.f32 %v7921_v53, %v12863_v51  ;;  %v8028_v49 = vsub.f32 %v391_v59, %v7990_v6 }
  0x79   : > { %1096 = vmatmul.f32.vlgmr.msra.gmra.mxu0 %v7751_v35  ;;  %1130 = vmatpush.msra.mxu1 %v7607_v36  ;;  %v397_v36 = vld [vmem:[%s12825_s2 + $0x280] sm:$0xff]  ;;  %v1328_v11 = vsub.f32 %v7901_v52, %v12864_v54  ;;  %v12860_v15 = vand.u32 4294901760, %v7954_v47  ;;  %v8039_v61 = vand.u32 4294901760, %v387_v27 }
  0x7a   : > { %1478 = vmatpush.msrb.mxu3 %v7858_v62  ;;  %1265 = vmatpush.msrb.mxu0 %v7858_v62  ;;  %v7946_v7 = vand.u32 4294901760, %v397_v36  ;;  %v1323_v58 = vand.u32 4294901760, %v1322_v43  ;;  %v1335_v42 = vand.u32 4294901760, %v1334_v1  ;;  %v8030_v43 = vand.u32 4294901760, %v305_v44  ;;  %v385_v1 = vld [vmem:[%s12825_s2 + $0x220] sm:$0xff] }
  0x7b   : > { %1213 = vmatpush.msra.mxu2 %v1033_v5  ;;  %1132 = vmatpush.msra.mxu1 %v7628_v2  ;;  %v7937_v5 = vsub.f32 %v403_v22, %v7909_v12  ;;  %v395_v2 = vld [vmem:[%s12825_s2 + $0x270] sm:$0xff]  ;;  %v1346_v22 = vsub.f32 %v7954_v47, %v12860_v15  ;;  %13142 = vst [vmem:[#allocation22_spill] sm:$0xff] %v8039_v61  ;;  %v12869_v15 = vand.u32 4294901760, %v8019_v26  ;;  %v8076_v30 = vand.u32 4294901760, %v385_v1 }
  0x7c   : > { %1480 = vmatpush.msrb.mxu3 %v7868_v18  ;;  %1267 = vmatpush.msrb.mxu0 %v7868_v18  ;;  %v7970_v46 = vand.u32 4294901760, %v395_v2  ;;  %v7979_v23 = vsub.f32 %v397_v36, %v7946_v7  ;;  %v441_v36 = vld [vmem:[%s12825_s2 + $0x3e0] sm:$0xff]  ;;  %13141 = vst [vmem:[#allocation21_spill] sm:$0xff] %v8030_v43 }
  0x7d   : > { %1420 = vmatpush.msrb.mxu2 %v7875_v33  ;;  %1134 = vmatpush.msra.mxu1 %v7652_v0  ;;  %v7968_v0 = vsub.f32 %v399_v28, %v7939_v20  ;;  %v12862_v32 = vand.u32 4294901760, %v7937_v5  ;;  %v8021_v28 = vand.u32 4294901760, %v389_v48  ;;  %13144 = vst [vmem:[#allocation24_spill] sm:$0xff] %v8076_v30 }
  0x7e   : > { %1215 = vmatmul.f32.vlgmr.msra.gmra.mxu2 %v7738_v41  ;;  %1269 = vmatpush.msrb.mxu0 %v7877_v40  ;;  %v8001_v50 = vsub.f32 %v395_v2, %v7970_v46  ;;  %v12861_v63 = vand.u32 4294901760, %v7979_v23  ;;  %v8032_v2 = vand.u32 4294901760, %v443_v37 }
  0x7f   : > { %1423 = vmatpush.msrb.mxu2 %v7888_v14  ;;  %1482 = vmatpush.msrb.mxu3 %v7877_v40  ;;  %v1340_v39 = vsub.f32 %v7937_v5, %v12862_v32  ;;  %v12859_v60 = vand.u32 4294901760, %v7968_v0  ;;  %v312_v32 = vld [vmem:[%s7586_s28 + $0x48] sm:$0xff] }
  0x80   : > { %1256 = vmatmul.f32.vlgmr.msra.gmra.mxu3 %v7738_v41  ;;  %1271 = vmatpush.msrb.mxu0 %v7896_v8  ;;  %v1358_v59 = vsub.f32 %v7979_v23, %v12861_v63  ;;  %v383_v63 = vld [vmem:[%s12825_s2 + $0x210] sm:$0xff] }
  0x81   : > { %1426 = vmatpush.msrb.mxu2 %v7901_v52  ;;  %1484 = vmatpush.msrb.mxu3 %v7896_v8 }
  0x82   : > { %1136 = vmatpush.msra.mxu1 %v7668_v25  ;;  %1273 = vmatpush.msrb.mxu0 %v7909_v12  ;;  %v1329_v25 = vand.u32 4294901760, %v1328_v11  ;;  %v1352_v11 = vsub.f32 %v7968_v0, %v12859_v60  ;;  %v8054_v60 = vsub.f32 %v389_v48, %v8021_v28  ;;  %v439_v48 = vld [vmem:[%s12825_s2 + $0x3d0] sm:$0xff] }
  0x83   : > { %1140 = vmatmul.f32.vlgmr.msra.gmra.mxu1 %v7763_v56  ;;  %1429 = vmatpush.msrb.mxu2 %v7921_v53 }
  0x84   : > { %1318 = vmatpush.msrb.mxu1 %v1317_v31  ;;  %1486 = vmatpush.msrb.mxu3 %v7909_v12  ;;  %v1341_v31 = vand.u32 4294901760, %v1340_v39  ;;  %v1347_v39 = vand.u32 4294901760, %v1346_v22  ;;  %v8067_v22 = vsub.f32 %v443_v37, %v8032_v2  ;;  %v1353_v51 = vand.u32 4294901760, %v1352_v11 }
  0x85   : > { %1275 = vmatpush.msrb.mxu0 %v7923_v34  ;;  %1432 = vmatpush.msrb.mxu2 %v7937_v5  ;;  %v1359_v37 = vand.u32 4294901760, %v1358_v59  ;;  %v8093_v11 = vand.u32 4294901760, %v383_v63  ;;  %v381_v59 = vld [vmem:[%s12825_s2 + $0x200] sm:$0xff] }
  0x86   : > { %1324 = vmatpush.msrb.mxu1 %v1323_v58  ;;  %1488 = vmatpush.msrb.mxu3 %v7923_v34  ;;  %v12867_v58 = vand.u32 4294901760, %v8001_v50 }
  0x87   : > { %1101 = vmatmul.f32.gmra.mxu0 %v7811_v29  ;;  %1219 = vmatmul.f32.gmra.mxu2 %v7798_v21  ;;  %13146 = vst [vmem:[#allocation26_spill] sm:$0xff] %v8093_v11  ;;  %v8113_v29 = vsub.f32 %v385_v1, %v8076_v30  ;;  %v13151_v1 = vand.u32 4294901760, %v8054_v60  ;;  %v8133_v41 = vsub.f32 %v383_v63, %v8093_v11  ;;  %v433_v63 = vld [vmem:[%s12825_s2 + $0x3a0] sm:$0xff] }
  0x88   : > { %1277 = vmatpush.msrb.mxu0 %v7939_v20  ;;  %1330 = vmatpush.msrb.mxu1 %v1329_v25  ;;  %v8050_v25 = vand.u32 4294901760, %v441_v36  ;;  %v1364_v54 = vsub.f32 %v8001_v50, %v12867_v58  ;;  %v8099_v58 = vand.u32 4294901760, %v439_v48  ;;  %v8175_v45 = vand.u32 4294901760, %v433_v63 }
  0x89   : > { %1435 = vmatpush.msrb.mxu2 %v7954_v47  ;;  %1490 = vmatpush.msrb.mxu3 %v7939_v20  ;;  %v1382_v57 = vsub.f32 %v8054_v60, %v13151_v1 }
  0x8a   : > { %1260 = vmatmul.f32.gmra.mxu3 %v7798_v21  ;;  %1279 = vmatpush.msrb.mxu0 %v7946_v7  ;;  %v8084_v3 = vsub.f32 %v441_v36, %v8050_v25  ;;  %v1365_v36 = vand.u32 4294901760, %v1364_v54  ;;  %v8123_v21 = vand.u32 4294901760, %v312_v32  ;;  %v435_v54 = vld [vmem:[%s12825_s2 + $0x3b0] sm:$0xff]  ;;  %v8136_v16 = vsub.f32 %v439_v48, %v8099_v58 }
  0x8b   : > { %1336 = vmatpush.msrb.mxu1 %v1335_v42  ;;  %1438 = vmatpush.msrb.mxu2 %v7968_v0  ;;  %v8064_v42 = vsub.f32 %v305_v44, %v8030_v43  ;;  %v8079_v44 = vsub.f32 %v387_v27, %v8039_v61  ;;  %v1370_v27 = vsub.f32 %v8019_v26, %v12869_v15  ;;  %v8156_v9 = vand.u32 4294901760, %v435_v54 }
  0x8c   : > { %1492 = vmatpush.msrb.mxu3 %v7946_v7  ;;  %1146 = vmatmul.f32.gmra.mxu1 %v7823_v13  ;;  %13145 = vst [vmem:[#allocation25_spill] sm:$0xff] %v8084_v3 }
  0x8d   : > { %13143 = vst [vmem:[#allocation23_spill] sm:$0xff] %v8064_v42  ;;  %1281 = vmatpush.msrb.mxu0 %v7970_v46  ;;  %1342 = vmatpush.msrb.mxu1 %v1341_v31  ;;  %v437_v31 = vld [vmem:[%s12825_s2 + $0x3c0] sm:$0xff]  ;;  %v8108_v15 = vand.u32 4294901760, %v8064_v42  ;;  %v13154_v48 = vand.u32 4294901760, %v8079_v44  ;;  %v8190_v10 = vsub.f32 %v435_v54, %v8156_v9 }
  0x8e   : > { %1441 = vmatpush.msrb.mxu2 %v7979_v23  ;;  %1494 = vmatpush.msrb.mxu3 %v7970_v46  ;;  %v8116_v56 = vand.u32 4294901760, %v437_v31  ;;  %13150 = vst [vmem:[#allocation29_spill] sm:$0xff] %v8123_v21 }
  0x8f   : > { %1283 = vmatpush.msrb.mxu0 %v7986_v55  ;;  %1348 = vmatpush.msrb.mxu1 %v1347_v39  ;;  %v13147_v39 = vand.u32 4294901760, %v8028_v49  ;;  %13148 = vst [vmem:[#allocation27_spill] sm:$0xff] %v8108_v15  ;;  %v1299_v38 = vsub.f32 %v8064_v42, %v8108_v15  ;;  %v1388_v1 = vsub.f32 %v8079_v44, %v13154_v48 }
  0x90   : > { %1444 = vmatpush.msrb.mxu2 %v8001_v50  ;;  %1496 = vmatpush.msrb.mxu3 %v7986_v55  ;;  %13152 = vst [vmem:[#allocation30_spill] sm:$0xff] %v8136_v16  ;;  %v8154_v17 = vsub.f32 %v437_v31, %v8116_v56  ;;  %v8167_v48 = vsub.f32 %v312_v32, %v8123_v21  ;;  %v431_v31 = vld [vmem:[%s12825_s2 + $0x390] sm:$0xff] }
  0x91   : > { %v1376_v13 = vsub.f32 %v8028_v49, %v13147_v39  ;;  %1285 = vmatpush.msrb.mxu0 %v7990_v6  ;;  %1354 = vmatpush.msrb.mxu1 %v1353_v51  ;;  %v8120_v39 = vand.u32 4294901760, %v381_v59  ;;  %v1371_v51 = vand.u32 4294901760, %v1370_v27  ;;  %v8179_v32 = vand.u32 4294901760, %v1299_v38  ;;  %13159 = vst [vmem:[#allocation33_spill] sm:$0xff] %v8190_v10 }
  0x92   : > { %1447 = vmatpush.msrb.mxu2 %v8019_v26  ;;  %1498 = vmatpush.msrb.mxu3 %v7990_v6  ;;  %13156 = vst [vmem:[#allocation31_spill] sm:$0xff] %v8167_v48  ;;  %v8192_v24 = vand.u32 4294901760, %v431_v31  ;;  %v1389_v38 = vand.u32 4294901760, %v1388_v1  ;;  %v427_v1 = vld [vmem:[%s12825_s2 + $0x370] sm:$0xff] }
  0x93   : > { %13149 = vst [vmem:[#allocation28_spill] sm:$0xff] %v8120_v39  ;;  %1287 = vmatpush.msrb.mxu0 %v8021_v28  ;;  %1360 = vmatpush.msrb.mxu1 %v1359_v37  ;;  %v1377_v35 = vand.u32 4294901760, %v1376_v13  ;;  %v13153_v37 = vand.u32 4294901760, %v8067_v22  ;;  %v1383_v13 = vand.u32 4294901760, %v1382_v57  ;;  %v13158_v57 = vand.u32 4294901760, %v8113_v29 }
  0x94   : > { %1450 = vmatpush.msrb.mxu2 %v8028_v49  ;;  %1500 = vmatpush.msrb.mxu3 %v8021_v28  ;;  %13157 = vst [vmem:[#allocation32_spill] sm:$0xff] %v8179_v32 }
  0x95   : > { %v1688_v27 = vsub.f32 %v8067_v22, %v13153_v37  ;;  %1289 = vmatpush.msrb.mxu0 %v8039_v61  ;;  %1366 = vmatpush.msrb.mxu1 %v1365_v36  ;;  %v8161_v37 = vsub.f32 %v381_v59, %v8120_v39  ;;  %v13155_v36 = vand.u32 4294901760, %v8084_v3  ;;  %v13162_v59 = vand.u32 4294901760, %v8133_v41 }
  0x96   : > { %1453 = vmatpush.msrb.mxu2 %v8054_v60  ;;  %1502 = vmatpush.msrb.mxu3 %v8039_v61  ;;  %v13164_v61 = vand.u32 4294901760, %v7875_v33 }
  0x97   : > { %v1694_v4 = vsub.f32 %v8084_v3, %v13155_v36  ;;  %1291 = vmatpush.msrb.mxu0 %v8076_v30  ;;  %1372 = vmatpush.msrb.mxu1 %v1371_v51  ;;  %v1689_v36 = vand.u32 4294901760, %v1688_v27  ;;  %v1394_v51 = vsub.f32 %v8113_v29, %v13158_v57  ;;  %v13161_v57 = vand.u32 4294901760, %v8136_v16 }
  0x98   : > { %1456 = vmatpush.msrb.mxu2 %v8079_v44  ;;  %1504 = vmatpush.msrb.mxu3 %v8076_v30  ;;  %v1400_v3 = vsub.f32 %v8133_v41, %v13162_v59  ;;  %v8223_v30 = vsub.f32 %v431_v31, %v8192_v24 }
  0x99   : > { %1293 = vmatpush.msrb.mxu0 %v8093_v11  ;;  %1378 = vmatpush.msrb.mxu1 %v1377_v35  ;;  %v1695_v27 = vand.u32 4294901760, %v1694_v4  ;;  %v8198_v35 = vand.u32 4294901760, %v8167_v48  ;;  %v1700_v54 = vsub.f32 %v8136_v16, %v13161_v57  ;;  %v8210_v4 = vand.u32 4294901760, %v429_v19  ;;  %v425_v16 = vld [vmem:[%s12825_s2 + $0x360] sm:$0xff] }
  0x9a   : > { %1459 = vmatpush.msrb.mxu2 %v8113_v29  ;;  %1506 = vmatpush.msrb.mxu3 %v8093_v11  ;;  %v8208_v11 = vsub.f32 %v433_v63, %v8175_v45  ;;  %v13163_v57 = vand.u32 4294901760, %v8154_v17  ;;  %v1401_v63 = vand.u32 4294901760, %v1400_v3 }
  0x9b   : > { %13160 = vst [vmem:[#allocation34_spill] sm:$0xff] %v8198_v35  ;;  %1295 = vmatpush.msrb.mxu0 %v8120_v39  ;;  %1384 = vmatpush.msrb.mxu1 %v1383_v13  ;;  %v1395_v13 = vand.u32 4294901760, %v1394_v51  ;;  %v1701_v31 = vand.u32 4294901760, %v1700_v54  ;;  %v8240_v33 = vsub.f32 %v429_v19, %v8210_v4 }
  0x9c   : > { %1462 = vmatpush.msrb.mxu2 %v8133_v41  ;;  %1508 = vmatpush.msrb.mxu3 %v8120_v39  ;;  %v1706_v59 = vsub.f32 %v8154_v17, %v13163_v57  ;;  %v1307_v57 = vsub.f32 %v8167_v48, %v8198_v35  ;;  %v421_v39 = vld [vmem:[%s12825_s2 + $0x340] sm:$0xff] }
  0x9d   : > { %1301 = vmatmul.f32.vlgmr.msrb.gmra.mxu0 %v8179_v32  ;;  %1390 = vmatpush.msrb.mxu1 %v1389_v38  ;;  %v8235_v32 = vand.u32 4294901760, %v427_v1  ;;  %v13166_v38 = vand.u32 4294901760, %v7888_v14  ;;  %v13168_v14 = vand.u32 4294901760, %v7901_v52  ;;  %v419_v52 = vld [vmem:[%s12825_s2 + $0x330] sm:$0xff] }
  0x9e   : > { %1690 = vmatpush.msra.mxu3 %v1689_v36  ;;  %1525 = vmatpush.msra.mxu0 %v13164_v61  ;;  %v13165_v36 = vand.u32 4294901760, %v8161_v37  ;;  %v423_v61 = vld [vmem:[%s12825_s2 + $0x350] sm:$0xff]  ;;  %v1707_v3 = vand.u32 4294901760, %v1706_v59 }
  0x9f   : > { %1465 = vmatpush.msrb.mxu2 %v8161_v37  ;;  %1396 = vmatpush.msrb.mxu1 %v1395_v13  ;;  %v8261_v13 = vand.u32 4294901760, %v1307_v57  ;;  %v8264_v59 = vsub.f32 %v427_v1, %v8235_v32  ;;  %v8281_v57 = vand.u32 4294901760, %v421_v39 }
  0xa0   : > { %v1406_v51 = vsub.f32 %v8161_v37, %v13165_v36  ;;  %1696 = vmatpush.msra.mxu3 %v1695_v27  ;;  %1529 = vmatpush.msra.mxu0 %v13166_v38  ;;  %v8248_v36 = vand.u32 4294901760, %v425_v16  ;;  %v13167_v27 = vand.u32 4294901760, %v8190_v10 }
  0xa1   : > { %1637 = vmatpush.msra.mxu2 %v8032_v2  ;;  %13169 = vst [vmem:[#allocation35_spill] sm:$0xff] %v8261_v13  ;;  %1402 = vmatpush.msrb.mxu1 %v1401_v63 }
  0xa2   : > { %1468 = vmatmul.f32.vlgmr.msrb.gmra.mxu2 %v8064_v42  ;;  %v1712_v19 = vsub.f32 %v8190_v10, %v13167_v27  ;;  %1533 = vmatpush.msra.mxu0 %v13168_v14  ;;  %v1407_v38 = vand.u32 4294901760, %v1406_v51  ;;  %v8266_v42 = vand.u32 4294901760, %v423_v61  ;;  %v13170_v27 = vand.u32 4294901760, %v8208_v11 }
  0xa3   : > { %1639 = vmatpush.msra.mxu2 %v8050_v25  ;;  %1702 = vmatpush.msra.mxu3 %v1701_v31  ;;  %v12901_v10 = vand.u32 4294901760, %v8240_v33  ;;  %v13171_v51 = vand.u32 4294901760, %v7921_v53  ;;  %v8279_v1 = vsub.f32 %v425_v16, %v8248_v36  ;;  %v13172_v31 = vand.u32 4294901760, %v8223_v30 }
  0xa4   : > { %v1718_v54 = vsub.f32 %v8208_v11, %v13170_v27  ;;  %1512 = vmatmul.f32.vlgmr.msrb.gmra.mxu3 %v8108_v15  ;;  %v1713_v63 = vand.u32 4294901760, %v1712_v19  ;;  %v417_v27 = vld [vmem:[%s12825_s2 + $0x320] sm:$0xff]  ;;  %1408 = vmatpush.msrb.mxu1 %v1407_v38  ;;  %v8293_v53 = vsub.f32 %v423_v61, %v8266_v42  ;;  %v415_v38 = vld [vmem:[%s12825_s2 + $0x310] sm:$0xff]  ;;  %v8310_v16 = vsub.f32 %v421_v39, %v8281_v57 }
  0xa5   : > { %1537 = vmatpush.msra.mxu0 %v13171_v51  ;;  %1641 = vmatpush.msra.mxu2 %v8099_v58  ;;  %v1724_v14 = vsub.f32 %v8223_v30, %v13172_v31  ;;  %v8295_v51 = vand.u32 4294901760, %v419_v52  ;;  %v1730_v31 = vsub.f32 %v8240_v33, %v12901_v10  ;;  %v413_v10 = vld [vmem:[%s12825_s2 + $0x300] sm:$0xff] }
  0xa6   : > { %1708 = vmatpush.msra.mxu3 %v1707_v3  ;;  %1309 = vmatmul.f32.gmra.mxu0 %v8261_v13  ;;  %v13173_v3 = vand.u32 4294901760, %v7937_v5  ;;  %v1719_v19 = vand.u32 4294901760, %v1718_v54  ;;  %v8312_v5 = vand.u32 4294901760, %v417_v27  ;;  %v13174_v54 = vand.u32 4294901760, %v7954_v47 }
  0xa7   : > { %1410 = vmatmul.f32.vlgmr.msrb.gmra.mxu1 %v8030_v43  ;;  %1643 = vmatpush.msra.mxu2 %v8116_v56  ;;  %v8328_v47 = vand.u32 4294901760, %v415_v38  ;;  %v1753_v61 = vand.u32 4294901760, %v8310_v16  ;;  %v8341_v15 = vand.u32 4294901760, %v413_v10 }
  0xa8   : > { %1541 = vmatpush.msra.mxu0 %v13173_v3  ;;  %1596 = vmatpush.msra.mxu1 %v7858_v62  ;;  %v1725_v3 = vand.u32 4294901760, %v1724_v14  ;;  %v13175_v62 = vand.u32 4294901760, %v8264_v59  ;;  %v1731_v14 = vand.u32 4294901760, %v1730_v31 }
  0xa9   : > { %1714 = vmatpush.msra.mxu3 %v1713_v63  ;;  %1645 = vmatpush.msra.mxu2 %v8156_v9  ;;  %v8326_v63 = vsub.f32 %v419_v52, %v8295_v51  ;;  %v8339_v52 = vsub.f32 %v417_v27, %v8312_v5  ;;  %v8352_v27 = vsub.f32 %v415_v38, %v8328_v47  ;;  %v13180_v38 = vand.u32 4294901760, %v8001_v50 }
  0xaa   : > { %1545 = vmatpush.msra.mxu0 %v13174_v54  ;;  %1598 = vmatpush.msra.mxu1 %v7868_v18  ;;  %v1736_v39 = vsub.f32 %v8264_v59, %v13175_v62  ;;  %v13176_v18 = vand.u32 4294901760, %v7968_v0  ;;  %v13177_v54 = vand.u32 4294901760, %v8279_v1  ;;  %v13178_v0 = vand.u32 4294901760, %v7979_v23 }
  0xab   : > { %1720 = vmatpush.msra.mxu3 %v1719_v19  ;;  %1473 = vmatmul.f32.gmra.mxu2 %v8167_v48  ;;  %v13179_v19 = vand.u32 4294901760, %v8293_v53 }
  0xac   : > { %1549 = vmatpush.msra.mxu0 %v13176_v18  ;;  %1600 = vmatpush.msra.mxu1 %v7877_v40  ;;  %v1742_v62 = vsub.f32 %v8279_v1, %v13177_v54  ;;  %v1737_v40 = vand.u32 4294901760, %v1736_v39  ;;  %v1759_v18 = vand.u32 4294901760, %v8326_v63  ;;  %v306_v54 = vld [vmem:[%s7586_s28 + $0x18] sm:$0xff]  ;;  %v1765_v39 = vand.u32 4294901760, %v8339_v52 }
  0xad   : > { %1647 = vmatpush.msra.mxu2 %v8175_v45  ;;  %1726 = vmatpush.msra.mxu3 %v1725_v3  ;;  %v1748_v31 = vsub.f32 %v8293_v53, %v13179_v19  ;;  %v1754_v3 = vsub.f32 %v8310_v16, %v1753_v61  ;;  %v1771_v19 = vand.u32 4294901760, %v8352_v27 }
  0xae   : > { %1518 = vmatmul.f32.gmra.mxu3 %v8198_v35  ;;  %1553 = vmatpush.msra.mxu0 %v13178_v0  ;;  %v1743_v23 = vand.u32 4294901760, %v1742_v62  ;;  %v8363_v0 = vsub.f32 %v413_v10, %v8341_v15  ;;  %v1760_v62 = vsub.f32 %v8326_v63, %v1759_v18  ;;  %v13182_v10 = vand.u32 4294901760, %v8019_v26 }
  0xaf   : > { %1602 = vmatpush.msra.mxu1 %v7896_v8  ;;  %1649 = vmatpush.msra.mxu2 %v8192_v24  ;;  %v8368_v8 = vand.u32 4294901760, %v306_v54  ;;  %v1766_v50 = vsub.f32 %v8339_v52, %v1765_v39 }
  0xb0   : > { %1732 = vmatpush.msra.mxu3 %v1731_v14  ;;  %1414 = vmatmul.f32.gmra.mxu1 %v8123_v21  ;;  %v1749_v14 = vand.u32 4294901760, %v1748_v31  ;;  %v13183_v31 = vand.u32 4294901760, %v8028_v49 }
  0xb1   : > { %1557 = vmatpush.msra.mxu0 %v13180_v38  ;;  %1604 = vmatpush.msra.mxu1 %v7909_v12  ;;  %13181 = vst [vmem:[#allocation36_spill] sm:$0xff] %v8368_v8  ;;  %v1755_v12 = vand.u32 4294901760, %v1754_v3  ;;  %v8387_v26 = vsub.f32 %v306_v54, %v8368_v8  ;;  %v13185_v3 = vand.u32 4294901760, %v8054_v60  ;;  %v313_v54 = vld [vmem:[%s7586_s28 + $0x50] sm:$0xff]  ;;  %v13186_v38 = vand.u32 4294901760, %v8079_v44 }
  0xb2   : > { %1651 = vmatpush.msra.mxu2 %v8210_v4  ;;  %1738 = vmatpush.msra.mxu3 %v1737_v40  ;;  %v1777_v40 = vand.u32 4294901760, %v8363_v0  ;;  %v13188_v60 = vand.u32 4294901760, %v8113_v29  ;;  %v13191_v29 = vand.u32 4294901760, %v8161_v37  ;;  %v13196_v37 = vld [vmem:[#allocation25_spill] sm:$0xff] }
  0xb3   : > { %1561 = vmatpush.msra.mxu0 %v13182_v10  ;;  %1606 = vmatpush.msra.mxu1 %v7923_v34  ;;  %13184 = vst [vmem:[#allocation37_spill] sm:$0xff] %v8387_v26  ;;  %v1761_v34 = vand.u32 4294901760, %v1760_v62  ;;  %v8411_v62 = vand.u32 4294901760, %v313_v54 }
  0xb4   : > { %1653 = vmatpush.msra.mxu2 %v8235_v32  ;;  %1744 = vmatpush.msra.mxu3 %v1743_v23  ;;  %v1772_v23 = vsub.f32 %v8352_v27, %v1771_v19  ;;  %v1778_v49 = vsub.f32 %v8363_v0, %v1777_v40 }
  0xb5   : > { %1565 = vmatpush.msra.mxu0 %v13183_v31  ;;  %1608 = vmatpush.msra.mxu1 %v7939_v20  ;;  %v1767_v20 = vand.u32 4294901760, %v1766_v50  ;;  %13189 = vst [vmem:[#allocation39_spill] sm:$0xff] %v8411_v62  ;;  %v13198_v50 = vld [vmem:[#allocation24_spill] sm:$0xff]  ;;  %v13199_v31 = vld [vmem:[#allocation30_spill] sm:$0xff] }
  0xb6   : > { %1655 = vmatpush.msra.mxu2 %v8248_v36  ;;  %1750 = vmatpush.msra.mxu3 %v1749_v14  ;;  %v8405_v14 = vand.u32 4294901760, %v8387_v26  ;;  %v1779_v44 = vand.u32 4294901760, %v1778_v49  ;;  %v13204_v49 = vld [vmem:[#allocation33_spill] sm:$0xff] }
  0xb7   : > { %1569 = vmatpush.msra.mxu0 %v13185_v3  ;;  %1610 = vmatpush.msra.mxu1 %v7946_v7  ;;  %v1773_v7 = vand.u32 4294901760, %v1772_v23  ;;  %v13201_v23 = vld [vmem:[#allocation26_spill] sm:$0xff] }
  0xb8   : > { %1657 = vmatpush.msra.mxu2 %v8266_v42  ;;  %1756 = vmatpush.msra.mxu3 %v1755_v12  ;;  %13187 = vst [vmem:[#allocation38_spill] sm:$0xff] %v8405_v14  ;;  %v1671_v10 = vsub.f32 %v8387_v26, %v8405_v14  ;;  %v13197_v12 = vand.u32 4294901760, %v8067_v22 }
  0xb9   : > { %1573 = vmatpush.msra.mxu0 %v13186_v38  ;;  %1612 = vmatpush.msra.mxu1 %v7970_v46  ;;  %v13190_v46 = vand.u32 4294901760, %v8133_v41  ;;  %v13206_v38 = vand.u32 4294901760, %v8154_v17 }
  0xba   : > { %1659 = vmatpush.msra.mxu2 %v8281_v57  ;;  %1762 = vmatpush.msra.mxu3 %v1761_v34  ;;  %v8429_v41 = vand.u32 4294901760, %v1671_v10  ;;  %v13200_v34 = vand.u32 4294901760, %v13196_v37 }
  0xbb   : > { %1577 = vmatpush.msra.mxu0 %v13188_v60  ;;  %1614 = vmatpush.msra.mxu1 %v7986_v55  ;;  %v8424_v55 = vsub.f32 %v313_v54, %v8411_v62 }
  0xbc   : > { %1661 = vmatpush.msra.mxu2 %v8295_v51  ;;  %1768 = vmatpush.msra.mxu3 %v1767_v20  ;;  %13193 = vst [vmem:[#allocation41_spill] sm:$0xff] %v8429_v41  ;;  %v13203_v20 = vld [vmem:[#allocation28_spill] sm:$0xff] }
  0xbd   : > { %1581 = vmatpush.msra.mxu0 %v13190_v46  ;;  %1616 = vmatpush.msra.mxu1 %v7990_v6  ;;  %13192 = vst [vmem:[#allocation40_spill] sm:$0xff] %v8424_v55  ;;  %v13194_v6 = vld [vmem:[#allocation22_spill] sm:$0xff] }
  0xbe   : > { %1663 = vmatpush.msra.mxu2 %v8312_v5  ;;  %1774 = vmatpush.msra.mxu3 %v1773_v7  ;;  %v13207_v7 = vand.u32 4294901760, %v13204_v49 }
  0xbf   : > { %1585 = vmatpush.msra.mxu0 %v13191_v29  ;;  %1618 = vmatpush.msra.mxu1 %v8021_v28  ;;  %v8436_v28 = vand.u32 4294901760, %v8424_v55 }
  0xc0   : > { %1665 = vmatpush.msra.mxu2 %v8328_v47  ;;  %1780 = vmatpush.msra.mxu3 %v1779_v44 }
  0xc1   : > { %1587 = vmatmul.f32.vlgmr.msra.gmra.mxu0 %v8030_v43  ;;  %1620 = vmatpush.msra.mxu1 %v13194_v6  ;;  %13195 = vst [vmem:[#allocation22_spill] sm:$0xff] %v8436_v28  ;;  %v1679_v3 = vsub.f32 %v8424_v55, %v8436_v28 }
  0xc2   : > { %1968 = vmatpush.msrb.mxu3 %v8032_v2  ;;  %1792 = vmatpush.msrb.mxu0 %v8067_v22  ;;  %v13202_v22 = vand.u32 4294901760, %v13199_v31 }
  0xc3   : > { %1667 = vmatpush.msra.mxu2 %v8341_v15  ;;  %1622 = vmatpush.msra.mxu1 %v13198_v50  ;;  %v8459_v54 = vand.u32 4294901760, %v1679_v3 }
  0xc4   : > { %1970 = vmatpush.msrb.mxu3 %v8050_v25  ;;  %1795 = vmatpush.msrb.mxu0 %v13196_v37  ;;  %v457_v37 = vld [vmem:[%s12825_s2 + $0x460] sm:$0xff] }
  0xc5   : > { %1897 = vmatpush.msrb.mxu2 %v13197_v12  ;;  %1624 = vmatpush.msra.mxu1 %v13201_v23  ;;  %13205 = vst [vmem:[#allocation25_spill] sm:$0xff] %v8459_v54  ;;  %v455_v23 = vld [vmem:[%s12825_s2 + $0x450] sm:$0xff] }
  0xc6   : > { %1673 = vmatmul.f32.vlgmr.msra.gmra.mxu2 %v8429_v41  ;;  %1798 = vmatpush.msrb.mxu0 %v13199_v31 }
  0xc7   : > { %1901 = vmatpush.msrb.mxu2 %v13200_v34  ;;  %1972 = vmatpush.msrb.mxu3 %v8099_v58 }
  0xc8   : > { %1782 = vmatmul.f32.vlgmr.msra.gmra.mxu3 %v8368_v8  ;;  %1801 = vmatpush.msrb.mxu0 %v8154_v17  ;;  %v13208_v17 = vand.u32 4294901760, %v8208_v11 }
  0xc9   : > { %1905 = vmatpush.msrb.mxu2 %v13202_v22  ;;  %1974 = vmatpush.msrb.mxu3 %v8116_v56 }
  0xca   : > { %1626 = vmatpush.msra.mxu1 %v13203_v20  ;;  %1591 = vmatmul.f32.gmra.mxu0 %v8123_v21 }
  0xcb   : > { %1628 = vmatmul.f32.vlgmr.msra.gmra.mxu1 %v8030_v43  ;;  %1804 = vmatpush.msrb.mxu0 %v13204_v49  ;;  %v453_v49 = vld [vmem:[%s12825_s2 + $0x440] sm:$0xff] }
  0xcc   : > { %1850 = vmatpush.msrb.mxu1 %v8032_v2  ;;  %1909 = vmatpush.msrb.mxu2 %v13206_v38  ;;  %v13209_v2 = vand.u32 4294901760, %v8223_v30 }
  0xcd   : > { %1976 = vmatpush.msrb.mxu3 %v8156_v9  ;;  %1807 = vmatpush.msrb.mxu0 %v8208_v11  ;;  %v471_v11 = vld [vmem:[%s12825_s2 + $0x4d0] sm:$0xff] }
  0xce   : > { %1852 = vmatpush.msrb.mxu1 %v8050_v25  ;;  %1913 = vmatpush.msrb.mxu2 %v13207_v7  ;;  %v13213_v25 = vand.u32 4294901760, %v8293_v53 }
  0xcf   : > { %1978 = vmatpush.msrb.mxu3 %v8175_v45  ;;  %1681 = vmatmul.f32.gmra.mxu2 %v8459_v54 }
  0xd0   : > { %1810 = vmatpush.msrb.mxu0 %v8223_v30  ;;  %1854 = vmatpush.msrb.mxu1 %v8099_v58  ;;  %v13210_v58 = vand.u32 4294901760, %v8240_v33  ;;  %v13212_v30 = vand.u32 4294901760, %v8279_v1 }
  0xd1   : > { %1917 = vmatpush.msrb.mxu2 %v13208_v17  ;;  %1980 = vmatpush.msrb.mxu3 %v8192_v24  ;;  %v8653_v17 = vand.u32 4294901760, %v455_v23 }
  0xd2   : > { %1786 = vmatmul.f32.gmra.mxu3 %v8411_v62  ;;  %1813 = vmatpush.msrb.mxu0 %v8240_v33  ;;  %v8529_v33 = vand.u32 4294901760, %v471_v11 }
  0xd3   : > { %1856 = vmatpush.msrb.mxu1 %v8116_v56  ;;  %1921 = vmatpush.msrb.mxu2 %v13209_v2  ;;  %v13211_v56 = vand.u32 4294901760, %v8264_v59 }
  0xd4   : > { %1982 = vmatpush.msrb.mxu3 %v8210_v4  ;;  %1632 = vmatmul.f32.gmra.mxu1 %v8123_v21 }
  0xd5   : > { %1816 = vmatpush.msrb.mxu0 %v8264_v59  ;;  %1858 = vmatpush.msrb.mxu1 %v8156_v9  ;;  %v475_v9 = vld [vmem:[%s12825_s2 + $0x4f0] sm:$0xff]  ;;  %v469_v59 = vld [vmem:[%s12825_s2 + $0x4c0] sm:$0xff] }
  0xd6   : > { %1925 = vmatpush.msrb.mxu2 %v13210_v58  ;;  %1984 = vmatpush.msrb.mxu3 %v8235_v32  ;;  %v307_v58 = vld [vmem:[%s7586_s28 + $0x20] sm:$0xff] }
  0xd7   : > { %1819 = vmatpush.msrb.mxu0 %v8279_v1  ;;  %1860 = vmatpush.msrb.mxu1 %v8175_v45  ;;  %v473_v45 = vld [vmem:[%s12825_s2 + $0x4e0] sm:$0xff]  ;;  %v467_v1 = vld [vmem:[%s12825_s2 + $0x4b0] sm:$0xff] }
  0xd8   : > { %1929 = vmatpush.msrb.mxu2 %v13211_v56  ;;  %1986 = vmatpush.msrb.mxu3 %v8248_v36  ;;  %v507_v56 = vld [vmem:[%s12825_s2 + $0x5f0] sm:$0xff] }
  0xd9   : > { %1822 = vmatpush.msrb.mxu0 %v8293_v53  ;;  %1862 = vmatpush.msrb.mxu1 %v8192_v24  ;;  %v8509_v24 = vand.u32 4294901760, %v475_v9 }
  0xda   : > { %1933 = vmatpush.msrb.mxu2 %v13212_v30  ;;  %1988 = vmatpush.msrb.mxu3 %v8266_v42 }
  0xdb   : > { %1825 = vmatpush.msrb.mxu0 %v8310_v16  ;;  %1864 = vmatpush.msrb.mxu1 %v8210_v4  ;;  %v8519_v4 = vand.u32 4294901760, %v473_v45  ;;  %v8547_v16 = vand.u32 4294901760, %v469_v59 }
  0xdc   : > { %1937 = vmatpush.msrb.mxu2 %v13213_v25  ;;  %1990 = vmatpush.msrb.mxu3 %v8281_v57 }
  0xdd   : > { %1828 = vmatpush.msrb.mxu0 %v8326_v63  ;;  %1866 = vmatpush.msrb.mxu1 %v8235_v32  ;;  %v8527_v32 = vsub.f32 %v475_v9, %v8509_v24 }
  0xde   : > { %1941 = vmatpush.msrb.mxu2 %v1753_v61  ;;  %1992 = vmatpush.msrb.mxu3 %v8295_v51  ;;  %v465_v61 = vld [vmem:[%s12825_s2 + $0x4a0] sm:$0xff] }
  0xdf   : > { %1831 = vmatpush.msrb.mxu0 %v8339_v52  ;;  %1868 = vmatpush.msrb.mxu1 %v8248_v36  ;;  %v8540_v36 = vsub.f32 %v473_v45, %v8519_v4  ;;  %v12912_v53 = vand.u32 4294901760, %v8527_v32  ;;  %v463_v52 = vld [vmem:[%s12825_s2 + $0x490] sm:$0xff] }
  0xe0   : > { %1945 = vmatpush.msrb.mxu2 %v1759_v18  ;;  %1994 = vmatpush.msrb.mxu3 %v8312_v5  ;;  %v8573_v18 = vsub.f32 %v469_v59, %v8547_v16  ;;  %v451_v59 = vld [vmem:[%s12825_s2 + $0x430] sm:$0xff] }
  0xe1   : > { %1834 = vmatpush.msrb.mxu0 %v8352_v27  ;;  %1870 = vmatpush.msrb.mxu1 %v8266_v42  ;;  %v8553_v42 = vsub.f32 %v471_v11, %v8529_v33  ;;  %v12910_v63 = vand.u32 4294901760, %v8540_v36  ;;  %v8575_v27 = vand.u32 4294901760, %v465_v61  ;;  %v8670_v11 = vand.u32 4294901760, %v453_v49 }
  0xe2   : > { %1949 = vmatpush.msrb.mxu2 %v1765_v39  ;;  %1996 = vmatpush.msrb.mxu3 %v8328_v47  ;;  %v2060_v39 = vsub.f32 %v8527_v32, %v12912_v53  ;;  %v12907_v10 = vand.u32 4294901760, %v8573_v18 }
  0xe3   : > { %1837 = vmatpush.msrb.mxu0 %v8363_v0  ;;  %1872 = vmatpush.msrb.mxu1 %v8281_v57  ;;  %v8561_v57 = vand.u32 4294901760, %v467_v1  ;;  %v12909_v0 = vand.u32 4294901760, %v8553_v42  ;;  %v2066_v60 = vsub.f32 %v8540_v36, %v12910_v63  ;;  %v8606_v46 = vsub.f32 %v465_v61, %v8575_v27  ;;  %v314_v63 = vld [vmem:[%s7586_s28 + $0x58] sm:$0xff] }
  0xe4   : > { %1953 = vmatpush.msrb.mxu2 %v1771_v19  ;;  %1998 = vmatpush.msrb.mxu3 %v8341_v15  ;;  %v2061_v29 = vand.u32 4294901760, %v2060_v39  ;;  %v2078_v3 = vsub.f32 %v8573_v18, %v12907_v10  ;;  %v8678_v61 = vand.u32 4294901760, %v507_v56 }
  0xe5   : > { %1840 = vmatmul.f32.vlgmr.msrb.gmra.mxu0 %v8387_v26  ;;  %1874 = vmatpush.msrb.mxu1 %v8295_v51  ;;  %v461_v51 = vld [vmem:[%s12825_s2 + $0x480] sm:$0xff]  ;;  %v8589_v19 = vsub.f32 %v467_v1, %v8561_v57  ;;  %v2072_v6 = vsub.f32 %v8553_v42, %v12909_v0  ;;  %v2067_v31 = vand.u32 4294901760, %v2066_v60  ;;  %v12905_v22 = vand.u32 4294901760, %v8606_v46 }
  0xe6   : > { %2222 = vmatpush.msra.mxu3 %v8509_v24  ;;  %2009 = vmatpush.msra.mxu0 %v8509_v24  ;;  %v8598_v44 = vand.u32 4294901760, %v461_v51  ;;  %v2079_v30 = vand.u32 4294901760, %v2078_v3  ;;  %v8676_v1 = vand.u32 4294901760, %v307_v58  ;;  %v8689_v60 = vsub.f32 %v455_v23, %v8653_v17 }
  0xe7   : > { %1957 = vmatpush.msrb.mxu2 %v1777_v40  ;;  %1876 = vmatpush.msrb.mxu1 %v8312_v5  ;;  %v8591_v40 = vand.u32 4294901760, %v463_v52  ;;  %v459_v5 = vld [vmem:[%s12825_s2 + $0x470] sm:$0xff]  ;;  %v12906_v50 = vand.u32 4294901760, %v8589_v19  ;;  %v2073_v20 = vand.u32 4294901760, %v2072_v6  ;;  %v2090_v45 = vsub.f32 %v8606_v46, %v12905_v22 }
  0xe8   : > { %2224 = vmatpush.msra.mxu3 %v8519_v4  ;;  %2011 = vmatpush.msra.mxu0 %v8519_v4  ;;  %v8622_v12 = vand.u32 4294901760, %v459_v5  ;;  %v8628_v34 = vsub.f32 %v461_v51, %v8598_v44  ;;  %v8697_v6 = vand.u32 4294901760, %v451_v59  ;;  %v8704_v23 = vsub.f32 %v453_v49, %v8670_v11  ;;  %v503_v49 = vld [vmem:[%s12825_s2 + $0x5d0] sm:$0xff] }
  0xe9   : > { %2164 = vmatpush.msra.mxu2 %v8527_v32  ;;  %1878 = vmatpush.msrb.mxu1 %v8328_v47  ;;  %v8620_v47 = vsub.f32 %v463_v52, %v8591_v40  ;;  %v2084_v38 = vsub.f32 %v8589_v19, %v12906_v50  ;;  %v505_v52 = vld [vmem:[%s12825_s2 + $0x5e0] sm:$0xff]  ;;  %v8751_v0 = vand.u32 4294901760, %v503_v49 }
  0xea   : > { %1959 = vmatmul.f32.vlgmr.msrb.gmra.mxu2 %v8368_v8  ;;  %2013 = vmatpush.msra.mxu0 %v8529_v33  ;;  %v8651_v7 = vsub.f32 %v459_v5, %v8622_v12  ;;  %v12903_v9 = vand.u32 4294901760, %v8628_v34  ;;  %13214 = vst [vmem:[#allocation24_spill] sm:$0xff] %v8697_v6  ;;  %v8733_v50 = vsub.f32 %v451_v59, %v8697_v6 }
  0xeb   : > { %2167 = vmatpush.msra.mxu2 %v8540_v36  ;;  %2226 = vmatpush.msra.mxu3 %v8529_v33  ;;  %v12904_v2 = vand.u32 4294901760, %v8620_v47  ;;  %v2085_v51 = vand.u32 4294901760, %v2084_v38  ;;  %v8710_v38 = vand.u32 4294901760, %v505_v52 }
  0xec   : > { %2000 = vmatmul.f32.vlgmr.msrb.gmra.mxu3 %v8368_v8  ;;  %2015 = vmatpush.msra.mxu0 %v8547_v16  ;;  %v12908_v5 = vand.u32 4294901760, %v8651_v7 }
  0xed   : > { %2170 = vmatpush.msra.mxu2 %v8553_v42  ;;  %2228 = vmatpush.msra.mxu3 %v8547_v16  ;;  %v2096_v39 = vsub.f32 %v8620_v47, %v12904_v2 }
  0xee   : > { %1880 = vmatpush.msrb.mxu1 %v8341_v15  ;;  %1845 = vmatmul.f32.gmra.mxu0 %v8424_v55  ;;  %v8638_v15 = vand.u32 4294901760, %v457_v37  ;;  %v2108_v2 = vsub.f32 %v8651_v7, %v12908_v5  ;;  %v8749_v5 = vsub.f32 %v505_v52, %v8710_v38 }
  0xef   : > { %1884 = vmatmul.f32.vlgmr.msrb.gmra.mxu1 %v8405_v14  ;;  %2017 = vmatpush.msra.mxu0 %v8561_v57  ;;  %v13221_v14 = vand.u32 4294901760, %v8704_v23 }
  0xf0   : > { %2062 = vmatpush.msra.mxu1 %v2061_v29  ;;  %2173 = vmatpush.msra.mxu2 %v8573_v18  ;;  %v8668_v25 = vsub.f32 %v457_v37, %v8638_v15  ;;  %v2102_v29 = vsub.f32 %v8628_v34, %v12903_v9  ;;  %v449_v37 = vld [vmem:[%s12825_s2 + $0x420] sm:$0xff]  ;;  %v2097_v9 = vand.u32 4294901760, %v2096_v39  ;;  %13218 = vst [vmem:[#allocation33_spill] sm:$0xff] %v8749_v5  ;;  %v2109_v53 = vand.u32 4294901760, %v2108_v2 }
  0xf1   : > { %2230 = vmatpush.msra.mxu3 %v8561_v57  ;;  %2019 = vmatpush.msra.mxu0 %v8575_v27  ;;  %v8727_v22 = vand.u32 4294901760, %v449_v37  ;;  %v2126_v26 = vsub.f32 %v8704_v23, %v13221_v14  ;;  %v497_v14 = vld [vmem:[%s12825_s2 + $0x5a0] sm:$0xff]  ;;  %v13227_v48 = vand.u32 4294901760, %v8749_v5 }
  0xf2   : > { %2068 = vmatpush.msra.mxu1 %v2067_v31  ;;  %2176 = vmatpush.msra.mxu2 %v8589_v19  ;;  %v2091_v31 = vand.u32 4294901760, %v2090_v45  ;;  %v12911_v3 = vand.u32 4294901760, %v8668_v25  ;;  %v8718_v45 = vsub.f32 %v507_v56, %v8678_v61  ;;  %v2103_v56 = vand.u32 4294901760, %v2102_v29  ;;  %v445_v29 = vld [vmem:[%s12825_s2 + $0x400] sm:$0xff] }
  0xf3   : > { %2232 = vmatpush.msra.mxu3 %v8575_v27  ;;  %1963 = vmatmul.f32.gmra.mxu2 %v8411_v62  ;;  %13216 = vst [vmem:[#allocation26_spill] sm:$0xff] %v8727_v22  ;;  %v8765_v59 = vsub.f32 %v449_v37, %v8727_v22  ;;  %v8771_v55 = vand.u32 4294901760, %v445_v29  ;;  %v499_v37 = vld [vmem:[%s12825_s2 + $0x5b0] sm:$0xff]  ;;  %v8827_v21 = vand.u32 4294901760, %v497_v14 }
  0xf4   : > { %2021 = vmatpush.msra.mxu0 %v8591_v40  ;;  %2074 = vmatpush.msra.mxu1 %v2073_v20  ;;  %v447_v20 = vld [vmem:[%s12825_s2 + $0x410] sm:$0xff]  ;;  %v2114_v39 = vsub.f32 %v8668_v25, %v12911_v3  ;;  %v13223_v8 = vand.u32 4294901760, %v8718_v45  ;;  %v8805_v54 = vand.u32 4294901760, %v499_v37 }
  0xf5   : > { %2179 = vmatpush.msra.mxu2 %v8606_v46  ;;  %2234 = vmatpush.msra.mxu3 %v8591_v40  ;;  %v8735_v10 = vand.u32 4294901760, %v447_v20  ;;  %13220 = vst [vmem:[#allocation43_spill] sm:$0xff] %v8771_v55  ;;  %v8813_v35 = vsub.f32 %v445_v29, %v8771_v55 }
  0xf6   : > { %2004 = vmatmul.f32.gmra.mxu3 %v8411_v62  ;;  %2023 = vmatpush.msra.mxu0 %v8598_v44  ;;  %v8842_v13 = vsub.f32 %v499_v37, %v8805_v54 }
  0xf7   : > { %2080 = vmatpush.msra.mxu1 %v2079_v30  ;;  %2182 = vmatpush.msra.mxu2 %v8620_v47  ;;  %v8715_v30 = vsub.f32 %v307_v58, %v8676_v1  ;;  %v12915_v58 = vand.u32 4294901760, %v8689_v60  ;;  %13217 = vst [vmem:[#allocation28_spill] sm:$0xff] %v8735_v10  ;;  %v8774_v3 = vsub.f32 %v447_v20, %v8735_v10 }
  0xf8   : > { %2236 = vmatpush.msra.mxu3 %v8598_v44  ;;  %1890 = vmatmul.f32.gmra.mxu1 %v8436_v28  ;;  %v8788_v20 = vsub.f32 %v503_v49, %v8751_v0  ;;  %13230 = vst [vmem:[#allocation48_spill] sm:$0xff] %v8842_v13 }
  0xf9   : > { %13215 = vst [vmem:[#allocation30_spill] sm:$0xff] %v8715_v30  ;;  %2025 = vmatpush.msra.mxu0 %v8622_v12  ;;  %2086 = vmatpush.msra.mxu1 %v2085_v51  ;;  %v501_v51 = vld [vmem:[%s12825_s2 + $0x5c0] sm:$0xff]  ;;  %v2120_v52 = vsub.f32 %v8689_v60, %v12915_v58  ;;  %v2115_v58 = vand.u32 4294901760, %v2114_v39  ;;  %v2127_v39 = vand.u32 4294901760, %v2126_v26 }
  0xfa   : > { %2185 = vmatpush.msra.mxu2 %v8628_v34  ;;  %2238 = vmatpush.msra.mxu3 %v8622_v12  ;;  %v8767_v28 = vand.u32 4294901760, %v501_v51  ;;  %13222 = vst [vmem:[#allocation44_spill] sm:$0xff] %v8788_v20  ;;  %v13233_v29 = vand.u32 4294901760, %v8788_v20 }
  0xfb   : > { %2027 = vmatpush.msra.mxu0 %v8638_v15  ;;  %2092 = vmatpush.msra.mxu1 %v2091_v31  ;;  %v8757_v31 = vand.u32 4294901760, %v8715_v30  ;;  %v2121_v49 = vand.u32 4294901760, %v2120_v52 }
  0xfc   : > { %2188 = vmatpush.msra.mxu2 %v8651_v7  ;;  %2240 = vmatpush.msra.mxu3 %v8638_v15  ;;  %v8803_v62 = vsub.f32 %v501_v51, %v8767_v28  ;;  %v495_v51 = vld [vmem:[%s12825_s2 + $0x590] sm:$0xff] }
  0xfd   : > { %13219 = vst [vmem:[#allocation42_spill] sm:$0xff] %v8757_v31  ;;  %2029 = vmatpush.msra.mxu0 %v8653_v17  ;;  %2098 = vmatpush.msra.mxu1 %v2097_v9  ;;  %v8777_v9 = vand.u32 4294901760, %v314_v63  ;;  %v2043_v2 = vsub.f32 %v8715_v30, %v8757_v31  ;;  %v8844_v43 = vand.u32 4294901760, %v495_v51 }
  0xfe   : > { %2191 = vmatpush.msra.mxu2 %v8668_v25  ;;  %2242 = vmatpush.msra.mxu3 %v8653_v17  ;;  %13224 = vst [vmem:[#allocation45_spill] sm:$0xff] %v8803_v62 }
  0xff   : > { %2031 = vmatpush.msra.mxu0 %v8670_v11  ;;  %2104 = vmatpush.msra.mxu1 %v2103_v56  ;;  %v2432_v56 = vsub.f32 %v8718_v45, %v13223_v8  ;;  %v13225_v8 = vand.u32 4294901760, %v8733_v50  ;;  %v8817_v52 = vsub.f32 %v314_v63, %v8777_v9  ;;  %v8831_v63 = vand.u32 4294901760, %v2043_v2 }
 0x100   : > { %2194 = vmatpush.msra.mxu2 %v8689_v60  ;;  %2244 = vmatpush.msra.mxu3 %v8670_v11 }
 0x101   : > { %2033 = vmatpush.msra.mxu0 %v8697_v6  ;;  %2110 = vmatpush.msra.mxu1 %v2109_v53  ;;  %v2132_v41 = vsub.f32 %v8733_v50, %v13225_v8  ;;  %13226 = vst [vmem:[#allocation46_spill] sm:$0xff] %v8817_v52  ;;  %v2438_v8 = vsub.f32 %v8749_v5, %v13227_v48  ;;  %v2433_v53 = vand.u32 4294901760, %v2432_v56  ;;  %v13229_v48 = vand.u32 4294901760, %v8765_v59 }
 0x102   : > { %2197 = vmatpush.msra.mxu2 %v8704_v23  ;;  %2246 = vmatpush.msra.mxu3 %v8697_v6  ;;  %13228 = vst [vmem:[#allocation47_spill] sm:$0xff] %v8831_v63  ;;  %v13231_v56 = vand.u32 4294901760, %v8774_v3  ;;  %v2444_v5 = vsub.f32 %v8788_v20, %v13233_v29  ;;  %v489_v20 = vld [vmem:[%s12825_s2 + $0x560] sm:$0xff]  ;;  %v13236_v6 = vand.u32 4294901760, %v8527_v32 }
 0x103   : > { %2035 = vmatpush.msra.mxu0 %v8727_v22  ;;  %2116 = vmatpush.msra.mxu1 %v2115_v58  ;;  %v493_v58 = vld [vmem:[%s12825_s2 + $0x580] sm:$0xff]  ;;  %v2138_v26 = vsub.f32 %v8765_v59, %v13229_v48  ;;  %v2133_v2 = vand.u32 4294901760, %v2132_v41  ;;  %v8853_v48 = vand.u32 4294901760, %v8817_v52  ;;  %v2439_v37 = vand.u32 4294901760, %v2438_v8 }
 0x104   : > { %2200 = vmatpush.msra.mxu2 %v8733_v50  ;;  %2248 = vmatpush.msra.mxu3 %v8727_v22  ;;  %v8862_v41 = vand.u32 4294901760, %v493_v58  ;;  %v13234_v8 = vand.u32 4294901760, %v8803_v62  ;;  %v8875_v22 = vsub.f32 %v495_v51, %v8844_v43  ;;  %v2445_v51 = vand.u32 4294901760, %v2444_v5 }
 0x105   : > { %2037 = vmatpush.msra.mxu0 %v8735_v10  ;;  %2122 = vmatpush.msra.mxu1 %v2121_v49  ;;  %v2144_v49 = vsub.f32 %v8774_v3, %v13231_v56  ;;  %13232 = vst [vmem:[#allocation49_spill] sm:$0xff] %v8853_v48  ;;  %v491_v56 = vld [vmem:[%s12825_s2 + $0x570] sm:$0xff] }
 0x106   : > { %2203 = vmatpush.msra.mxu2 %v8765_v59  ;;  %2250 = vmatpush.msra.mxu3 %v8735_v10  ;;  %v8860_v10 = vsub.f32 %v497_v14, %v8827_v21  ;;  %v2450_v29 = vsub.f32 %v8803_v62, %v13234_v8  ;;  %13235 = vst [vmem:[#allocation50_spill] sm:$0xff] %v8875_v22  ;;  %v8902_v62 = vpop.f32.mrf.mxu0 }
 0x107   : > { %2039 = vmatpush.msra.mxu0 %v8771_v55  ;;  %2128 = vmatpush.msra.mxu1 %v2127_v39  ;;  %v2139_v39 = vand.u32 4294901760, %v2138_v26  ;;  %v2051_v8 = vsub.f32 %v8817_v52, %v8853_v48  ;;  %v2145_v14 = vand.u32 4294901760, %v2144_v49  ;;  %v8892_v32 = vsub.f32 %v493_v58, %v8862_v41 }
 0x108   : > { %2206 = vmatpush.msra.mxu2 %v8774_v3  ;;  %2252 = vmatpush.msra.mxu3 %v8771_v55  ;;  %v2451_v5 = vand.u32 4294901760, %v2450_v29  ;;  %v13240_v58 = vand.u32 4294901760, %v8842_v13 }
 0x109   : > { %2045 = vmatmul.f32.vlgmr.msra.gmra.mxu0 %v8831_v63  ;;  %2134 = vmatpush.msra.mxu1 %v2133_v2  ;;  %v8887_v63 = vand.u32 4294901760, %v491_v56  ;;  %13238 = vst [vmem:[#allocation51_spill] sm:$0xff] %v8892_v32  ;;  %v13239_v2 = vand.u32 4294901760, %v8540_v36  ;;  %v485_v36 = vld [vmem:[%s12825_s2 + $0x540] sm:$0xff] }
 0x10a   : > { %2434 = vmatpush.msrb.mxu3 %v2433_v53  ;;  %2269 = vmatpush.msrb.mxu0 %v13236_v6  ;;  %v13237_v53 = vand.u32 4294901760, %v8813_v35  ;;  %v487_v6 = vld [vmem:[%s12825_s2 + $0x550] sm:$0xff]  ;;  %v2456_v49 = vsub.f32 %v8842_v13, %v13240_v58  ;;  %v13244_v58 = vand.u32 4294901760, %v8860_v10 }
 0x10b   : > { %2209 = vmatpush.msra.mxu2 %v8813_v35  ;;  %2140 = vmatpush.msra.mxu1 %v2139_v39  ;;  %v8915_v39 = vand.u32 4294901760, %v2051_v8  ;;  %v8918_v29 = vsub.f32 %v491_v56, %v8887_v63  ;;  %v8931_v8 = vpop.f32.mrf.mxu2  ;;  %v13245_v56 = vand.u32 4294901760, %v8573_v18  ;;  %v479_v18 = vld [vmem:[%s12825_s2 + $0x510] sm:$0xff] }
 0x10c   : > { %v2150_v26 = vsub.f32 %v8813_v35, %v13237_v53  ;;  %2440 = vmatpush.msrb.mxu3 %v2439_v37  ;;  %2273 = vmatpush.msrb.mxu0 %v13239_v2  ;;  %v8900_v53 = vand.u32 4294901760, %v489_v20  ;;  %v13241_v2 = vand.u32 4294901760, %v8553_v42  ;;  %v2462_v37 = vsub.f32 %v8860_v10, %v13244_v58  ;;  %v483_v42 = vld [vmem:[%s12825_s2 + $0x530] sm:$0xff] }
 0x10d   : > { %2381 = vmatpush.msrb.mxu2 %v8678_v61  ;;  %13242 = vst [vmem:[#allocation52_spill] sm:$0xff] %v8915_v39  ;;  %2146 = vmatpush.msra.mxu1 %v2145_v14  ;;  %v13246_v58 = vand.u32 4294901760, %v8875_v22 }
 0x10e   : > { %2212 = vmatmul.f32.vlgmr.msra.gmra.mxu2 %v8715_v30  ;;  %2277 = vmatpush.msrb.mxu0 %v13241_v2  ;;  %v2151_v55 = vand.u32 4294901760, %v2150_v26  ;;  %13243 = vst [vmem:[#allocation53_spill] sm:$0xff] %v8918_v29  ;;  %v8920_v30 = vand.u32 4294901760, %v487_v6  ;;  %v8929_v26 = vpop.f32.mrf.mxu1  ;;  %v8937_v14 = vsub.f32 %v489_v20, %v8900_v53  ;;  %v2457_v2 = vand.u32 4294901760, %v2456_v49 }
 0x10f   : > { %2383 = vmatpush.msrb.mxu2 %v8710_v38  ;;  %2446 = vmatpush.msrb.mxu3 %v2445_v51  ;;  %v8939_v51 = vand.u32 4294901760, %v485_v36  ;;  %v2468_v13 = vsub.f32 %v8875_v22, %v13246_v58  ;;  %v13247_v49 = vand.u32 4294901760, %v8589_v19  ;;  %v2463_v58 = vand.u32 4294901760, %v2462_v37 }
 0x110   : > { %2256 = vmatmul.f32.vlgmr.msra.gmra.mxu3 %v8757_v31  ;;  %2281 = vmatpush.msrb.mxu0 %v13245_v56  ;;  %v481_v31 = vld [vmem:[%s12825_s2 + $0x520] sm:$0xff]  ;;  %v8951_v20 = vsub.f32 %v487_v6, %v8920_v30  ;;  %v8953_v56 = vand.u32 4294901760, %v483_v42  ;;  %v13248_v22 = vand.u32 4294901760, %v8892_v32  ;;  %v13249_v37 = vand.u32 4294901760, %v8606_v46 }
 0x111   : > { %2385 = vmatpush.msrb.mxu2 %v8751_v0  ;;  %2452 = vmatpush.msrb.mxu3 %v2451_v5  ;;  %v8955_v5 = vpop.f32.mrf.mxu3  ;;  %v8972_v19 = vand.u32 4294901760, %v481_v31  ;;  %v8988_v46 = vand.u32 4294901760, %v479_v18 }
 0x112   : > { %2152 = vmatpush.msra.mxu1 %v2151_v55  ;;  %2053 = vmatmul.f32.gmra.mxu0 %v8915_v39  ;;  %v2474_v55 = vsub.f32 %v8892_v32, %v13248_v22  ;;  %v8970_v39 = vsub.f32 %v485_v36, %v8939_v51  ;;  %v2469_v22 = vand.u32 4294901760, %v2468_v13  ;;  %v8990_v13 = vpop.f32.mrf.mxu0 }
 0x113   : > { %2154 = vmatmul.f32.vlgmr.msra.gmra.mxu1 %v8676_v1  ;;  %2285 = vmatpush.msrb.mxu0 %v13247_v49  ;;  %v477_v49 = vld [vmem:[%s12825_s2 + $0x500] sm:$0xff] }
 0x114   : > { %2340 = vmatpush.msrb.mxu1 %v8509_v24  ;;  %2387 = vmatpush.msrb.mxu2 %v8767_v28  ;;  %v13250_v24 = vand.u32 4294901760, %v8918_v29  ;;  %v9003_v32 = vand.u32 4294901760, %v477_v49 }
 0x115   : > { %2458 = vmatpush.msrb.mxu3 %v2457_v2  ;;  %2289 = vmatpush.msrb.mxu0 %v13249_v37  ;;  %v8986_v2 = vsub.f32 %v483_v42, %v8953_v56  ;;  %v2475_v37 = vand.u32 4294901760, %v2474_v55  ;;  %v9018_v42 = vsub.f32 %v479_v18, %v8988_v46 }
 0x116   : > { %2342 = vmatpush.msrb.mxu1 %v8519_v4  ;;  %2389 = vmatpush.msrb.mxu2 %v8805_v54  ;;  %v2480_v36 = vsub.f32 %v8918_v29, %v13250_v24  ;;  %v13251_v4 = vand.u32 4294901760, %v8620_v47  ;;  %v13252_v24 = vand.u32 4294901760, %v8937_v14  ;;  %v9001_v29 = vsub.f32 %v481_v31, %v8972_v19  ;;  %v9008_v47 = vpop.f32.mrf.mxu2 }
 0x117   : > { %2464 = vmatpush.msrb.mxu3 %v2463_v58  ;;  %2217 = vmatmul.f32.gmra.mxu2 %v8817_v52  ;;  %v9006_v58 = vpop.f32.mrf.mxu1 }
 0x118   : > { %2293 = vmatpush.msrb.mxu0 %v13251_v4  ;;  %2344 = vmatpush.msrb.mxu1 %v8529_v33  ;;  %v2486_v6 = vsub.f32 %v8937_v14, %v13252_v24  ;;  %v13253_v33 = vand.u32 4294901760, %v8628_v34  ;;  %v2481_v55 = vand.u32 4294901760, %v2480_v36  ;;  %v13254_v4 = vand.u32 4294901760, %v8951_v20 }
 0x119   : > { %2391 = vmatpush.msrb.mxu2 %v8827_v21  ;;  %2470 = vmatpush.msrb.mxu3 %v2469_v22  ;;  %v308_v22 = vld [vmem:[%s7586_s28 + $0x28] sm:$0xff]  ;;  %v13255_v36 = vand.u32 4294901760, %v8970_v39  ;;  %v9029_v24 = vsub.f32 %v477_v49, %v9003_v32  ;;  %v9031_v18 = vpop.f32.mrf.mxu3  ;;  %v2515_v49 = vand.u32 4294901760, %v9018_v42 }
 0x11a   : > { %2262 = vmatmul.f32.gmra.mxu3 %v8853_v48  ;;  %2297 = vmatpush.msrb.mxu0 %v13253_v33  ;;  %v2492_v31 = vsub.f32 %v8951_v20, %v13254_v4  ;;  %v2487_v34 = vand.u32 4294901760, %v2486_v6  ;;  %v13256_v48 = vand.u32 4294901760, %v8651_v7  ;;  %v13259_v4 = vand.u32 4294901760, %v8668_v25 }
 0x11b   : > { %2346 = vmatpush.msrb.mxu1 %v8547_v16  ;;  %2393 = vmatpush.msrb.mxu2 %v8844_v43  ;;  %v2498_v33 = vsub.f32 %v8970_v39, %v13255_v36  ;;  %v9036_v16 = vand.u32 4294901760, %v308_v22  ;;  %v13260_v7 = vand.u32 4294901760, %v9001_v29 }
 0x11c   : > { %2476 = vmatpush.msrb.mxu3 %v2475_v37  ;;  %2158 = vmatmul.f32.gmra.mxu1 %v8777_v9  ;;  %v2493_v6 = vand.u32 4294901760, %v2492_v31  ;;  %v13258_v37 = vand.u32 4294901760, %v8986_v2  ;;  %v9051_v31 = vpop.f32.mrf.mxu0 }
 0x11d   : > { %2301 = vmatpush.msrb.mxu0 %v13256_v48  ;;  %2348 = vmatpush.msrb.mxu1 %v8561_v57  ;;  %13257 = vst [vmem:[#allocation54_spill] sm:$0xff] %v9036_v16  ;;  %v2499_v57 = vand.u32 4294901760, %v2498_v33  ;;  %v2510_v48 = vsub.f32 %v9001_v29, %v13260_v7  ;;  %v13263_v33 = vand.u32 4294901760, %v8704_v23 }
 0x11e   : > { %2395 = vmatpush.msrb.mxu2 %v8862_v41  ;;  %2482 = vmatpush.msrb.mxu3 %v2481_v55  ;;  %v2504_v36 = vsub.f32 %v8986_v2, %v13258_v37  ;;  %v2521_v55 = vand.u32 4294901760, %v9029_v24  ;;  %v13261_v37 = vand.u32 4294901760, %v8689_v60 }
 0x11f   : > { %2305 = vmatpush.msrb.mxu0 %v13259_v4  ;;  %2350 = vmatpush.msrb.mxu1 %v8575_v27  ;;  %v9057_v27 = vsub.f32 %v308_v22, %v9036_v16  ;;  %v9066_v60 = vpop.f32.mrf.mxu1  ;;  %v9068_v4 = vpop.f32.mrf.mxu2 }
 0x120   : > { %2397 = vmatpush.msrb.mxu2 %v8887_v63  ;;  %2488 = vmatpush.msrb.mxu3 %v2487_v34  ;;  %v2505_v25 = vand.u32 4294901760, %v2504_v36  ;;  %v2516_v34 = vsub.f32 %v9018_v42, %v2515_v49  ;;  %v2522_v22 = vsub.f32 %v9029_v24, %v2521_v55  ;;  %v13264_v36 = vand.u32 4294901760, %v8733_v50 }
 0x121   : > { %2309 = vmatpush.msrb.mxu0 %v13261_v37  ;;  %2352 = vmatpush.msrb.mxu1 %v8591_v40  ;;  %13262 = vst [vmem:[#allocation55_spill] sm:$0xff] %v9057_v27  ;;  %v2511_v40 = vand.u32 4294901760, %v2510_v48  ;;  %v9082_v7 = vpop.f32.mrf.mxu3  ;;  %v13268_v37 = vand.u32 4294901760, %v8774_v3  ;;  %v668_v3 = vadd.f32 %v8929_v26, %v8902_v62 }
 0x122   : > { %2399 = vmatpush.msrb.mxu2 %v8900_v53  ;;  %2494 = vmatpush.msrb.mxu3 %v2493_v6  ;;  %v315_v6 = vld [vmem:[%s7586_s28 + $0x60] sm:$0xff]  ;;  %v2517_v23 = vand.u32 4294901760, %v2516_v34 }
 0x123   : > { %2313 = vmatpush.msrb.mxu0 %v13263_v33  ;;  %2354 = vmatpush.msrb.mxu1 %v8598_v44  ;;  %v9079_v44 = vand.u32 4294901760, %v9057_v27  ;;  %v9087_v48 = vand.u32 4294901760, %v315_v6  ;;  %v726_v26 = vadd.f32 %v8931_v8, %v668_v3  ;;  %v13279_v8 = vld [vmem:[#allocation28_spill] sm:$0xff] }
 0x124   : > { %2401 = vmatpush.msrb.mxu2 %v8920_v30  ;;  %2500 = vmatpush.msrb.mxu3 %v2499_v57  ;;  %v13266_v57 = vand.u32 4294901760, %v8765_v59  ;;  %v9090_v50 = vpop.f32.mrf.mxu0 }
 0x125   : > { %2317 = vmatpush.msrb.mxu0 %v13264_v36  ;;  %2356 = vmatpush.msrb.mxu1 %v8622_v12  ;;  %13265 = vst [vmem:[#allocation56_spill] sm:$0xff] %v9079_v44  ;;  %v2523_v12 = vand.u32 4294901760, %v2522_v22  ;;  %v9102_v59 = vsub.f32 %v315_v6, %v9087_v48  ;;  %v13275_v22 = vand.u32 4294901760, %v8718_v45  ;;  %v13276_v6 = vld [vmem:[#allocation26_spill] sm:$0xff]  ;;  %v672_v36 = vadd.f32 %v9006_v58, %v8990_v13 }
 0x126   : > { %2403 = vmatpush.msrb.mxu2 %v8939_v51  ;;  %2506 = vmatpush.msrb.mxu3 %v2505_v25  ;;  %13267 = vst [vmem:[#allocation57_spill] sm:$0xff] %v9087_v48  ;;  %v2415_v25 = vsub.f32 %v9057_v27, %v9079_v44 }
 0x127   : > { %2321 = vmatpush.msrb.mxu0 %v13266_v57  ;;  %2358 = vmatpush.msrb.mxu1 %v8638_v15  ;;  %v13269_v15 = vand.u32 4294901760, %v8813_v35  ;;  %13270 = vst [vmem:[#allocation58_spill] sm:$0xff] %v9102_v59  ;;  %v9106_v34 = vpop.f32.mrf.mxu1  ;;  %v9122_v62 = vand.u32 4294901760, %v9102_v59  ;;  %v731_v58 = vadd.f32 %v9008_v47, %v672_v36 }
 0x128   : > { %2405 = vmatpush.msrb.mxu2 %v8953_v56  ;;  %2512 = vmatpush.msrb.mxu3 %v2511_v40  ;;  %v9113_v35 = vand.u32 4294901760, %v2415_v25  ;;  %v13274_v40 = vld [vmem:[#allocation33_spill] sm:$0xff] }
 0x129   : > { %2325 = vmatpush.msrb.mxu0 %v13268_v37  ;;  %2360 = vmatpush.msrb.mxu1 %v8653_v17  ;;  %v9108_v17 = vpop.f32.mrf.mxu2  ;;  %v9117_v33 = vpop.f32.mrf.mxu3  ;;  %v13278_v57 = vand.u32 4294901760, %v13274_v40  ;;  %v770_v37 = vadd.f32 %v8955_v5, %v726_v26  ;;  %v13280_v25 = vld [vmem:[#allocation45_spill] sm:$0xff]  ;;  %v13283_v5 = vld [vmem:[#allocation48_spill] sm:$0xff] }
 0x12a   : > { %2407 = vmatpush.msrb.mxu2 %v8972_v19  ;;  %2518 = vmatpush.msrb.mxu3 %v2517_v23  ;;  %13271 = vst [vmem:[#allocation59_spill] sm:$0xff] %v9113_v35  ;;  %v13277_v23 = vld [vmem:[#allocation44_spill] sm:$0xff]  ;;  %v13285_v47 = vand.u32 4294901760, %v13280_v25  ;;  %v13286_v36 = vand.u32 4294901760, %v13283_v5 }
 0x12b   : > { %2329 = vmatpush.msrb.mxu0 %v13269_v15  ;;  %2362 = vmatpush.msrb.mxu1 %v8670_v11  ;;  %v13272_v11 = vld [vmem:[#allocation24_spill] sm:$0xff]  ;;  %v13281_v13 = vand.u32 4294901760, %v13277_v23 }
 0x12c   : > { %2409 = vmatpush.msrb.mxu2 %v8988_v46  ;;  %2524 = vmatpush.msrb.mxu3 %v2523_v12  ;;  %13273 = vst [vmem:[#allocation24_spill] sm:$0xff] %v9122_v62  ;;  %v9135_v12 = vpop.f32.mrf.mxu0 }
 0x12d   : > { %2331 = vmatmul.f32.vlgmr.msrb.gmra.mxu0 %v8676_v1  ;;  %2364 = vmatpush.msrb.mxu1 %v13272_v11  ;;  %v13282_v11 = vld [vmem:[#allocation43_spill] sm:$0xff] }
 0x12e   : > { %2712 = vmatpush.msra.mxu3 %v8678_v61  ;;  %2536 = vmatpush.msra.mxu0 %v8718_v45  ;;  %v2423_v45 = vsub.f32 %v9102_v59, %v9122_v62 }
 0x12f   : > { %2411 = vmatpush.msrb.mxu2 %v9003_v32  ;;  %2366 = vmatpush.msrb.mxu1 %v13276_v6  ;;  %v9148_v15 = vpop.f32.mrf.mxu1  ;;  %v776_v6 = vadd.f32 %v9031_v18, %v731_v58  ;;  %v13289_v18 = vld [vmem:[#allocation51_spill] sm:$0xff] }
 0x130   : > { %2714 = vmatpush.msra.mxu3 %v8710_v38  ;;  %2539 = vmatpush.msra.mxu0 %v13274_v40  ;;  %v9156_v26 = vand.u32 4294901760, %v2423_v45  ;;  %v845_v40 = vadd.f32 %v9051_v31, %v770_v37  ;;  %v13287_v31 = vld [vmem:[#allocation50_spill] sm:$0xff]  ;;  %v13291_v37 = vld [vmem:[#allocation53_spill] sm:$0xff] }
 0x131   : > { %2641 = vmatpush.msra.mxu2 %v13275_v22  ;;  %2368 = vmatpush.msrb.mxu1 %v13279_v8  ;;  %v9150_v3 = vpop.f32.mrf.mxu2  ;;  %v9162_v22 = vpop.f32.mrf.mxu3  ;;  %v348_v8 = vld [vmem:[%s12825_s2 + $0xf8] sm:$0xff] }
 0x132   : > { %2417 = vmatmul.f32.vlgmr.msrb.gmra.mxu2 %v9113_v35  ;;  %2542 = vmatpush.msra.mxu0 %v13277_v23  ;;  %13284 = vst [vmem:[#allocation33_spill] sm:$0xff] %v9156_v26 }
 0x133   : > { %2645 = vmatpush.msra.mxu2 %v13278_v57  ;;  %2716 = vmatpush.msra.mxu3 %v8751_v0  ;;  %v13288_v57 = vand.u32 4294901760, %v8860_v10 }
 0x134   : > { %2526 = vmatmul.f32.vlgmr.msrb.gmra.mxu3 %v9036_v16  ;;  %2545 = vmatpush.msra.mxu0 %v13280_v25  ;;  %v9170_v23 = vpop.f32.mrf.mxu0  ;;  %v13292_v25 = vand.u32 4294901760, %v13289_v18 }
 0x135   : > { %2649 = vmatpush.msra.mxu2 %v13281_v13  ;;  %2718 = vmatpush.msra.mxu3 %v8767_v28  ;;  %v344_v13 = vld [vmem:[%s12825_s2 + $0xd8] sm:$0xff] }
 0x136   : > { %2370 = vmatpush.msrb.mxu1 %v13282_v11  ;;  %2335 = vmatmul.f32.gmra.mxu0 %v8777_v9 }
 0x137   : > { %2372 = vmatmul.f32.vlgmr.msrb.gmra.mxu1 %v8676_v1  ;;  %2548 = vmatpush.msra.mxu0 %v13283_v5 }
 0x138   : > { %2594 = vmatpush.msra.mxu1 %v8678_v61  ;;  %2653 = vmatpush.msra.mxu2 %v13285_v47  ;;  %v886_v61 = vadd.f32 %v9066_v60, %v845_v40  ;;  %v13290_v60 = vand.u32 4294901760, %v13287_v31  ;;  %v13293_v40 = vand.u32 4294901760, %v13291_v37 }
 0x139   : > { %2720 = vmatpush.msra.mxu3 %v8805_v54  ;;  %2551 = vmatpush.msra.mxu0 %v8860_v10  ;;  %v9190_v10 = vpop.f32.mrf.mxu1  ;;  %v9192_v45 = vpop.f32.mrf.mxu2 }
 0x13a   : > { %2596 = vmatpush.msra.mxu1 %v8710_v38  ;;  %2657 = vmatpush.msra.mxu2 %v13286_v36  ;;  %v849_v38 = vadd.f32 %v9090_v50, %v776_v6  ;;  %v346_v50 = vld [vmem:[%s12825_s2 + $0xe8] sm:$0xff]  ;;  %v9210_v58 = vpop.f32.mrf.mxu3 }
 0x13b   : > { %2722 = vmatpush.msra.mxu3 %v8827_v21  ;;  %2425 = vmatmul.f32.gmra.mxu2 %v9156_v26 }
 0x13c   : > { %2554 = vmatpush.msra.mxu0 %v13287_v31  ;;  %2598 = vmatpush.msra.mxu1 %v8751_v0  ;;  %v931_v0 = vadd.f32 %v9068_v4, %v886_v61  ;;  %v890_v4 = vadd.f32 %v9106_v34, %v849_v38  ;;  %v9212_v11 = vpop.f32.mrf.mxu0  ;;  %v342_v34 = vld [vmem:[%s12825_s2 + $0xc8] sm:$0xff]  ;;  %v511_v38 = vld [vmem:[%s12825_s2 + $0x610] sm:$0xff] }
 0x13d   : > { %2661 = vmatpush.msra.mxu2 %v13288_v57  ;;  %2724 = vmatpush.msra.mxu3 %v8844_v43  ;;  %v9237_v61 = vand.u32 4294901760, %v342_v34  ;;  %v13295_v57 = vand.u32 4294901760, %v8951_v20 }
 0x13e   : > { %2530 = vmatmul.f32.gmra.mxu3 %v9087_v48  ;;  %2557 = vmatpush.msra.mxu0 %v13289_v18  ;;  %v1040_v5 = vadd.f32 %v9082_v7, %v931_v0  ;;  %v939_v36 = vadd.f32 %v9108_v17, %v890_v4  ;;  %v13294_v7 = vand.u32 4294901760, %v8937_v14  ;;  %v309_v18 = vld [vmem:[%s7586_s28 + $0x30] sm:$0xff]  ;;  %v13296_v0 = vand.u32 4294901760, %v8970_v39 }
 0x13f   : > { %2600 = vmatpush.msra.mxu1 %v8767_v28  ;;  %2665 = vmatpush.msra.mxu2 %v13290_v60  ;;  %v9201_v28 = vand.u32 4294901760, %v348_v8  ;;  %v9284_v4 = vand.u32 4294901760, %v511_v38 }
 0x140   : > { %2726 = vmatpush.msra.mxu3 %v8862_v41  ;;  %2376 = vmatmul.f32.gmra.mxu1 %v8777_v9  ;;  %v1098_v6 = vadd.f32 %v9135_v12, %v1040_v5  ;;  %v1044_v60 = vadd.f32 %v9117_v33, %v939_v36  ;;  %v13297_v5 = vand.u32 4294901760, %v8986_v2 }
 0x141   : > { %2560 = vmatpush.msra.mxu0 %v13291_v37  ;;  %2602 = vmatpush.msra.mxu1 %v8805_v54  ;;  %v9216_v54 = vand.u32 4294901760, %v346_v50  ;;  %v9228_v47 = vsub.f32 %v348_v8, %v9201_v28  ;;  %v9248_v31 = vpop.f32.mrf.mxu1 }
 0x142   : > { %2669 = vmatpush.msra.mxu2 %v13292_v25  ;;  %2728 = vmatpush.msra.mxu3 %v8887_v63  ;;  %v1142_v17 = vadd.f32 %v9148_v15, %v1098_v6  ;;  %v9280_v37 = vpop.f32.mrf.mxu3 }
 0x143   : > { %2563 = vmatpush.msra.mxu0 %v8937_v14  ;;  %2604 = vmatpush.msra.mxu1 %v8827_v21  ;;  %v9230_v21 = vand.u32 4294901760, %v344_v13  ;;  %v9245_v12 = vsub.f32 %v346_v50, %v9216_v54  ;;  %v9250_v14 = vpop.f32.mrf.mxu2  ;;  %v12957_v15 = vand.u32 4294901760, %v9228_v47  ;;  %v9275_v50 = vsub.f32 %v342_v34, %v9237_v61 }
 0x144   : > { %2673 = vmatpush.msra.mxu2 %v13293_v40  ;;  %2730 = vmatpush.msra.mxu3 %v8900_v53  ;;  %v1217_v34 = vadd.f32 %v9150_v3, %v1142_v17  ;;  %v9300_v40 = vpop.f32.mrf.mxu0  ;;  %v13298_v17 = vand.u32 4294901760, %v9001_v29 }
 0x145   : > { %2566 = vmatpush.msra.mxu0 %v8951_v20  ;;  %2606 = vmatpush.msra.mxu1 %v8844_v43  ;;  %v340_v43 = vld [vmem:[%s12825_s2 + $0xb8] sm:$0xff]  ;;  %v9266_v20 = vsub.f32 %v344_v13, %v9230_v21  ;;  %v12955_v33 = vand.u32 4294901760, %v9245_v12  ;;  %v515_v13 = vsel %vm513_vm0, %v309_v18, 0  ;;  %v2994_v6 = vsub.f32 %v9228_v47, %v12957_v15 }
 0x146   : > { %2677 = vmatpush.msra.mxu2 %v13294_v7  ;;  %2732 = vmatpush.msra.mxu3 %v8920_v30  ;;  %v9268_v8 = vand.u32 4294901760, %v340_v43  ;;  %v1103_v7 = vadd.f32 %v9170_v23, %v1044_v60  ;;  %v9320_v18 = vand.u32 4294901760, %v515_v13 }
 0x147   : > { %2569 = vmatpush.msra.mxu0 %v8970_v39  ;;  %2608 = vmatpush.msra.mxu1 %v8862_v41  ;;  %v338_v41 = vld [vmem:[%s12825_s2 + $0xa8] sm:$0xff]  ;;  %v509_v39 = vld [vmem:[%s12825_s2 + $0x600] sm:$0xff]  ;;  %v12954_v3 = vand.u32 4294901760, %v9266_v20 }
 0x148   : > { %2681 = vmatpush.msra.mxu2 %v13295_v57  ;;  %2734 = vmatpush.msra.mxu3 %v8939_v51  ;;  %v9290_v25 = vand.u32 4294901760, %v338_v41  ;;  %v9317_v57 = vand.u32 4294901760, %v509_v39  ;;  %13299 = vst [vmem:[#allocation26_spill] sm:$0xff] %v9320_v18 }
 0x149   : > { %2572 = vmatpush.msra.mxu0 %v8986_v2  ;;  %2610 = vmatpush.msra.mxu1 %v8887_v63  ;;  %v336_v63 = vld [vmem:[%s12825_s2 + $0x98] sm:$0xff]  ;;  %v9309_v2 = vsub.f32 %v340_v43, %v9268_v8  ;;  %v9325_v43 = vsub.f32 %v511_v38, %v9284_v4  ;;  %v2995_v38 = vand.u32 4294901760, %v2994_v6 }
 0x14a   : > { %2685 = vmatpush.msra.mxu2 %v13296_v0  ;;  %2736 = vmatpush.msra.mxu3 %v8953_v56  ;;  %v9311_v36 = vand.u32 4294901760, %v336_v63  ;;  %v9331_v23 = vsub.f32 %v338_v41, %v9290_v25  ;;  %v332_v0 = vld [vmem:[%s12825_s2 + $0x78] sm:$0xff]  ;;  %v3006_v41 = vsub.f32 %v9266_v20, %v12954_v3  ;;  %v9364_v6 = vsub.f32 %v509_v39, %v9317_v57 }
 0x14b   : > { %2575 = vmatpush.msra.mxu0 %v9001_v29  ;;  %2612 = vmatpush.msra.mxu1 %v8900_v53  ;;  %v334_v53 = vld [vmem:[%s12825_s2 + $0x88] sm:$0xff]  ;;  %v3000_v29 = vsub.f32 %v9245_v12, %v12955_v33  ;;  %v9372_v3 = vand.u32 4294901760, %v332_v0 }
 0x14c   : > { %2689 = vmatpush.msra.mxu2 %v13297_v5  ;;  %2738 = vmatpush.msra.mxu3 %v8972_v19  ;;  %v9333_v60 = vand.u32 4294901760, %v334_v53  ;;  %v1258_v5 = vadd.f32 %v9162_v22, %v1217_v34  ;;  %v9350_v22 = vsub.f32 %v336_v63, %v9311_v36  ;;  %v9358_v34 = vpop.f32.mrf.mxu2  ;;  %v9394_v15 = vpop.f32.mrf.mxu0 }
 0x14d   : > { %2578 = vmatpush.msra.mxu0 %v9018_v42  ;;  %2614 = vmatpush.msra.mxu1 %v8920_v30  ;;  %v12956_v30 = vand.u32 4294901760, %v9275_v50  ;;  %v330_v42 = vld [vmem:[%s12825_s2 + $0x68] sm:$0xff] }
 0x14e   : > { %2693 = vmatpush.msra.mxu2 %v13298_v17  ;;  %2740 = vmatpush.msra.mxu3 %v8988_v46  ;;  %v12958_v17 = vand.u32 4294901760, %v9309_v2  ;;  %v1303_v33 = vadd.f32 %v9212_v11, %v1258_v5  ;;  %v328_v11 = vld [vmem:[%s12825_s2 + $0x58] sm:$0xff] }
 0x14f   : > { %2581 = vmatpush.msra.mxu0 %v9029_v24  ;;  %2616 = vmatpush.msra.mxu1 %v8939_v51  ;;  %v1148_v51 = vadd.f32 %v9190_v10, %v1103_v7  ;;  %v9356_v10 = vpop.f32.mrf.mxu1  ;;  %v3012_v63 = vsub.f32 %v9275_v50, %v12956_v30  ;;  %v9370_v7 = vsub.f32 %v515_v13, %v9320_v18  ;;  %v12959_v24 = vand.u32 4294901760, %v9331_v23 }
 0x150   : > { %2697 = vmatpush.msra.mxu2 %v2515_v49  ;;  %2742 = vmatpush.msra.mxu3 %v9003_v32  ;;  %v316_v49 = vld [vmem:[%s7586_s28 + $0x68] sm:$0xff]  ;;  %v12963_v13 = vand.u32 4294901760, %v9325_v43  ;;  %v9385_v30 = vand.u32 4294901760, %v330_v42  ;;  %v1412_v5 = vadd.f32 %v9248_v31, %v1303_v33  ;;  %v9407_v33 = vsub.f32 %v332_v0, %v9372_v3  ;;  %s7104_s28 = sld [smem:[#allocation2 + $0x3]] }
 0x151   : > { %2584 = vmatmul.f32.vlgmr.msra.gmra.mxu0 %v9057_v27  ;;  %2618 = vmatpush.msra.mxu1 %v8953_v56  ;;  %13300 = vst [vmem:[#allocation44_spill] sm:$0xff] %v9370_v7  ;;  %v3001_v56 = vand.u32 4294901760, %v3000_v29  ;;  %v1221_v39 = vadd.f32 %v9192_v45, %v1148_v51  ;;  %v518_v29 = vsel %vm513_vm0, %v316_v49, 0  ;;  %v3018_v45 = vsub.f32 %v9309_v2, %v12958_v17 }
 0x152   : > { %2868 = vmatpush.msrb.mxu3 %v9284_v4  ;;  %2701 = vmatpush.msra.mxu2 %v2521_v55  ;;  %v9379_v55 = vsub.f32 %v334_v53, %v9333_v60  ;;  %v9392_v53 = vpop.f32.mrf.mxu3  ;;  %v3013_v49 = vand.u32 4294901760, %v3012_v63  ;;  %v9404_v31 = vand.u32 4294901760, %v9370_v7  ;;  %v9414_v17 = vand.u32 4294901760, %v328_v11 }
 0x153   : > { %2620 = vmatpush.msra.mxu1 %v8972_v19  ;;  %2744 = vmatmul.f32.vlgmr.msra.gmra.mxu3 %v9036_v16  ;;  %v3007_v19 = vand.u32 4294901760, %v3006_v41  ;;  %v9416_v51 = vand.u32 4294901760, %v518_v29  ;;  %v1262_v0 = vadd.f32 %v9210_v58, %v1221_v39  ;;  %v2809_v63 = vand.u32 4294901760, %v9364_v6  ;;  %v324_v39 = vld [vmem:[%s12825_s2 + $0x38] sm:$0xff] }
 0x154   : > { %2838 = vmatpush.msrb.mxu2 %v9325_v43  ;;  %2870 = vmatpush.msrb.mxu3 %v9317_v57  ;;  %13301 = vst [vmem:[#allocation28_spill] sm:$0xff] %v9404_v31  ;;  %v1470_v41 = vadd.f32 %v9250_v14, %v1412_v5  ;;  %v3019_v27 = vand.u32 4294901760, %v3018_v45  ;;  %v13303_v58 = vand.u32 4294901760, %v9350_v22  ;;  %v9442_v14 = vpop.f32.mrf.mxu2  ;;  %v2773_v5 = vsub.f32 %v9370_v7, %v9404_v31 }
 0x155   : > { %2703 = vmatmul.f32.vlgmr.msra.gmra.mxu2 %v9036_v16  ;;  %2622 = vmatpush.msra.mxu1 %v8988_v46  ;;  %13302 = vst [vmem:[#allocation45_spill] sm:$0xff] %v9416_v51  ;;  %v326_v46 = vld [vmem:[%s12825_s2 + $0x48] sm:$0xff]  ;;  %v1311_v16 = vadd.f32 %v9300_v40, %v1262_v0  ;;  %v13304_v40 = vand.u32 4294901760, %v9379_v55 }
 0x156   : > { %2996 = vmatpush.msra.mxu3 %v2995_v38  ;;  %2841 = vmatpush.msrb.mxu2 %v9364_v6  ;;  %v3024_v38 = vsub.f32 %v9331_v23, %v12959_v24  ;;  %v9429_v24 = vsub.f32 %v330_v42, %v9385_v30  ;;  %v9447_v45 = vand.u32 4294901760, %v326_v46 }
 0x157   : > { %2624 = vmatpush.msra.mxu1 %v9003_v32  ;;  %2767 = vmatpush.msrb.mxu0 %v9284_v4  ;;  %v3030_v32 = vsub.f32 %v9350_v22, %v13303_v58  ;;  %v1629_v42 = vpop.f32.mrf.mxu1  ;;  %v3036_v0 = vsub.f32 %v9379_v55, %v13304_v40  ;;  %v9466_v40 = vand.u32 4294901760, %v324_v39 }
 0x158   : > { %2943 = vmatpush.msra.mxu2 %v9201_v28  ;;  %3002 = vmatpush.msra.mxu3 %v3001_v56  ;;  %v2804_v56 = vsub.f32 %v9325_v43, %v12963_v13  ;;  %v3025_v58 = vand.u32 4294901760, %v3024_v38  ;;  %v9454_v13 = vsub.f32 %v328_v11, %v9414_v17  ;;  %v2810_v38 = vsub.f32 %v9364_v6, %v2809_v63 }
 0x159   : > { %2589 = vmatmul.f32.gmra.mxu0 %v9102_v59  ;;  %2628 = vmatmul.f32.vlgmr.msra.gmra.mxu1 %v9079_v44  ;;  %v9457_v59 = vsub.f32 %v518_v29, %v9416_v51  ;;  %v1514_v11 = vadd.f32 %v9280_v37, %v1470_v41  ;;  %v1416_v29 = vadd.f32 %v9356_v10, %v1311_v16  ;;  %v3031_v35 = vand.u32 4294901760, %v3030_v32  ;;  %v1592_v41 = vpop.f32.mrf.mxu0 }
 0x15a   : > { %2945 = vmatpush.msra.mxu2 %v9216_v54  ;;  %3008 = vmatpush.msra.mxu3 %v3007_v19  ;;  %v322_v19 = vld [vmem:[%s12825_s2 + $0x28] sm:$0xff]  ;;  %v9471_v26 = vpop.f32.mrf.mxu3  ;;  %v9476_v6 = vand.u32 4294901760, %v2773_v5  ;;  %v13308_v44 = vand.u32 4294901760, %v9407_v33  ;;  %v9482_v37 = vsub.f32 %v326_v46, %v9447_v45  ;;  %v2811_v46 = vand.u32 4294901760, %v2810_v38 }
 0x15b   : > { %13305 = vst [vmem:[#allocation43_spill] sm:$0xff] %v9457_v59  ;;  %2769 = vmatpush.msrb.mxu0 %v9317_v57  ;;  %2748 = vmatmul.f32.gmra.mxu3 %v9087_v48  ;;  %v9484_v16 = vand.u32 4294901760, %v322_v19  ;;  %v1589_v10 = vadd.f32 %v9394_v15, %v1514_v11  ;;  %v9493_v32 = vand.u32 4294901760, %v9457_v59  ;;  %v13310_v5 = vand.u32 4294901760, %v9429_v24 }
 0x15c   : > { %2947 = vmatpush.msra.mxu2 %v9230_v21  ;;  %3014 = vmatpush.msra.mxu3 %v3013_v49  ;;  %v2805_v49 = vand.u32 4294901760, %v2804_v56  ;;  %v13306_v56 = vand.u32 4294901760, %v9325_v43  ;;  %13307 = vst [vmem:[#allocation48_spill] sm:$0xff] %v9476_v6  ;;  %v3042_v52 = vsub.f32 %v9407_v33, %v13308_v44  ;;  %v12971_v43 = vand.u32 4294901760, %v9454_v13  ;;  %v1682_v11 = vpop.f32.mrf.mxu2 }
 0x15d   : > { %2707 = vmatmul.f32.gmra.mxu2 %v9087_v48  ;;  %13309 = vst [vmem:[#allocation50_spill] sm:$0xff] %v9493_v32  ;;  %v3037_v44 = vand.u32 4294901760, %v3036_v0  ;;  %v9499_v48 = vsub.f32 %v324_v39, %v9466_v40  ;;  %v1630_v15 = vadd.f32 %v1629_v42, %v1589_v10  ;;  %v1475_v0 = vadd.f32 %v9358_v34, %v1416_v29 }
 0x15e   : > { %2949 = vmatpush.msra.mxu2 %v9237_v61  ;;  %3020 = vmatpush.msra.mxu3 %v3019_v27  ;;  %v320_v27 = vld [vmem:[%s12825_s2 + $0x18] sm:$0xff]  ;;  %v12972_v39 = vand.u32 4294901760, %v9482_v37  ;;  %v9512_v42 = vsub.f32 %v322_v19, %v9484_v16  ;;  %v2781_v34 = vsub.f32 %v9457_v59, %v9493_v32 }
 0x15f   : > { %2901 = vmatpush.msra.mxu0 %v13306_v56  ;;  %2806 = vmatpush.msrb.mxu1 %v2805_v49  ;;  %v3048_v56 = vsub.f32 %v9429_v24, %v13310_v5  ;;  %v3043_v49 = vand.u32 4294901760, %v3042_v52  ;;  %v1633_v38 = vpop.f32.mrf.mxu1  ;;  %v1675_v10 = vadd.f32 %v9442_v14, %v1630_v15 }
 0x160   : > { %2951 = vmatpush.msra.mxu2 %v9268_v8  ;;  %3026 = vmatpush.msra.mxu3 %v3025_v58  ;;  %v9502_v58 = vand.u32 4294901760, %v320_v27  ;;  %v9538_v15 = vand.u32 4294901760, %v2781_v34 }
 0x161   : > { %2905 = vmatpush.msra.mxu0 %v2809_v63  ;;  %v318_v63 = vld [vmem:[%s12825_s2 + $0x8] sm:$0xff]  ;;  %2634 = vmatmul.f32.gmra.mxu1 %v9122_v62  ;;  %v3049_v52 = vand.u32 4294901760, %v3048_v56 }
 0x162   : > { %2953 = vmatpush.msra.mxu2 %v9290_v25  ;;  %3032 = vmatpush.msra.mxu3 %v3031_v35  ;;  %v3054_v35 = vsub.f32 %v9454_v13, %v12971_v43  ;;  %v9522_v19 = vand.u32 4294901760, %v318_v63  ;;  %v9528_v5 = vsub.f32 %v320_v27, %v9502_v58  ;;  %v1520_v43 = vadd.f32 %v9392_v53, %v1475_v0  ;;  %v1787_v14 = vpop.f32.mrf.mxu3  ;;  %v1841_v27 = vpop.f32.mrf.mxu0 }
 0x163   : > { %2775 = vmatmul.f32.vlgmr.msrb.gmra.mxu0 %v9476_v6  ;;  %2812 = vmatpush.msrb.mxu1 %v2811_v46  ;;  %v3071_v46 = vand.u32 4294901760, %v9512_v42  ;;  %13311 = vst [vmem:[#allocation51_spill] sm:$0xff] %v9538_v15  ;;  %v13312_v53 = vand.u32 4294901760, %v9499_v48 }
 0x164   : > { %3098 = vmatpush.msrb.mxu0 %v9228_v47  ;;  %2955 = vmatpush.msra.mxu2 %v9311_v36  ;;  %v3055_v56 = vand.u32 4294901760, %v3054_v35  ;;  %v1593_v29 = vadd.f32 %v1592_v41, %v1520_v43 }
 0x165   : > { %3038 = vmatpush.msra.mxu3 %v3037_v44  ;;  %2844 = vmatmul.f32.vlgmr.msrb.gmra.mxu2 %v9370_v7  ;;  %v3060_v44 = vsub.f32 %v9482_v37, %v12972_v39  ;;  %v3066_v0 = vsub.f32 %v9499_v48, %v13312_v53  ;;  %v1784_v39 = vadd.f32 %v9471_v26, %v1675_v10 }
 0x166   : > { %3101 = vmatpush.msrb.mxu0 %v9245_v12  ;;  %2957 = vmatpush.msra.mxu2 %v9333_v60  ;;  %v1634_v35 = vadd.f32 %v1633_v38, %v1593_v29  ;;  %v3072_v43 = vsub.f32 %v9512_v42, %v3071_v46 }
 0x167   : > { %3044 = vmatpush.msra.mxu3 %v3043_v49  ;;  %2930 = vmatpush.msra.mxu1 %v9284_v4  ;;  %v9545_v49 = vsub.f32 %v318_v63, %v9522_v19  ;;  %v3077_v4 = vand.u32 4294901760, %v9528_v5  ;;  %v3061_v41 = vand.u32 4294901760, %v3060_v44  ;;  %v1842_v26 = vadd.f32 %v1841_v27, %v1784_v39 }
 0x168   : > { %3104 = vmatpush.msrb.mxu0 %v9266_v20  ;;  %2959 = vmatpush.msra.mxu2 %v9372_v3  ;;  %v3067_v63 = vand.u32 4294901760, %v3066_v0  ;;  %v1683_v10 = vadd.f32 %v1682_v11, %v1634_v35  ;;  %v3073_v39 = vand.u32 4294901760, %v3072_v43 }
 0x169   : > { %3050 = vmatpush.msra.mxu3 %v3049_v52  ;;  %2932 = vmatpush.msra.mxu1 %v9317_v57  ;;  %v3083_v34 = vand.u32 4294901760, %v9545_v49  ;;  %v3078_v52 = vsub.f32 %v9528_v5, %v3077_v4 }
 0x16a   : > { %2874 = vmatmul.f32.vlgmr.msrb.gmra.mxu3 %v9404_v31  ;;  %3107 = vmatpush.msrb.mxu0 %v9275_v50  ;;  %v1788_v35 = vadd.f32 %v1787_v14, %v1683_v10  ;;  %v13313_v10 = vand.u32 4294901760, %v9228_v47 }
 0x16b   : > { %2961 = vmatpush.msra.mxu2 %v9385_v30  ;;  %3056 = vmatpush.msra.mxu3 %v3055_v56  ;;  %v3084_v27 = vsub.f32 %v9545_v49, %v3083_v34  ;;  %v3079_v11 = vand.u32 4294901760, %v3078_v52  ;;  %v1846_v53 = vpop.f32.mrf.mxu0 }
 0x16c   : > { %2783 = vmatmul.f32.gmra.mxu0 %v9538_v15  ;;  %2814 = vmatmul.f32.vlgmr.msrb.gmra.mxu1 %v9320_v18  ;;  %v1885_v38 = vpop.f32.mrf.mxu1  ;;  %v1847_v43 = vadd.f32 %v1846_v53, %v1788_v35  ;;  %v13317_v35 = vand.u32 4294901760, %v9309_v2 }
 0x16d   : > { %3110 = vmatpush.msrb.mxu0 %v9309_v2  ;;  %v1960_v57 = vpop.f32.mrf.mxu2  ;;  %3156 = vmatpush.msrb.mxu1 %v9201_v28  ;;  %v1886_v29 = vadd.f32 %v1885_v38, %v1842_v26  ;;  %v13318_v2 = vand.u32 4294901760, %v9331_v23 }
 0x16e   : > { %2963 = vmatpush.msra.mxu2 %v9414_v17  ;;  %3062 = vmatpush.msra.mxu3 %v3061_v41  ;;  %v3085_v41 = vand.u32 4294901760, %v3084_v27 }
 0x16f   : > { %3113 = vmatpush.msrb.mxu0 %v9331_v23  ;;  %3158 = vmatpush.msrb.mxu1 %v9216_v54  ;;  %v1961_v44 = vadd.f32 %v1960_v57, %v1886_v29  ;;  %v2001_v56 = vpop.f32.mrf.mxu3  ;;  %v380_v57 = vld [vmem:[%s12825_s2 + $0x1f8] sm:$0xff] }
 0x170   : > { %2965 = vmatpush.msra.mxu2 %v9447_v45  ;;  %3068 = vmatpush.msra.mxu3 %v3067_v63 }
 0x171   : > { %2849 = vmatmul.f32.gmra.mxu2 %v9457_v59  ;;  %3116 = vmatpush.msrb.mxu0 %v9350_v22  ;;  %v9574_v0 = vadd.f32 %v2001_v56, %v1961_v44  ;;  %v13314_v44 = vand.u32 4294901760, %v9245_v12  ;;  %v13315_v56 = vand.u32 4294901760, %v9266_v20  ;;  %v372_v20 = vld [vmem:[%s12825_s2 + $0x1b8] sm:$0xff]  ;;  %v13392_v59 = vld [vmem:[#allocation30_spill] sm:$0xff] }
 0x172   : > { %3160 = vmatpush.msrb.mxu1 %v9230_v21  ;;  %2967 = vmatpush.msra.mxu2 %v9466_v40 }
 0x173   : > { %3074 = vmatpush.msra.mxu3 %v3073_v39  ;;  %3119 = vmatpush.msrb.mxu0 %v9379_v55  ;;  %v378_v39 = vld [vmem:[%s12825_s2 + $0x1e8] sm:$0xff] }
 0x174   : > { %2880 = vmatmul.f32.gmra.mxu3 %v9493_v32  ;;  %3162 = vmatpush.msrb.mxu1 %v9237_v61  ;;  %v9616_v47 = vand.u32 4294901760, %v378_v39 }
 0x175   : > { %2969 = vmatpush.msra.mxu2 %v9484_v16  ;;  %3080 = vmatpush.msra.mxu3 %v3079_v11  ;;  %v1891_v26 = vpop.f32.mrf.mxu1  ;;  %v13316_v11 = vand.u32 4294901760, %v9275_v50 }
 0x176   : > { %2818 = vmatmul.f32.gmra.mxu1 %v9416_v51  ;;  %2907 = vmatmul.f32.vlgmr.msra.gmra.mxu0 %v9320_v18  ;;  %v1892_v14 = vadd.f32 %v1891_v26, %v1847_v43  ;;  %v1964_v63 = vpop.f32.mrf.mxu2  ;;  %v368_v26 = vld [vmem:[%s12825_s2 + $0x198] sm:$0xff] }
 0x177   : > { %3164 = vmatpush.msrb.mxu1 %v9268_v8  ;;  %3122 = vmatpush.msrb.mxu0 %v9407_v33 }
 0x178   : > { %2971 = vmatpush.msra.mxu2 %v9502_v58  ;;  %3086 = vmatpush.msra.mxu3 %v3085_v41  ;;  %v1965_v38 = vadd.f32 %v1964_v63, %v1892_v14  ;;  %v9650_v41 = vand.u32 4294901760, %v372_v20  ;;  %v13319_v63 = vand.u32 4294901760, %v9350_v22  ;;  %v13320_v22 = vand.u32 4294901760, %v9379_v55 }
 0x179   : > { %3166 = vmatpush.msrb.mxu1 %v9290_v25  ;;  %3125 = vmatpush.msrb.mxu0 %v9429_v24  ;;  %v2005_v52 = vpop.f32.mrf.mxu3 }
 0x17a   : > { %3274 = vmatpush.msrb.mxu3 %v9201_v28  ;;  %2973 = vmatpush.msra.mxu2 %v9522_v19  ;;  %v9594_v29 = vadd.f32 %v2005_v52, %v1965_v38  ;;  %v9601_v28 = vand.u32 4294901760, %v380_v57  ;;  %v9685_v52 = vsub.f32 %v372_v20, %v9650_v41 }
 0x17b   : > { %3168 = vmatpush.msrb.mxu1 %v9311_v36  ;;  %3128 = vmatpush.msrb.mxu0 %v9454_v13 }
 0x17c   : > { %3203 = vmatpush.msrb.mxu2 %v13313_v10  ;;  %3276 = vmatpush.msrb.mxu3 %v9216_v54  ;;  %v376_v54 = vld [vmem:[%s12825_s2 + $0x1d8] sm:$0xff]  ;;  %v9622_v12 = vsub.f32 %v380_v57, %v9601_v28  ;;  %v366_v57 = vld [vmem:[%s12825_s2 + $0x188] sm:$0xff]  ;;  %v9690_v10 = vand.u32 4294901760, %v368_v26 }
 0x17d   : > { %3170 = vmatpush.msrb.mxu1 %v9333_v60  ;;  %3131 = vmatpush.msrb.mxu0 %v9482_v37  ;;  %v9629_v27 = vand.u32 4294901760, %v376_v54  ;;  %v9701_v55 = vand.u32 4294901760, %v366_v57 }
 0x17e   : > { %3207 = vmatpush.msrb.mxu2 %v13314_v44  ;;  %3278 = vmatpush.msrb.mxu3 %v9230_v21  ;;  %v374_v21 = vld [vmem:[%s12825_s2 + $0x1c8] sm:$0xff]  ;;  %v3365_v50 = vand.u32 4294901760, %v9622_v12  ;;  %v13321_v44 = vand.u32 4294901760, %v9407_v33  ;;  %v3389_v33 = vand.u32 4294901760, %v9685_v52  ;;  %v9719_v20 = vsub.f32 %v368_v26, %v9690_v10 }
 0x17f   : > { %2911 = vmatmul.f32.gmra.mxu0 %v9416_v51  ;;  %2934 = vmatmul.f32.vlgmr.msra.gmra.mxu1 %v9320_v18  ;;  %v9639_v53 = vand.u32 4294901760, %v374_v21  ;;  %v9656_v43 = vsub.f32 %v376_v54, %v9629_v27  ;;  %v9734_v26 = vsub.f32 %v366_v57, %v9701_v55  ;;  %v360_v57 = vld [vmem:[%s12825_s2 + $0x158] sm:$0xff] }
 0x180   : > { %3134 = vmatpush.msrb.mxu0 %v9499_v48  ;;  %3172 = vmatpush.msrb.mxu1 %v9372_v3 }
 0x181   : > { %3211 = vmatpush.msrb.mxu2 %v13315_v56  ;;  %3280 = vmatpush.msrb.mxu3 %v9237_v61  ;;  %v9642_v61 = vsub.f32 %v378_v39, %v9616_v47  ;;  %v9668_v14 = vsub.f32 %v374_v21, %v9639_v53  ;;  %v3377_v38 = vand.u32 4294901760, %v9656_v43  ;;  %v364_v56 = vld [vmem:[%s12825_s2 + $0x178] sm:$0xff] }
 0x182   : > { %3137 = vmatpush.msrb.mxu0 %v9512_v42  ;;  %3174 = vmatpush.msrb.mxu1 %v9385_v30 }
 0x183   : > { %3215 = vmatpush.msrb.mxu2 %v13316_v11  ;;  %3282 = vmatpush.msrb.mxu3 %v9268_v8  ;;  %v370_v8 = vld [vmem:[%s12825_s2 + $0x1a8] sm:$0xff]  ;;  %v3383_v39 = vand.u32 4294901760, %v9668_v14  ;;  %v3378_v21 = vsub.f32 %v9656_v43, %v3377_v38  ;;  %v13322_v11 = vand.u32 4294901760, %v9429_v24 }
 0x184   : > { %3140 = vmatpush.msrb.mxu0 %v9528_v5  ;;  %3176 = vmatpush.msrb.mxu1 %v9414_v17  ;;  %v9676_v23 = vand.u32 4294901760, %v370_v8 }
 0x185   : > { %3219 = vmatpush.msrb.mxu2 %v13317_v35  ;;  %3284 = vmatpush.msrb.mxu3 %v9290_v25  ;;  %v3371_v25 = vand.u32 4294901760, %v9642_v61 }
 0x186   : > { %3143 = vmatpush.msrb.mxu0 %v9545_v49  ;;  %3178 = vmatpush.msrb.mxu1 %v9447_v45 }
 0x187   : > { %3223 = vmatpush.msrb.mxu2 %v13318_v2  ;;  %3286 = vmatpush.msrb.mxu3 %v9311_v36  ;;  %v3366_v36 = vsub.f32 %v9622_v12, %v3365_v50  ;;  %v362_v2 = vld [vmem:[%s12825_s2 + $0x168] sm:$0xff] }
 0x188   : > { %3315 = vmatpush.msra.mxu0 %v9601_v28  ;;  %2938 = vmatmul.f32.gmra.mxu1 %v9416_v51 }
 0x189   : > { %3227 = vmatpush.msrb.mxu2 %v13319_v63  ;;  %3180 = vmatpush.msrb.mxu1 %v9466_v40  ;;  %v3367_v54 = vand.u32 4294901760, %v3366_v36  ;;  %v3379_v63 = vand.u32 4294901760, %v3378_v21  ;;  %v3390_v36 = vsub.f32 %v9685_v52, %v3389_v33 }
 0x18a   : > { %3288 = vmatpush.msrb.mxu3 %v9333_v60  ;;  %3317 = vmatpush.msra.mxu0 %v9616_v47  ;;  %v3372_v60 = vsub.f32 %v9642_v61, %v3371_v25 }
 0x18b   : > { %3231 = vmatpush.msrb.mxu2 %v13320_v22  ;;  %3182 = vmatpush.msrb.mxu1 %v9484_v16  ;;  %v13324_v22 = vld [vmem:[#allocation15_spill] sm:$0xff] }
 0x18c   : > { %3290 = vmatpush.msrb.mxu3 %v9372_v3  ;;  %3319 = vmatpush.msra.mxu0 %v9629_v27  ;;  %v9707_v3 = vsub.f32 %v370_v8, %v9676_v23  ;;  %v3373_v35 = vand.u32 4294901760, %v3372_v60  ;;  %v9726_v8 = vand.u32 4294901760, %v364_v56  ;;  %v9744_v60 = vand.u32 4294901760, %v362_v2 }
 0x18d   : > { %3235 = vmatpush.msrb.mxu2 %v13321_v44  ;;  %3184 = vmatpush.msrb.mxu1 %v9502_v58 }
 0x18e   : > { %3292 = vmatpush.msrb.mxu3 %v9385_v30  ;;  %3321 = vmatpush.msra.mxu0 %v9639_v53  ;;  %v3384_v30 = vsub.f32 %v9668_v14, %v3383_v39  ;;  %v3395_v24 = vand.u32 4294901760, %v9707_v3 }
 0x18f   : > { %3239 = vmatpush.msrb.mxu2 %v13322_v11  ;;  %3186 = vmatpush.msrb.mxu1 %v9522_v19  ;;  %v358_v11 = vld [vmem:[%s12825_s2 + $0x148] sm:$0xff] }
 0x190   : > { %3294 = vmatpush.msrb.mxu3 %v9414_v17  ;;  %3323 = vmatpush.msra.mxu0 %v9650_v41  ;;  %v13323_v17 = vand.u32 4294901760, %v9454_v13  ;;  %v12976_v13 = vand.u32 4294901760, %v9719_v20  ;;  %v3385_v44 = vand.u32 4294901760, %v3384_v30  ;;  %v3396_v21 = vsub.f32 %v9707_v3, %v3395_v24 }
 0x191   : > { %3368 = vmatpush.msra.mxu1 %v3367_v54  ;;  %2979 = vmatmul.f32.vlgmr.msra.gmra.mxu2 %v13324_v22  ;;  %v9753_v54 = vsub.f32 %v364_v56, %v9726_v8  ;;  %v3391_v30 = vand.u32 4294901760, %v3390_v36  ;;  %v9765_v56 = vand.u32 4294901760, %v360_v57  ;;  %v356_v22 = vld [vmem:[%s12825_s2 + $0x138] sm:$0xff] }
 0x192   : > { %3243 = vmatpush.msrb.mxu2 %v13323_v17  ;;  %3296 = vmatpush.msrb.mxu3 %v9447_v45  ;;  %v13325_v45 = vand.u32 4294901760, %v9482_v37  ;;  %v13326_v37 = vld [vmem:[#allocation10_spill] sm:$0xff]  ;;  %v3402_v17 = vsub.f32 %v9719_v20, %v12976_v13 }
 0x193   : > { %3325 = vmatpush.msra.mxu0 %v9676_v23  ;;  %3374 = vmatpush.msra.mxu1 %v3373_v35  ;;  %v12974_v35 = vand.u32 4294901760, %v9734_v26 }
 0x194   : > { %3247 = vmatpush.msrb.mxu2 %v13325_v45  ;;  %3298 = vmatpush.msrb.mxu3 %v9466_v40  ;;  %v13327_v40 = vand.u32 4294901760, %v9499_v48  ;;  %v9777_v45 = vsub.f32 %v362_v2, %v9744_v60  ;;  %v12973_v48 = vand.u32 4294901760, %v9753_v54  ;;  %v354_v2 = vld [vmem:[%s12825_s2 + $0x128] sm:$0xff] }
 0x195   : > { %3327 = vmatpush.msra.mxu0 %v9690_v10  ;;  %3088 = vmatmul.f32.vlgmr.msra.gmra.mxu3 %v13326_v37  ;;  %v3408_v36 = vsub.f32 %v9734_v26, %v12974_v35 }
 0x196   : > { %3380 = vmatpush.msra.mxu1 %v3379_v63  ;;  %3251 = vmatpush.msrb.mxu2 %v13327_v40  ;;  %v9780_v63 = vand.u32 4294901760, %v358_v11  ;;  %v9796_v40 = vsub.f32 %v360_v57, %v9765_v56  ;;  %v12975_v42 = vand.u32 4294901760, %v9777_v45  ;;  %v3414_v57 = vsub.f32 %v9753_v54, %v12973_v48  ;;  %v350_v48 = vld [vmem:[%s12825_s2 + $0x108] sm:$0xff] }
 0x197   : > { %3300 = vmatpush.msrb.mxu3 %v9484_v16  ;;  %3329 = vmatpush.msra.mxu0 %v9701_v55  ;;  %v3397_v16 = vand.u32 4294901760, %v3396_v21  ;;  %v13328_v21 = vld [vmem:[#allocation19_spill] sm:$0xff] }
 0x198   : > { %3386 = vmatpush.msra.mxu1 %v3385_v44  ;;  %3255 = vmatpush.msrb.mxu2 %v3071_v46  ;;  %v9793_v44 = vand.u32 4294901760, %v356_v22  ;;  %v352_v46 = vld [vmem:[%s12825_s2 + $0x118] sm:$0xff]  ;;  %v9813_v5 = vsub.f32 %v358_v11, %v9780_v63  ;;  %v3420_v49 = vsub.f32 %v9777_v45, %v12975_v42 }
 0x199   : > { %3302 = vmatpush.msrb.mxu3 %v9502_v58  ;;  %3331 = vmatpush.msra.mxu0 %v9726_v8  ;;  %v3403_v58 = vand.u32 4294901760, %v3402_v17  ;;  %v9819_v17 = vand.u32 4294901760, %v352_v46 }
 0x19a   : > { %3392 = vmatpush.msra.mxu1 %v3391_v30  ;;  %3259 = vmatpush.msrb.mxu2 %v3077_v4  ;;  %v9810_v30 = vand.u32 4294901760, %v354_v2  ;;  %v13329_v4 = vld [vmem:[#allocation13_spill] sm:$0xff]  ;;  %v9826_v11 = vsub.f32 %v356_v22, %v9793_v44  ;;  %v9839_v22 = vand.u32 4294901760, %v350_v48 }
 0x19b   : > { %3304 = vmatpush.msrb.mxu3 %v9522_v19  ;;  %2987 = vmatmul.f32.gmra.mxu2 %v13328_v21  ;;  %v3409_v19 = vand.u32 4294901760, %v3408_v36  ;;  %v12978_v21 = vand.u32 4294901760, %v9796_v40  ;;  %v12977_v36 = vand.u32 4294901760, %v9813_v5 }
 0x19c   : > { %3333 = vmatpush.msra.mxu0 %v9744_v60  ;;  %3398 = vmatpush.msra.mxu1 %v3397_v16  ;;  %v13330_v16 = vld [vmem:[#allocation11_spill] sm:$0xff]  ;;  %v9836_v35 = vsub.f32 %v354_v2, %v9810_v30  ;;  %v13331_v2 = vld [vmem:[#allocation12_spill] sm:$0xff] }
 0x19d   : > { %3528 = vmatpush.msra.mxu3 %v9601_v28  ;;  %3263 = vmatpush.msrb.mxu2 %v3083_v34  ;;  %v3415_v34 = vand.u32 4294901760, %v3414_v57  ;;  %v12979_v57 = vand.u32 4294901760, %v9826_v11  ;;  %v3432_v42 = vsub.f32 %v9813_v5, %v12977_v36  ;;  %v13332_v36 = vld [vmem:[#allocation14_spill] sm:$0xff] }
 0x19e   : > { %3092 = vmatmul.f32.gmra.mxu3 %v13329_v4  ;;  %3146 = vmatmul.f32.vlgmr.msrb.gmra.mxu0 %v13330_v16  ;;  %v9848_v16 = vsub.f32 %v352_v46, %v9819_v17  ;;  %v3443_v13 = vand.u32 4294901760, %v9836_v35  ;;  %v9860_v46 = vsub.f32 %v350_v48, %v9839_v22 }
 0x19f   : > { %3404 = vmatpush.msra.mxu1 %v3403_v58  ;;  %3335 = vmatpush.msra.mxu0 %v9765_v56  ;;  %v3426_v58 = vsub.f32 %v9796_v40, %v12978_v21  ;;  %v3433_v48 = vand.u32 4294901760, %v3432_v42  ;;  %v412_v42 = vld [vmem:[%s12825_s2 + $0x2f8] sm:$0xff] }
 0x1a0   : > { %3470 = vmatpush.msra.mxu2 %v9622_v12  ;;  %3530 = vmatpush.msra.mxu3 %v9616_v47  ;;  %v3444_v21 = vsub.f32 %v9836_v35, %v3443_v13 }
 0x1a1   : > { %3410 = vmatpush.msra.mxu1 %v3409_v19  ;;  %3337 = vmatpush.msra.mxu0 %v9780_v63  ;;  %v3421_v19 = vand.u32 4294901760, %v3420_v49  ;;  %v3427_v49 = vand.u32 4294901760, %v3426_v58  ;;  %v3455_v58 = vand.u32 4294901760, %v9860_v46 }
 0x1a2   : > { %3473 = vmatpush.msra.mxu2 %v9642_v61  ;;  %3532 = vmatpush.msra.mxu3 %v9629_v27 }
 0x1a3   : > { %3190 = vmatmul.f32.vlgmr.msrb.gmra.mxu1 %v13331_v2  ;;  %3339 = vmatpush.msra.mxu0 %v9793_v44  ;;  %v3449_v2 = vand.u32 4294901760, %v9848_v16 }
 0x1a4   : > { %3416 = vmatpush.msra.mxu1 %v3415_v34  ;;  %3476 = vmatpush.msra.mxu2 %v9656_v43  ;;  %v3438_v34 = vsub.f32 %v9826_v11, %v12979_v57  ;;  %v406_v43 = vld [vmem:[%s12825_s2 + $0x2c8] sm:$0xff] }
 0x1a5   : > { %3534 = vmatpush.msra.mxu3 %v9639_v53  ;;  %3265 = vmatmul.f32.vlgmr.msrb.gmra.mxu2 %v13326_v37  ;;  %v3450_v57 = vsub.f32 %v9848_v16, %v3449_v2 }
 0x1a6   : > { %3341 = vmatpush.msra.mxu0 %v9810_v30  ;;  %3422 = vmatpush.msra.mxu1 %v3421_v19  ;;  %v3439_v19 = vand.u32 4294901760, %v3438_v34 }
 0x1a7   : > { %3479 = vmatpush.msra.mxu2 %v9668_v14  ;;  %3536 = vmatpush.msra.mxu3 %v9650_v41  ;;  %v3451_v34 = vand.u32 4294901760, %v3450_v57  ;;  %v404_v14 = vld [vmem:[%s12825_s2 + $0x2b8] sm:$0xff] }
 0x1a8   : > { %3151 = vmatmul.f32.gmra.mxu0 %v13332_v36  ;;  %3306 = vmatmul.f32.vlgmr.msrb.gmra.mxu3 %v13326_v37  ;;  %v3445_v37 = vand.u32 4294901760, %v3444_v21  ;;  %v13333_v36 = vld [vmem:[#allocation16_spill] sm:$0xff]  ;;  %v9896_v21 = vand.u32 4294901760, %v412_v42 }
 0x1a9   : > { %3343 = vmatpush.msra.mxu0 %v9819_v17  ;;  %3428 = vmatpush.msra.mxu1 %v3427_v49  ;;  %v3456_v49 = vsub.f32 %v9860_v46, %v3455_v58 }
 0x1aa   : > { %3482 = vmatpush.msra.mxu2 %v9685_v52  ;;  %3538 = vmatpush.msra.mxu3 %v9676_v23  ;;  %v9915_v61 = vsub.f32 %v412_v42, %v9896_v21  ;;  %v9938_v42 = vand.u32 4294901760, %v406_v43 }
 0x1ab   : > { %3345 = vmatpush.msra.mxu0 %v9839_v22  ;;  %3434 = vmatpush.msra.mxu1 %v3433_v48  ;;  %v410_v48 = vld [vmem:[%s12825_s2 + $0x2e8] sm:$0xff]  ;;  %v3457_v12 = vand.u32 4294901760, %v3456_v49 }
 0x1ac   : > { %3485 = vmatpush.msra.mxu2 %v9707_v3  ;;  %3540 = vmatpush.msra.mxu3 %v9690_v10  ;;  %v9910_v57 = vand.u32 4294901760, %v410_v48  ;;  %v402_v49 = vld [vmem:[%s12825_s2 + $0x2a8] sm:$0xff] }
 0x1ad   : > { %3196 = vmatmul.f32.gmra.mxu1 %v13333_v36  ;;  %3575 = vmatpush.msrb.mxu0 %v3365_v50  ;;  %v408_v50 = vld [vmem:[%s12825_s2 + $0x2d8] sm:$0xff] }
 0x1ae   : > { %3440 = vmatpush.msra.mxu1 %v3439_v19  ;;  %3488 = vmatpush.msra.mxu2 %v9719_v20  ;;  %v13334_v19 = vld [vmem:[#allocation5_spill] sm:$0xff] }
 0x1af   : > { %3542 = vmatpush.msra.mxu3 %v9701_v55  ;;  %3579 = vmatpush.msrb.mxu0 %v3371_v25  ;;  %v9920_v25 = vand.u32 4294901760, %v408_v50 }
 0x1b0   : > { %3446 = vmatpush.msra.mxu1 %v3445_v37  ;;  %3491 = vmatpush.msra.mxu2 %v9734_v26  ;;  %v9929_v37 = vsub.f32 %v410_v48, %v9910_v57  ;;  %v13337_v48 = vand.u32 4294901760, %v9734_v26 }
 0x1b1   : > { %3544 = vmatpush.msra.mxu3 %v9726_v8  ;;  %3583 = vmatpush.msrb.mxu0 %v3377_v38  ;;  %v13335_v38 = vld [vmem:[#allocation17_spill] sm:$0xff]  ;;  %v9943_v36 = vsub.f32 %v408_v50, %v9920_v25 }
 0x1b2   : > { %3452 = vmatpush.msra.mxu1 %v3451_v34  ;;  %3351 = vmatmul.f32.vlgmr.msra.gmra.mxu0 %v13334_v19  ;;  %v12982_v52 = vand.u32 4294901760, %v9929_v37  ;;  %v400_v34 = vld [vmem:[%s12825_s2 + $0x298] sm:$0xff]  ;;  %v398_v19 = vld [vmem:[%s12825_s2 + $0x288] sm:$0xff] }
 0x1b3   : > { %3494 = vmatpush.msra.mxu2 %v9753_v54  ;;  %3546 = vmatpush.msra.mxu3 %v9744_v60  ;;  %v9984_v50 = vand.u32 4294901760, %v400_v34 }
 0x1b4   : > { %3587 = vmatpush.msrb.mxu0 %v3383_v39  ;;  %3458 = vmatpush.msra.mxu1 %v3457_v12  ;;  %v12984_v39 = vand.u32 4294901760, %v9915_v61 }
 0x1b5   : > { %3497 = vmatpush.msra.mxu2 %v9777_v45  ;;  %3548 = vmatpush.msra.mxu3 %v9765_v56 }
 0x1b6   : > { %3460 = vmatmul.f32.vlgmr.msra.gmra.mxu1 %v13335_v38  ;;  %3591 = vmatpush.msrb.mxu0 %v3389_v33  ;;  %v13336_v33 = vand.u32 4294901760, %v9719_v20  ;;  %v3738_v3 = vsub.f32 %v9915_v61, %v12984_v39  ;;  %v12980_v20 = vand.u32 4294901760, %v9943_v36 }
 0x1b7   : > { %3646 = vmatpush.msrb.mxu1 %v9601_v28  ;;  %3500 = vmatpush.msra.mxu2 %v9796_v40  ;;  %v9951_v28 = vand.u32 4294901760, %v404_v14 }
 0x1b8   : > { %3550 = vmatpush.msra.mxu3 %v9780_v63  ;;  %3595 = vmatpush.msrb.mxu0 %v3395_v24  ;;  %v9963_v24 = vsub.f32 %v406_v43, %v9938_v42  ;;  %v3739_v26 = vand.u32 4294901760, %v3738_v3  ;;  %v10007_v3 = vand.u32 4294901760, %v398_v19 }
 0x1b9   : > { %3648 = vmatpush.msrb.mxu1 %v9616_v47  ;;  %3503 = vmatpush.msra.mxu2 %v9813_v5  ;;  %v9965_v47 = vand.u32 4294901760, %v402_v49  ;;  %v9977_v12 = vsub.f32 %v404_v14, %v9951_v28  ;;  %v3750_v14 = vsub.f32 %v9943_v36, %v12980_v20 }
 0x1ba   : > { %3552 = vmatpush.msra.mxu3 %v9793_v44  ;;  %3269 = vmatmul.f32.gmra.mxu2 %v13329_v4  ;;  %v12981_v43 = vand.u32 4294901760, %v9963_v24 }
 0x1bb   : > { %3599 = vmatpush.msrb.mxu0 %v13336_v33  ;;  %3650 = vmatpush.msrb.mxu1 %v9629_v27  ;;  %v3744_v27 = vsub.f32 %v9929_v37, %v12982_v52  ;;  %v396_v33 = vld [vmem:[%s12825_s2 + $0x278] sm:$0xff]  ;;  %v10037_v52 = vsub.f32 %v398_v19, %v10007_v3 }
 0x1bc   : > { %3506 = vmatpush.msra.mxu2 %v9826_v11  ;;  %3554 = vmatpush.msra.mxu3 %v9810_v30  ;;  %v3756_v20 = vsub.f32 %v9963_v24, %v12981_v43 }
 0x1bd   : > { %3603 = vmatpush.msrb.mxu0 %v13337_v48  ;;  %3310 = vmatmul.f32.gmra.mxu3 %v13329_v4  ;;  %v9993_v4 = vsub.f32 %v402_v49, %v9965_v47  ;;  %v12983_v49 = vand.u32 4294901760, %v9977_v12  ;;  %v10013_v48 = vsub.f32 %v400_v34, %v9984_v50  ;;  %v13341_v34 = vand.u32 4294901760, %v9796_v40 }
 0x1be   : > { %3652 = vmatpush.msrb.mxu1 %v9639_v53  ;;  %3509 = vmatpush.msra.mxu2 %v9836_v35  ;;  %v13338_v53 = vand.u32 4294901760, %v9753_v54  ;;  %v13339_v54 = vand.u32 4294901760, %v9777_v45  ;;  %v13342_v40 = vand.u32 4294901760, %v9813_v5  ;;  %v390_v5 = vld [vmem:[%s12825_s2 + $0x248] sm:$0xff] }
 0x1bf   : > { %3556 = vmatpush.msra.mxu3 %v9819_v17  ;;  %v3767_v45 = vand.u32 4294901760, %v9993_v4  ;;  %v3762_v43 = vsub.f32 %v9977_v12, %v12983_v49 }
 0x1c0   : > { %3607 = vmatpush.msrb.mxu0 %v13338_v53  ;;  %3654 = vmatpush.msrb.mxu1 %v9650_v41  ;;  %v3745_v41 = vand.u32 4294901760, %v3744_v27  ;;  %v394_v53 = vld [vmem:[%s12825_s2 + $0x268] sm:$0xff]  ;;  %v3751_v27 = vand.u32 4294901760, %v3750_v14  ;;  %v12987_v14 = vand.u32 4294901760, %v10013_v48 }
 0x1c1   : > { %3512 = vmatpush.msra.mxu2 %v9848_v16  ;;  %3558 = vmatpush.msra.mxu3 %v9839_v22  ;;  %v3768_v49 = vsub.f32 %v9993_v4, %v3767_v45  ;;  %v382_v16 = vld [vmem:[%s12825_s2 + $0x208] sm:$0xff] }
 0x1c2   : > { %3611 = vmatpush.msrb.mxu0 %v13339_v54  ;;  %3656 = vmatpush.msrb.mxu1 %v9676_v23  ;;  %v10023_v54 = vand.u32 4294901760, %v396_v33  ;;  %v13340_v23 = vld [vmem:[#allocation18_spill] sm:$0xff] }
 0x1c3   : > { %3740 = vmatpush.msrb.mxu3 %v3739_v26  ;;  %3515 = vmatpush.msra.mxu2 %v9860_v46  ;;  %v392_v26 = vld [vmem:[%s12825_s2 + $0x258] sm:$0xff] }
 0x1c4   : > { %3518 = vmatmul.f32.vlgmr.msra.gmra.mxu2 %v13340_v23  ;;  %3615 = vmatpush.msrb.mxu0 %v13341_v34  ;;  %v10039_v23 = vand.u32 4294901760, %v394_v53  ;;  %v13343_v34 = vld [vmem:[#allocation20_spill] sm:$0xff]  ;;  %v10050_v19 = vsub.f32 %v396_v33, %v10023_v54  ;;  %v10052_v39 = vand.u32 4294901760, %v392_v26 }
 0x1c5   : > { %3658 = vmatpush.msrb.mxu1 %v9690_v10  ;;  %3687 = vmatpush.msrb.mxu2 %v9896_v21  ;;  %v3757_v10 = vand.u32 4294901760, %v3756_v20  ;;  %v12985_v20 = vand.u32 4294901760, %v10037_v52  ;;  %v388_v33 = vld [vmem:[%s12825_s2 + $0x238] sm:$0xff] }
 0x1c6   : > { %3746 = vmatpush.msrb.mxu3 %v3745_v41  ;;  %3619 = vmatpush.msrb.mxu0 %v13342_v40  ;;  %v13344_v41 = vld [vmem:[#allocation7_spill] sm:$0xff]  ;;  %v10062_v40 = vsub.f32 %v394_v53, %v10039_v23  ;;  %v12986_v53 = vand.u32 4294901760, %v10050_v19 }
 0x1c7   : > { %3562 = vmatmul.f32.vlgmr.msra.gmra.mxu3 %v13343_v34  ;;  %3660 = vmatpush.msrb.mxu1 %v9701_v55  ;;  %v3763_v55 = vand.u32 4294901760, %v3762_v43  ;;  %v13345_v34 = vand.u32 4294901760, %v9826_v11  ;;  %v3769_v43 = vand.u32 4294901760, %v3768_v49  ;;  %v386_v11 = vld [vmem:[%s12825_s2 + $0x228] sm:$0xff] }
 0x1c8   : > { %3689 = vmatpush.msrb.mxu2 %v9910_v57  ;;  %3752 = vmatpush.msrb.mxu3 %v3751_v27  ;;  %v3774_v27 = vsub.f32 %v10013_v48, %v12987_v14  ;;  %v3791_v49 = vand.u32 4294901760, %v10062_v40  ;;  %v10130_v14 = vand.u32 4294901760, %v382_v16 }
 0x1c9   : > { %3359 = vmatmul.f32.gmra.mxu0 %v13344_v41  ;;  %3662 = vmatpush.msrb.mxu1 %v9726_v8  ;;  %v10073_v8 = vand.u32 4294901760, %v390_v5  ;;  %v10078_v41 = vsub.f32 %v392_v26, %v10052_v39  ;;  %v384_v26 = vld [vmem:[%s12825_s2 + $0x218] sm:$0xff] }
 0x1ca   : > { %3623 = vmatpush.msrb.mxu0 %v13345_v34  ;;  %3691 = vmatpush.msrb.mxu2 %v9920_v25  ;;  %v10086_v34 = vand.u32 4294901760, %v388_v33 }
 0x1cb   : > { %3758 = vmatpush.msrb.mxu3 %v3757_v10  ;;  %3664 = vmatpush.msrb.mxu1 %v9744_v60  ;;  %v13346_v10 = vld [vmem:[#allocation6_spill] sm:$0xff]  ;;  %v3780_v60 = vsub.f32 %v10037_v52, %v12985_v20  ;;  %v10100_v35 = vsub.f32 %v390_v5, %v10073_v8  ;;  %v3797_v20 = vand.u32 4294901760, %v10078_v41 }
 0x1cc   : > { %3627 = vmatpush.msrb.mxu0 %v3443_v13  ;;  %3693 = vmatpush.msrb.mxu2 %v9938_v42  ;;  %v3775_v13 = vand.u32 4294901760, %v3774_v27  ;;  %v10115_v5 = vsub.f32 %v388_v33, %v10086_v34  ;;  %v10117_v27 = vand.u32 4294901760, %v384_v26 }
 0x1cd   : > { %3764 = vmatpush.msrb.mxu3 %v3763_v55  ;;  %3523 = vmatmul.f32.gmra.mxu2 %v13346_v10  ;;  %v10102_v55 = vand.u32 4294901760, %v386_v11  ;;  %v3786_v10 = vsub.f32 %v10050_v19, %v12986_v53  ;;  %v3792_v53 = vsub.f32 %v10062_v40, %v3791_v49  ;;  %v3798_v46 = vsub.f32 %v10078_v41, %v3797_v20 }
 0x1ce   : > { %3631 = vmatpush.msrb.mxu0 %v3449_v2  ;;  %3666 = vmatpush.msrb.mxu1 %v9765_v56  ;;  %v13347_v56 = vld [vmem:[#allocation8_spill] sm:$0xff]  ;;  %v13348_v2 = vld [vmem:[#allocation9_spill] sm:$0xff] }
 0x1cf   : > { %3695 = vmatpush.msrb.mxu2 %v9951_v28  ;;  %3770 = vmatpush.msrb.mxu3 %v3769_v43  ;;  %v3781_v43 = vand.u32 4294901760, %v3780_v60  ;;  %v10128_v33 = vsub.f32 %v386_v11, %v10102_v55  ;;  %v10141_v11 = vsub.f32 %v384_v26, %v10117_v27  ;;  %v3793_v60 = vand.u32 4294901760, %v3792_v53 }
 0x1d0   : > { %3464 = vmatmul.f32.gmra.mxu1 %v13347_v56  ;;  %3568 = vmatmul.f32.gmra.mxu3 %v13348_v2  ;;  %v3803_v2 = vand.u32 4294901760, %v10100_v35  ;;  %v3799_v26 = vand.u32 4294901760, %v3798_v46 }
 0x1d1   : > { %3635 = vmatpush.msrb.mxu0 %v3455_v58  ;;  %3668 = vmatpush.msrb.mxu1 %v9780_v63  ;;  %v3787_v63 = vand.u32 4294901760, %v3786_v10  ;;  %v3809_v58 = vand.u32 4294901760, %v10115_v5  ;;  %v10151_v10 = vsub.f32 %v382_v16, %v10130_v14  ;;  %v3821_v53 = vand.u32 4294901760, %v10141_v11 }
 0x1d2   : > { %3697 = vmatpush.msrb.mxu2 %v9965_v47  ;;  %3776 = vmatpush.msrb.mxu3 %v3775_v13  ;;  %v3815_v13 = vand.u32 4294901760, %v10128_v33 }
 0x1d3   : > { %3637 = vmatmul.f32.vlgmr.msrb.gmra.mxu0 %v13335_v38  ;;  %3670 = vmatpush.msrb.mxu1 %v9793_v44  ;;  %v3804_v44 = vsub.f32 %v10100_v35, %v3803_v2 }
 0x1d4   : > { %3842 = vmatpush.msra.mxu0 %v9915_v61  ;;  %3699 = vmatpush.msrb.mxu2 %v9984_v50 }
 0x1d5   : > { %3782 = vmatpush.msrb.mxu3 %v3781_v43  ;;  %3672 = vmatpush.msrb.mxu1 %v9810_v30  ;;  %v3810_v30 = vsub.f32 %v10115_v5, %v3809_v58  ;;  %v3805_v16 = vand.u32 4294901760, %v3804_v44  ;;  %v12991_v43 = vand.u32 4294901760, %v10151_v10 }
 0x1d6   : > { %3845 = vmatpush.msra.mxu0 %v9929_v37  ;;  %3701 = vmatpush.msrb.mxu2 %v10007_v3 }
 0x1d7   : > { %3788 = vmatpush.msrb.mxu3 %v3787_v63  ;;  %3674 = vmatpush.msrb.mxu1 %v9819_v17  ;;  %v3816_v17 = vsub.f32 %v10128_v33, %v3815_v13  ;;  %v3811_v63 = vand.u32 4294901760, %v3810_v30  ;;  %v444_v30 = vld [vmem:[%s12825_s2 + $0x3f8] sm:$0xff] }
 0x1d8   : > { %3848 = vmatpush.msra.mxu0 %v9943_v36  ;;  %3703 = vmatpush.msrb.mxu2 %v10023_v54 }
 0x1d9   : > { %3794 = vmatpush.msrb.mxu3 %v3793_v60  ;;  %3676 = vmatpush.msrb.mxu1 %v9839_v22  ;;  %v3822_v22 = vsub.f32 %v10141_v11, %v3821_v53  ;;  %v3817_v46 = vand.u32 4294901760, %v3816_v17  ;;  %v3828_v60 = vsub.f32 %v10151_v10, %v12991_v43  ;;  %v13352_v17 = vand.u32 4294901760, %v9929_v37  ;;  %v13363_v43 = vld [vmem:[#allocation27_spill] sm:$0xff] }
 0x1da   : > { %3851 = vmatpush.msra.mxu0 %v9963_v24  ;;  %3705 = vmatpush.msrb.mxu2 %v10039_v23  ;;  %v13354_v37 = vand.u32 4294901760, %v9963_v24  ;;  %v13356_v24 = vand.u32 4294901760, %v9977_v12 }
 0x1db   : > { %3800 = vmatpush.msrb.mxu3 %v3799_v26  ;;  %3641 = vmatmul.f32.gmra.mxu0 %v13347_v56  ;;  %v3829_v44 = vand.u32 4294901760, %v3828_v60  ;;  %v13349_v26 = vld [vmem:[#allocation32_spill] sm:$0xff] }
 0x1dc   : > { %3678 = vmatmul.f32.vlgmr.msrb.gmra.mxu1 %v13335_v38  ;;  %3854 = vmatpush.msra.mxu0 %v9977_v12  ;;  %v3823_v38 = vand.u32 4294901760, %v3822_v22  ;;  %v436_v60 = vld [vmem:[%s12825_s2 + $0x3b8] sm:$0xff] }
 0x1dd   : > { %3900 = vmatpush.msra.mxu1 %v9896_v21  ;;  %3707 = vmatpush.msrb.mxu2 %v10052_v39 }
 0x1de   : > { %3806 = vmatpush.msrb.mxu3 %v3805_v16  ;;  %3857 = vmatpush.msra.mxu0 %v9993_v4  ;;  %v442_v16 = vld [vmem:[%s12825_s2 + $0x3e8] sm:$0xff]  ;;  %v13359_v4 = vand.u32 4294901760, %v10013_v48 }
 0x1df   : > { %3902 = vmatpush.msra.mxu1 %v9910_v57  ;;  %3709 = vmatpush.msrb.mxu2 %v10073_v8  ;;  %v10223_v22 = vand.u32 4294901760, %v442_v16 }
 0x1e0   : > { %3812 = vmatpush.msrb.mxu3 %v3811_v63  ;;  %3860 = vmatpush.msra.mxu0 %v10013_v48  ;;  %v13353_v63 = vand.u32 4294901760, %v9943_v36  ;;  %v13360_v48 = vand.u32 4294901760, %v10037_v52 }
 0x1e1   : > { %3904 = vmatpush.msra.mxu1 %v9920_v25  ;;  %3711 = vmatpush.msrb.mxu2 %v10086_v34 }
 0x1e2   : > { %3818 = vmatpush.msrb.mxu3 %v3817_v46  ;;  %3863 = vmatpush.msra.mxu0 %v10037_v52  ;;  %v13361_v52 = vand.u32 4294901760, %v10050_v19 }
 0x1e3   : > { %3906 = vmatpush.msra.mxu1 %v9938_v42  ;;  %3713 = vmatpush.msrb.mxu2 %v10102_v55 }
 0x1e4   : > { %3824 = vmatpush.msrb.mxu3 %v3823_v38  ;;  %3682 = vmatmul.f32.gmra.mxu1 %v13347_v56  ;;  %v13350_v56 = vand.u32 4294901760, %v9915_v61  ;;  %v10213_v61 = vand.u32 4294901760, %v444_v30 }
 0x1e5   : > { %3866 = vmatpush.msra.mxu0 %v10050_v19  ;;  %3908 = vmatpush.msra.mxu1 %v9951_v28 }
 0x1e6   : > { %3715 = vmatpush.msrb.mxu2 %v10117_v27  ;;  %3830 = vmatpush.msrb.mxu3 %v3829_v44  ;;  %v10234_v36 = vsub.f32 %v444_v30, %v10213_v61  ;;  %v434_v44 = vld [vmem:[%s12825_s2 + $0x3a8] sm:$0xff] }
 0x1e7   : > { %3869 = vmatpush.msra.mxu0 %v10062_v40  ;;  %3910 = vmatpush.msra.mxu1 %v9965_v47 }
 0x1e8   : > { %4018 = vmatpush.msra.mxu3 %v9896_v21  ;;  %3717 = vmatpush.msrb.mxu2 %v10130_v14  ;;  %v13351_v21 = vld [vmem:[#allocation21_spill] sm:$0xff]  ;;  %v12990_v12 = vand.u32 4294901760, %v10234_v36 }
 0x1e9   : > { %3723 = vmatmul.f32.vlgmr.msrb.gmra.mxu2 %v13349_v26  ;;  %3872 = vmatpush.msra.mxu0 %v10078_v41  ;;  %v13357_v26 = vld [vmem:[#allocation29_spill] sm:$0xff] }
 0x1ea   : > { %3912 = vmatpush.msra.mxu1 %v9984_v50  ;;  %3947 = vmatpush.msra.mxu2 %v13350_v56  ;;  %v10258_v56 = vand.u32 4294901760, %v436_v60 }
 0x1eb   : > { %4020 = vmatpush.msra.mxu3 %v9910_v57  ;;  %3875 = vmatpush.msra.mxu0 %v10100_v35  ;;  %v440_v57 = vld [vmem:[%s12825_s2 + $0x3d8] sm:$0xff] }
 0x1ec   : > { %3832 = vmatmul.f32.vlgmr.msrb.gmra.mxu3 %v13351_v21  ;;  %3914 = vmatpush.msra.mxu1 %v10007_v3  ;;  %v10236_v46 = vand.u32 4294901760, %v440_v57 }
 0x1ed   : > { %3951 = vmatpush.msra.mxu2 %v13352_v17  ;;  %4022 = vmatpush.msra.mxu3 %v9920_v25  ;;  %v438_v25 = vld [vmem:[%s12825_s2 + $0x3c8] sm:$0xff] }
 0x1ee   : > { %3878 = vmatpush.msra.mxu0 %v10115_v5  ;;  %3916 = vmatpush.msra.mxu1 %v10023_v54  ;;  %v10246_v38 = vand.u32 4294901760, %v438_v25  ;;  %v10262_v30 = vsub.f32 %v440_v57, %v10236_v46 }
 0x1ef   : > { %3955 = vmatpush.msra.mxu2 %v13353_v63  ;;  %4024 = vmatpush.msra.mxu3 %v9938_v42  ;;  %v13355_v42 = vld [vmem:[#allocation35_spill] sm:$0xff]  ;;  %v432_v63 = vld [vmem:[%s12825_s2 + $0x398] sm:$0xff] }
 0x1f0   : > { %3881 = vmatpush.msra.mxu0 %v10128_v33  ;;  %3918 = vmatpush.msra.mxu1 %v10039_v23  ;;  %v10276_v57 = vsub.f32 %v438_v25, %v10246_v38  ;;  %v430_v25 = vld [vmem:[%s12825_s2 + $0x388] sm:$0xff]  ;;  %v416_v33 = vld [vmem:[%s12825_s2 + $0x318] sm:$0xff] }
 0x1f1   : > { %3959 = vmatpush.msra.mxu2 %v13354_v37  ;;  %4026 = vmatpush.msra.mxu3 %v9951_v28  ;;  %v10249_v28 = vsub.f32 %v442_v16, %v10223_v22  ;;  %v10269_v16 = vand.u32 4294901760, %v434_v44  ;;  %v10291_v37 = vsub.f32 %v436_v60, %v10258_v56  ;;  %v428_v60 = vld [vmem:[%s12825_s2 + $0x378] sm:$0xff] }
 0x1f2   : > { %3731 = vmatmul.f32.gmra.mxu2 %v13355_v42  ;;  %3884 = vmatpush.msra.mxu0 %v10141_v11  ;;  %v10327_v19 = vand.u32 4294901760, %v428_v60 }
 0x1f3   : > { %3920 = vmatpush.msra.mxu1 %v10052_v39  ;;  %3963 = vmatpush.msra.mxu2 %v13356_v24  ;;  %v12988_v17 = vand.u32 4294901760, %v10249_v28  ;;  %v4127_v24 = vand.u32 4294901760, %v10276_v57 }
 0x1f4   : > { %4028 = vmatpush.msra.mxu3 %v9965_v47  ;;  %3887 = vmatpush.msra.mxu0 %v10151_v10  ;;  %v13358_v47 = vld [vmem:[#allocation23_spill] sm:$0xff] }
 0x1f5   : > { %3836 = vmatmul.f32.gmra.mxu3 %v13357_v26  ;;  %3922 = vmatpush.msra.mxu1 %v10073_v8  ;;  %v4116_v42 = vsub.f32 %v10249_v28, %v12988_v17  ;;  %v4133_v17 = vand.u32 4294901760, %v10291_v37 }
 0x1f6   : > { %3967 = vmatpush.msra.mxu2 %v3767_v45  ;;  %4030 = vmatpush.msra.mxu3 %v9984_v50  ;;  %v4110_v50 = vsub.f32 %v10234_v36, %v12990_v12  ;;  %v12989_v45 = vand.u32 4294901760, %v10262_v30 }
 0x1f7   : > { %3890 = vmatmul.f32.vlgmr.msra.gmra.mxu0 %v13358_v47  ;;  %3924 = vmatpush.msra.mxu1 %v10086_v34  ;;  %v10308_v47 = vsub.f32 %v434_v44, %v10269_v16  ;;  %v426_v44 = vld [vmem:[%s12825_s2 + $0x368] sm:$0xff] }
 0x1f8   : > { %4059 = vmatpush.msrb.mxu0 %v10213_v61  ;;  %3971 = vmatpush.msra.mxu2 %v13359_v4  ;;  %v4111_v4 = vand.u32 4294901760, %v4110_v50  ;;  %v13362_v50 = vld [vmem:[#allocation31_spill] sm:$0xff]  ;;  %v10340_v40 = vand.u32 4294901760, %v426_v44 }
 0x1f9   : > { %4032 = vmatpush.msra.mxu3 %v10007_v3  ;;  %3926 = vmatpush.msra.mxu1 %v10102_v55  ;;  %v10296_v3 = vand.u32 4294901760, %v432_v63  ;;  %v4139_v12 = vand.u32 4294901760, %v10308_v47 }
 0x1fa   : > { %4061 = vmatpush.msrb.mxu0 %v10223_v22  ;;  %3975 = vmatpush.msra.mxu2 %v13360_v48  ;;  %v4122_v48 = vsub.f32 %v10262_v30, %v12989_v45  ;;  %v4128_v45 = vsub.f32 %v10276_v57, %v4127_v24  ;;  %v10376_v35 = vsub.f32 %v426_v44, %v10340_v40  ;;  %v418_v44 = vld [vmem:[%s12825_s2 + $0x328] sm:$0xff] }
 0x1fb   : > { %4034 = vmatpush.msra.mxu3 %v10023_v54  ;;  %3928 = vmatpush.msra.mxu1 %v10117_v27  ;;  %v10313_v54 = vand.u32 4294901760, %v430_v25 }
 0x1fc   : > { %4063 = vmatpush.msrb.mxu0 %v10236_v46  ;;  %3979 = vmatpush.msra.mxu2 %v13361_v52  ;;  %v4117_v52 = vand.u32 4294901760, %v4116_v42 }
 0x1fd   : > { %4036 = vmatpush.msra.mxu3 %v10039_v23  ;;  %3930 = vmatpush.msra.mxu1 %v10130_v14  ;;  %v10330_v23 = vsub.f32 %v432_v63, %v10296_v3  ;;  %v4123_v63 = vand.u32 4294901760, %v4122_v48 }
 0x1fe   : > { %4065 = vmatpush.msrb.mxu0 %v10246_v38  ;;  %3983 = vmatpush.msra.mxu2 %v3791_v49  ;;  %v424_v49 = vld [vmem:[%s12825_s2 + $0x358] sm:$0xff] }
 0x1ff   : > { %4038 = vmatpush.msra.mxu3 %v10052_v39  ;;  %3895 = vmatmul.f32.gmra.mxu0 %v13362_v50  ;;  %v10346_v39 = vsub.f32 %v430_v25, %v10313_v54  ;;  %v4145_v42 = vand.u32 4294901760, %v10330_v23  ;;  %v422_v25 = vld [vmem:[%s12825_s2 + $0x348] sm:$0xff]  ;;  %v10367_v41 = vand.u32 4294901760, %v424_v49 }
 0x200   : > { %3934 = vmatmul.f32.vlgmr.msra.gmra.mxu1 %v13363_v43  ;;  %4067 = vmatpush.msrb.mxu0 %v10258_v56  ;;  %v4134_v43 = vsub.f32 %v10291_v37, %v4133_v17 }
 0x201   : > { %4112 = vmatpush.msrb.mxu1 %v4111_v4  ;;  %3987 = vmatpush.msra.mxu2 %v3797_v20  ;;  %v10360_v4 = vsub.f32 %v428_v60, %v10327_v19  ;;  %v4129_v20 = vand.u32 4294901760, %v4128_v45  ;;  %v4151_v48 = vand.u32 4294901760, %v10346_v39  ;;  %v420_v60 = vld [vmem:[%s12825_s2 + $0x338] sm:$0xff]  ;;  %v10380_v45 = vand.u32 4294901760, %v422_v25 }
 0x202   : > { %4040 = vmatpush.msra.mxu3 %v10073_v8  ;;  %4069 = vmatpush.msrb.mxu0 %v10269_v16  ;;  %v4140_v8 = vsub.f32 %v10308_v47, %v4139_v12 }
 0x203   : > { %4118 = vmatpush.msrb.mxu1 %v4117_v52  ;;  %3991 = vmatpush.msra.mxu2 %v3803_v2  ;;  %v4135_v2 = vand.u32 4294901760, %v4134_v43  ;;  %v4157_v50 = vand.u32 4294901760, %v10360_v4  ;;  %v13364_v52 = vld [vmem:[#allocation34_spill] sm:$0xff]  ;;  %v12992_v43 = vand.u32 4294901760, %v10376_v35 }
 0x204   : > { %4042 = vmatpush.msra.mxu3 %v10086_v34  ;;  %4071 = vmatpush.msrb.mxu0 %v10296_v3  ;;  %v4146_v34 = vsub.f32 %v10330_v23, %v4145_v42  ;;  %v4141_v5 = vand.u32 4294901760, %v4140_v8  ;;  %v414_v8 = vld [vmem:[%s12825_s2 + $0x308] sm:$0xff] }
 0x205   : > { %4124 = vmatpush.msrb.mxu1 %v4123_v63  ;;  %3995 = vmatpush.msra.mxu2 %v3809_v58  ;;  %v10393_v58 = vand.u32 4294901760, %v420_v60  ;;  %v4152_v63 = vsub.f32 %v10346_v39, %v4151_v48 }
 0x206   : > { %4044 = vmatpush.msra.mxu3 %v10102_v55  ;;  %4073 = vmatpush.msrb.mxu0 %v10313_v54  ;;  %v10396_v55 = vsub.f32 %v424_v49, %v10367_v41  ;;  %v10411_v49 = vsub.f32 %v422_v25, %v10380_v45 }
 0x207   : > { %4130 = vmatpush.msrb.mxu1 %v4129_v20  ;;  %3999 = vmatpush.msra.mxu2 %v3815_v13  ;;  %v10408_v13 = vand.u32 4294901760, %v418_v44  ;;  %v4158_v20 = vsub.f32 %v10360_v4, %v4157_v50  ;;  %v10427_v11 = vsub.f32 %v420_v60, %v10393_v58 }
 0x208   : > { %4046 = vmatpush.msra.mxu3 %v10117_v27  ;;  %3940 = vmatmul.f32.gmra.mxu1 %v13364_v52  ;;  %v4147_v27 = vand.u32 4294901760, %v4146_v34  ;;  %v12993_v25 = vand.u32 4294901760, %v10396_v55  ;;  %v4164_v34 = vsub.f32 %v10376_v35, %v12992_v43  ;;  %v4175_v52 = vand.u32 4294901760, %v10411_v49 }
 0x209   : > { %4075 = vmatpush.msrb.mxu0 %v10327_v19  ;;  %4136 = vmatpush.msrb.mxu1 %v4135_v2  ;;  %v10423_v2 = vand.u32 4294901760, %v416_v33  ;;  %v10441_v60 = vsub.f32 %v418_v44, %v10408_v13 }
 0x20a   : > { %4003 = vmatpush.msra.mxu2 %v3821_v53  ;;  %4048 = vmatpush.msra.mxu3 %v10130_v14  ;;  %v13365_v14 = vand.u32 4294901760, %v10151_v10  ;;  %v4153_v53 = vand.u32 4294901760, %v4152_v63  ;;  %v4159_v10 = vand.u32 4294901760, %v4158_v20  ;;  %v4170_v63 = vsub.f32 %v10396_v55, %v12993_v25 }
 0x20b   : > { %4077 = vmatpush.msrb.mxu0 %v10340_v40  ;;  %4142 = vmatpush.msrb.mxu1 %v4141_v5  ;;  %v10437_v5 = vand.u32 4294901760, %v414_v8  ;;  %v10451_v43 = vsub.f32 %v416_v33, %v10423_v2  ;;  %v4165_v44 = vand.u32 4294901760, %v4164_v34  ;;  %v12994_v20 = vand.u32 4294901760, %v10441_v60 }
 0x20c   : > { %4272 = vmatpush.msrb.mxu3 %v10213_v61  ;;  %4007 = vmatpush.msra.mxu2 %v13365_v14  ;;  %v12997_v14 = vand.u32 4294901760, %v10427_v11 }
 0x20d   : > { %4009 = vmatmul.f32.vlgmr.msra.gmra.mxu2 %v13351_v21  ;;  %4079 = vmatpush.msrb.mxu0 %v10367_v41  ;;  %v10461_v25 = vsub.f32 %v414_v8, %v10437_v5  ;;  %v4188_v34 = vsub.f32 %v10441_v60, %v12994_v20 }
 0x20e   : > { %4148 = vmatpush.msrb.mxu1 %v4147_v27  ;;  %4214 = vmatpush.msrb.mxu2 %v10234_v36  ;;  %v4176_v27 = vsub.f32 %v10411_v49, %v4175_v52  ;;  %v4182_v33 = vsub.f32 %v10427_v11, %v12997_v14  ;;  %v13368_v14 = vand.u32 4294901760, %v10249_v28 }
 0x20f   : > { %4274 = vmatpush.msrb.mxu3 %v10223_v22  ;;  %4081 = vmatpush.msrb.mxu0 %v10380_v45 }
 0x210   : > { %4050 = vmatmul.f32.vlgmr.msra.gmra.mxu3 %v13351_v21  ;;  %4154 = vmatpush.msrb.mxu1 %v4153_v53  ;;  %v4171_v21 = vand.u32 4294901760, %v4170_v63  ;;  %v12995_v53 = vand.u32 4294901760, %v10451_v43  ;;  %v4177_v8 = vand.u32 4294901760, %v4176_v27  ;;  %v4183_v63 = vand.u32 4294901760, %v4182_v33  ;;  %v13366_v33 = vld [vmem:[#allocation41_spill] sm:$0xff] }
 0x211   : > { %4217 = vmatpush.msrb.mxu2 %v10249_v28  ;;  %4276 = vmatpush.msrb.mxu3 %v10236_v46  ;;  %v4189_v27 = vand.u32 4294901760, %v4188_v34  ;;  %v474_v34 = vld [vmem:[%s12825_s2 + $0x4e8] sm:$0xff] }
 0x212   : > { %4083 = vmatpush.msrb.mxu0 %v10393_v58  ;;  %4160 = vmatpush.msrb.mxu1 %v4159_v10  ;;  %v12996_v10 = vand.u32 4294901760, %v10461_v25  ;;  %v470_v28 = vld [vmem:[%s12825_s2 + $0x4c8] sm:$0xff] }
 0x213   : > { %4220 = vmatpush.msrb.mxu2 %v10262_v30  ;;  %4278 = vmatpush.msrb.mxu3 %v10246_v38 }
 0x214   : > { %4085 = vmatpush.msrb.mxu0 %v10408_v13  ;;  %4166 = vmatpush.msrb.mxu1 %v4165_v44  ;;  %v4194_v44 = vsub.f32 %v10451_v43, %v12995_v53  ;;  %v4200_v20 = vsub.f32 %v10461_v25, %v12996_v10 }
 0x215   : > { %4223 = vmatpush.msrb.mxu2 %v10276_v57  ;;  %4280 = vmatpush.msrb.mxu3 %v10258_v56 }
 0x216   : > { %4013 = vmatmul.f32.gmra.mxu2 %v13357_v26  ;;  %4087 = vmatpush.msrb.mxu0 %v10423_v2  ;;  %v4195_v53 = vand.u32 4294901760, %v4194_v44  ;;  %v4201_v10 = vand.u32 4294901760, %v4200_v20  ;;  %v13369_v44 = vand.u32 4294901760, %v10262_v30  ;;  %v468_v30 = vld [vmem:[%s12825_s2 + $0x4b8] sm:$0xff] }
 0x217   : > { %4172 = vmatpush.msrb.mxu1 %v4171_v21  ;;  %4226 = vmatpush.msrb.mxu2 %v10291_v37  ;;  %v476_v21 = vld [vmem:[%s12825_s2 + $0x4f8] sm:$0xff] }
 0x218   : > { %4282 = vmatpush.msrb.mxu3 %v10269_v16  ;;  %4089 = vmatpush.msrb.mxu0 %v10437_v5  ;;  %v464_v37 = vld [vmem:[%s12825_s2 + $0x498] sm:$0xff] }
 0x219   : > { %4054 = vmatmul.f32.gmra.mxu3 %v13357_v26  ;;  %4178 = vmatpush.msrb.mxu1 %v4177_v8  ;;  %v13367_v26 = vand.u32 4294901760, %v10234_v36  ;;  %v10498_v8 = vand.u32 4294901760, %v476_v21  ;;  %v472_v36 = vld [vmem:[%s12825_s2 + $0x4d8] sm:$0xff] }
 0x21a   : > { %4229 = vmatpush.msrb.mxu2 %v10308_v47  ;;  %4284 = vmatpush.msrb.mxu3 %v10296_v3 }
 0x21b   : > { %4095 = vmatmul.f32.vlgmr.msrb.gmra.mxu0 %v13366_v33  ;;  %4184 = vmatpush.msrb.mxu1 %v4183_v63  ;;  %v10511_v63 = vand.u32 4294901760, %v474_v34  ;;  %v10517_v20 = vsub.f32 %v476_v21, %v10498_v8  ;;  %v10536_v21 = vand.u32 4294901760, %v470_v28  ;;  %v10547_v33 = vand.u32 4294901760, %v468_v30 }
 0x21c   : > { %4319 = vmatpush.msra.mxu0 %v13367_v26  ;;  %4232 = vmatpush.msrb.mxu2 %v10330_v23  ;;  %v466_v26 = vld [vmem:[%s12825_s2 + $0x4a8] sm:$0xff]  ;;  %v10581_v23 = vand.u32 4294901760, %v464_v37 }
 0x21d   : > { %4286 = vmatpush.msrb.mxu3 %v10313_v54  ;;  %4190 = vmatpush.msrb.mxu1 %v4189_v27  ;;  %v10534_v27 = vsub.f32 %v474_v34, %v10511_v63  ;;  %v13001_v57 = vand.u32 4294901760, %v10517_v20  ;;  %v10576_v34 = vsub.f32 %v468_v30, %v10547_v33 }
 0x21e   : > { %4323 = vmatpush.msra.mxu0 %v13368_v14  ;;  %4235 = vmatpush.msrb.mxu2 %v10346_v39  ;;  %v10523_v14 = vand.u32 4294901760, %v472_v36  ;;  %v13372_v39 = vld [vmem:[#allocation39_spill] sm:$0xff] }
 0x21f   : > { %4288 = vmatpush.msrb.mxu3 %v10327_v19  ;;  %4196 = vmatpush.msrb.mxu1 %v4195_v53  ;;  %v13370_v53 = vld [vmem:[#allocation25_spill] sm:$0xff]  ;;  %v13006_v30 = vand.u32 4294901760, %v10576_v34 }
 0x220   : > { %4327 = vmatpush.msra.mxu0 %v13369_v44  ;;  %4238 = vmatpush.msrb.mxu2 %v10360_v4  ;;  %v458_v4 = vld [vmem:[%s12825_s2 + $0x468] sm:$0xff] }
 0x221   : > { %4290 = vmatpush.msrb.mxu3 %v10340_v40  ;;  %4202 = vmatpush.msrb.mxu1 %v4201_v10  ;;  %v13371_v10 = vld [vmem:[#allocation36_spill] sm:$0xff] }
 0x222   : > { %4331 = vmatpush.msra.mxu0 %v4127_v24  ;;  %4241 = vmatpush.msrb.mxu2 %v10376_v35  ;;  %v10545_v24 = vsub.f32 %v472_v36, %v10523_v14 }
 0x223   : > { %4292 = vmatpush.msrb.mxu3 %v10367_v41  ;;  %4103 = vmatmul.f32.gmra.mxu0 %v13370_v53 }
 0x224   : > { %4204 = vmatmul.f32.vlgmr.msrb.gmra.mxu1 %v13371_v10  ;;  %4335 = vmatpush.msra.mxu0 %v4133_v17  ;;  %v10559_v17 = vsub.f32 %v470_v28, %v10536_v21  ;;  %v12998_v47 = vand.u32 4294901760, %v10545_v24 }
 0x225   : > { %4390 = vmatpush.msra.mxu1 %v10213_v61  ;;  %4244 = vmatpush.msrb.mxu2 %v10396_v55  ;;  %v12999_v61 = vand.u32 4294901760, %v10534_v27 }
 0x226   : > { %4294 = vmatpush.msrb.mxu3 %v10380_v45  ;;  %4339 = vmatpush.msra.mxu0 %v4139_v12  ;;  %v10570_v12 = vand.u32 4294901760, %v466_v26  ;;  %v13000_v36 = vand.u32 4294901760, %v10559_v17  ;;  %v4494_v28 = vsub.f32 %v10545_v24, %v12998_v47 }
 0x227   : > { %4392 = vmatpush.msra.mxu1 %v10223_v22  ;;  %4247 = vmatpush.msrb.mxu2 %v10411_v49  ;;  %v4482_v22 = vsub.f32 %v10517_v20, %v13001_v57 }
 0x228   : > { %4296 = vmatpush.msrb.mxu3 %v10393_v58  ;;  %4343 = vmatpush.msra.mxu0 %v4145_v42  ;;  %v462_v42 = vld [vmem:[%s12825_s2 + $0x488] sm:$0xff]  ;;  %v10595_v44 = vsub.f32 %v466_v26, %v10570_v12  ;;  %v10612_v26 = vsub.f32 %v464_v37, %v10581_v23 }
 0x229   : > { %4394 = vmatpush.msra.mxu1 %v10236_v46  ;;  %4250 = vmatpush.msrb.mxu2 %v10427_v11  ;;  %v4488_v46 = vsub.f32 %v10534_v27, %v12999_v61  ;;  %v10607_v53 = vand.u32 4294901760, %v462_v42  ;;  %v456_v61 = vld [vmem:[%s12825_s2 + $0x458] sm:$0xff] }
 0x22a   : > { %4298 = vmatpush.msrb.mxu3 %v10408_v13  ;;  %4347 = vmatpush.msra.mxu0 %v4151_v48  ;;  %v4483_v48 = vand.u32 4294901760, %v4482_v22  ;;  %v4500_v22 = vsub.f32 %v10559_v17, %v13000_v36  ;;  %v13003_v37 = vand.u32 4294901760, %v10595_v44  ;;  %v10639_v36 = vand.u32 4294901760, %v458_v4 }
 0x22b   : > { %4396 = vmatpush.msra.mxu1 %v10246_v38  ;;  %4253 = vmatpush.msrb.mxu2 %v10441_v60  ;;  %v460_v38 = vld [vmem:[%s12825_s2 + $0x478] sm:$0xff]  ;;  %v13002_v57 = vand.u32 4294901760, %v10612_v26  ;;  %v13391_v31 = vand.u32 4294901760, %v10595_v44 }
 0x22c   : > { %4300 = vmatpush.msrb.mxu3 %v10423_v2  ;;  %4208 = vmatmul.f32.gmra.mxu1 %v13372_v39  ;;  %v10623_v47 = vand.u32 4294901760, %v460_v38 }
 0x22d   : > { %4351 = vmatpush.msra.mxu0 %v4157_v50  ;;  %4398 = vmatpush.msra.mxu1 %v10258_v56  ;;  %v13373_v56 = vand.u32 4294901760, %v10376_v35  ;;  %v4489_v50 = vand.u32 4294901760, %v4488_v46  ;;  %v13374_v35 = vld [vmem:[#allocation37_spill] sm:$0xff]  ;;  %v4495_v46 = vand.u32 4294901760, %v4494_v28 }
 0x22e   : > { %4256 = vmatpush.msrb.mxu2 %v10451_v43  ;;  %4302 = vmatpush.msrb.mxu3 %v10437_v5  ;;  %v10647_v28 = vsub.f32 %v460_v38, %v10623_v47  ;;  %v10662_v38 = vsub.f32 %v458_v4, %v10639_v36 }
 0x22f   : > { %4355 = vmatpush.msra.mxu0 %v13373_v56  ;;  %4400 = vmatpush.msra.mxu1 %v10269_v16  ;;  %v13375_v16 = vand.u32 4294901760, %v10396_v55  ;;  %v4506_v56 = vsub.f32 %v10576_v34, %v13006_v30  ;;  %v4501_v55 = vand.u32 4294901760, %v4500_v22  ;;  %v13377_v22 = vand.u32 4294901760, %v10427_v11  ;;  %v450_v11 = vld [vmem:[%s12825_s2 + $0x428] sm:$0xff] }
 0x230   : > { %4484 = vmatpush.msra.mxu3 %v4483_v48  ;;  %4259 = vmatpush.msrb.mxu2 %v10461_v25  ;;  %v10637_v48 = vsub.f32 %v462_v42, %v10607_v53  ;;  %v454_v42 = vld [vmem:[%s12825_s2 + $0x448] sm:$0xff]  ;;  %v13005_v4 = vand.u32 4294901760, %v10647_v28 }
 0x231   : > { %4262 = vmatmul.f32.vlgmr.msrb.gmra.mxu2 %v13374_v35  ;;  %4359 = vmatpush.msra.mxu0 %v13375_v16  ;;  %v10649_v35 = vand.u32 4294901760, %v456_v61  ;;  %v13376_v16 = vld [vmem:[#allocation38_spill] sm:$0xff]  ;;  %v4507_v49 = vand.u32 4294901760, %v4506_v56 }
 0x232   : > { %4402 = vmatpush.msra.mxu1 %v10296_v3  ;;  %4431 = vmatpush.msra.mxu2 %v10498_v8  ;;  %v4512_v3 = vsub.f32 %v10595_v44, %v13003_v37  ;;  %v10704_v37 = vpop.f32.mrf.mxu0 }
 0x233   : > { %4490 = vmatpush.msra.mxu3 %v4489_v50  ;;  %4363 = vmatpush.msra.mxu0 %v4175_v52  ;;  %v13004_v52 = vand.u32 4294901760, %v10637_v48  ;;  %v452_v50 = vld [vmem:[%s12825_s2 + $0x438] sm:$0xff]  ;;  %v10678_v56 = vsub.f32 %v456_v61, %v10649_v35 }
 0x234   : > { %4306 = vmatmul.f32.vlgmr.msrb.gmra.mxu3 %v13376_v16  ;;  %4404 = vmatpush.msra.mxu1 %v10313_v54  ;;  %v4518_v54 = vsub.f32 %v10612_v26, %v13002_v57  ;;  %v4513_v16 = vand.u32 4294901760, %v4512_v3  ;;  %v448_v57 = vld [vmem:[%s12825_s2 + $0x418] sm:$0xff] }
 0x235   : > { %4433 = vmatpush.msra.mxu2 %v10511_v63  ;;  %4496 = vmatpush.msra.mxu3 %v4495_v46  ;;  %v10673_v46 = vand.u32 4294901760, %v454_v42  ;;  %v4524_v61 = vsub.f32 %v10637_v48, %v13004_v52  ;;  %v4530_v52 = vsub.f32 %v10647_v28, %v13005_v4 }
 0x236   : > { %4367 = vmatpush.msra.mxu0 %v13377_v22  ;;  %4406 = vmatpush.msra.mxu1 %v10327_v19  ;;  %v13378_v19 = vand.u32 4294901760, %v10441_v60  ;;  %v10686_v22 = vand.u32 4294901760, %v452_v50  ;;  %v13379_v60 = vld [vmem:[#allocation40_spill] sm:$0xff]  ;;  %v4519_v3 = vand.u32 4294901760, %v4518_v54 }
 0x237   : > { %4435 = vmatpush.msra.mxu2 %v10523_v14  ;;  %4502 = vmatpush.msra.mxu3 %v4501_v55  ;;  %v13007_v55 = vand.u32 4294901760, %v10662_v38  ;;  %v4525_v4 = vand.u32 4294901760, %v4524_v61 }
 0x238   : > { %4371 = vmatpush.msra.mxu0 %v13378_v19  ;;  %4408 = vmatpush.msra.mxu1 %v10340_v40  ;;  %v13380_v40 = vand.u32 4294901760, %v10451_v43  ;;  %v10700_v19 = vsub.f32 %v454_v42, %v10673_v46  ;;  %v446_v43 = vld [vmem:[%s12825_s2 + $0x408] sm:$0xff]  ;;  %v13381_v42 = vand.u32 4294901760, %v10461_v25  ;;  %v10718_v54 = vsub.f32 %v452_v50, %v10686_v22 }
 0x239   : > { %4437 = vmatpush.msra.mxu2 %v10536_v21  ;;  %4508 = vmatpush.msra.mxu3 %v4507_v49  ;;  %v10702_v49 = vand.u32 4294901760, %v450_v11  ;;  %v4536_v30 = vsub.f32 %v10662_v38, %v13007_v55  ;;  %v10732_v50 = vand.u32 4294901760, %v446_v43  ;;  %v10748_v55 = vpop.f32.mrf.mxu3 }
 0x23a   : > { %4267 = vmatmul.f32.gmra.mxu2 %v13379_v60  ;;  %4375 = vmatpush.msra.mxu0 %v13380_v40  ;;  %v13008_v60 = vand.u32 4294901760, %v10678_v56  ;;  %v13382_v40 = vld [vmem:[#allocation22_spill] sm:$0xff]  ;;  %v13009_v25 = vand.u32 4294901760, %v10700_v19 }
 0x23b   : > { %4410 = vmatpush.msra.mxu1 %v10367_v41  ;;  %4439 = vmatpush.msra.mxu2 %v10547_v33  ;;  %v10720_v41 = vand.u32 4294901760, %v448_v57 }
 0x23c   : > { %4514 = vmatpush.msra.mxu3 %v4513_v16  ;;  %4379 = vmatpush.msra.mxu0 %v13381_v42  ;;  %v10730_v16 = vsub.f32 %v450_v11, %v10702_v49  ;;  %v10734_v42 = vpop.f32.mrf.mxu1  ;;  %v4542_v61 = vsub.f32 %v10678_v56, %v13008_v60  ;;  %v13013_v11 = vand.u32 4294901760, %v10718_v54  ;;  %v10757_v60 = vsub.f32 %v446_v43, %v10732_v50 }
 0x23d   : > { %4312 = vmatmul.f32.gmra.mxu3 %v13382_v40  ;;  %4412 = vmatpush.msra.mxu1 %v10380_v45  ;;  %v4531_v45 = vand.u32 4294901760, %v4530_v52  ;;  %v4537_v40 = vand.u32 4294901760, %v4536_v30 }
 0x23e   : > { %4441 = vmatpush.msra.mxu2 %v10570_v12  ;;  %4520 = vmatpush.msra.mxu3 %v4519_v3  ;;  %v10745_v3 = vsub.f32 %v448_v57, %v10720_v41  ;;  %v13012_v52 = vand.u32 4294901760, %v10730_v16  ;;  %v10760_v57 = vpop.f32.mrf.mxu2  ;;  %v4554_v30 = vsub.f32 %v10718_v54, %v13013_v11  ;;  %v500_v11 = vld [vmem:[%s12825_s2 + $0x5b8] sm:$0xff] }
 0x23f   : > { %4381 = vmatmul.f32.vlgmr.msra.gmra.mxu0 %v13371_v10  ;;  %4414 = vmatpush.msra.mxu1 %v10393_v58  ;;  %v4548_v58 = vsub.f32 %v10700_v19, %v13009_v25  ;;  %v10768_v25 = vpop.f32.mrf.mxu0 }
 0x240   : > { %4586 = vmatpush.msrb.mxu0 %v10517_v20  ;;  %4443 = vmatpush.msra.mxu2 %v10581_v23  ;;  %v4560_v43 = vsub.f32 %v10730_v16, %v13012_v52  ;;  %v13389_v52 = vld [vmem:[#allocation52_spill] sm:$0xff] }
 0x241   : > { %4526 = vmatpush.msra.mxu3 %v4525_v4  ;;  %4416 = vmatpush.msra.mxu1 %v10408_v13  ;;  %v4543_v13 = vand.u32 4294901760, %v4542_v61  ;;  %v13010_v4 = vand.u32 4294901760, %v10745_v3  ;;  %v4555_v61 = vand.u32 4294901760, %v4554_v30 }
 0x242   : > { %4589 = vmatpush.msrb.mxu0 %v10534_v27  ;;  %4445 = vmatpush.msra.mxu2 %v10607_v53 }
 0x243   : > { %4532 = vmatpush.msra.mxu3 %v4531_v45  ;;  %4418 = vmatpush.msra.mxu1 %v10423_v2  ;;  %v4549_v2 = vand.u32 4294901760, %v4548_v58  ;;  %v13011_v45 = vand.u32 4294901760, %v10757_v60  ;;  %v4561_v58 = vand.u32 4294901760, %v4560_v43 }
 0x244   : > { %4592 = vmatpush.msrb.mxu0 %v10545_v24  ;;  %4447 = vmatpush.msra.mxu2 %v10623_v47 }
 0x245   : > { %4538 = vmatpush.msra.mxu3 %v4537_v40  ;;  %4420 = vmatpush.msra.mxu1 %v10437_v5  ;;  %v4566_v5 = vsub.f32 %v10745_v3, %v13010_v4  ;;  %v10783_v40 = vpop.f32.mrf.mxu1 }
 0x246   : > { %4595 = vmatpush.msrb.mxu0 %v10559_v17  ;;  %4449 = vmatpush.msra.mxu2 %v10639_v36 }
 0x247   : > { %4544 = vmatpush.msra.mxu3 %v4543_v13  ;;  %4385 = vmatmul.f32.gmra.mxu0 %v13372_v39  ;;  %v10793_v13 = vpop.f32.mrf.mxu3  ;;  %v4567_v30 = vand.u32 4294901760, %v4566_v5  ;;  %v10796_v4 = vpop.f32.mrf.mxu0 }
 0x248   : > { %4422 = vmatmul.f32.vlgmr.msra.gmra.mxu1 %v13371_v10  ;;  %4598 = vmatpush.msrb.mxu0 %v10576_v34  ;;  %v4572_v10 = vsub.f32 %v10757_v60, %v13011_v45  ;;  %v13386_v45 = vand.u32 4294901760, %v10545_v24 }
 0x249   : > { %4644 = vmatpush.msrb.mxu1 %v10498_v8  ;;  %4451 = vmatpush.msra.mxu2 %v10649_v35 }
 0x24a   : > { %4550 = vmatpush.msra.mxu3 %v4549_v2  ;;  %4601 = vmatpush.msrb.mxu0 %v10595_v44  ;;  %v10800_v2 = vpop.f32.mrf.mxu2  ;;  %v4573_v43 = vand.u32 4294901760, %v4572_v10  ;;  %v13384_v10 = vand.u32 4294901760, %v10517_v20  ;;  %v13385_v20 = vand.u32 4294901760, %v10534_v27  ;;  %v492_v44 = vld [vmem:[%s12825_s2 + $0x578] sm:$0xff] }
 0x24b   : > { %4646 = vmatpush.msrb.mxu1 %v10511_v63  ;;  %4453 = vmatpush.msra.mxu2 %v10673_v46 }
 0x24c   : > { %4556 = vmatpush.msra.mxu3 %v4555_v61  ;;  %4604 = vmatpush.msrb.mxu0 %v10612_v26 }
 0x24d   : > { %4648 = vmatpush.msrb.mxu1 %v10523_v14  ;;  %4455 = vmatpush.msra.mxu2 %v10686_v22  ;;  %v10806_v61 = vpop.f32.mrf.mxu1 }
 0x24e   : > { %4562 = vmatpush.msra.mxu3 %v4561_v58  ;;  %4607 = vmatpush.msrb.mxu0 %v10637_v48 }
 0x24f   : > { %4650 = vmatpush.msrb.mxu1 %v10536_v21  ;;  %4457 = vmatpush.msra.mxu2 %v10702_v49  ;;  %v10813_v5 = vpop.f32.mrf.mxu3 }
 0x250   : > { %4568 = vmatpush.msra.mxu3 %v4567_v30  ;;  %4426 = vmatmul.f32.gmra.mxu1 %v13372_v39  ;;  %v13383_v39 = vld [vmem:[#allocation47_spill] sm:$0xff]  ;;  %v508_v30 = vld [vmem:[%s12825_s2 + $0x5f8] sm:$0xff] }
 0x251   : > { %4610 = vmatpush.msrb.mxu0 %v10647_v28  ;;  %4652 = vmatpush.msrb.mxu1 %v10547_v33 }
 0x252   : > { %4459 = vmatpush.msra.mxu2 %v10720_v41  ;;  %4574 = vmatpush.msra.mxu3 %v4573_v43  ;;  %v10819_v58 = vpop.f32.mrf.mxu2  ;;  %v10827_v43 = vpop.f32.mrf.mxu0 }
 0x253   : > { %4613 = vmatpush.msrb.mxu0 %v10662_v38  ;;  %4654 = vmatpush.msrb.mxu1 %v10570_v12 }
 0x254   : > { %4762 = vmatpush.msrb.mxu3 %v10498_v8  ;;  %4461 = vmatpush.msra.mxu2 %v10732_v50  ;;  %v506_v8 = vld [vmem:[%s12825_s2 + $0x5e8] sm:$0xff] }
 0x255   : > { %4467 = vmatmul.f32.vlgmr.msra.gmra.mxu2 %v13383_v39  ;;  %4616 = vmatpush.msrb.mxu0 %v10678_v56  ;;  %v10839_v39 = vand.u32 4294901760, %v508_v30  ;;  %v10851_v27 = vand.u32 4294901760, %v506_v8 }
 0x256   : > { %4656 = vmatpush.msrb.mxu1 %v10581_v23  ;;  %4691 = vmatpush.msrb.mxu2 %v13384_v10  ;;  %v10846_v10 = vpop.f32.mrf.mxu1 }
 0x257   : > { %4764 = vmatpush.msrb.mxu3 %v10511_v63  ;;  %4619 = vmatpush.msrb.mxu0 %v10700_v19  ;;  %v504_v63 = vld [vmem:[%s12825_s2 + $0x5d8] sm:$0xff]  ;;  %v10862_v24 = vsub.f32 %v508_v30, %v10839_v39  ;;  %v10881_v30 = vsub.f32 %v506_v8, %v10851_v27 }
 0x258   : > { %4576 = vmatmul.f32.vlgmr.msra.gmra.mxu3 %v8676_v1  ;;  %4658 = vmatpush.msrb.mxu1 %v10607_v53 }
 0x259   : > { %4695 = vmatpush.msrb.mxu2 %v13385_v20  ;;  %4766 = vmatpush.msrb.mxu3 %v10523_v14  ;;  %v502_v14 = vld [vmem:[%s12825_s2 + $0x5c8] sm:$0xff]  ;;  %v13387_v20 = vand.u32 4294901760, %v10559_v17 }
 0x25a   : > { %4622 = vmatpush.msrb.mxu0 %v10718_v54  ;;  %4660 = vmatpush.msrb.mxu1 %v10623_v47  ;;  %v10873_v32 = vpop.f32.mrf.mxu0  ;;  %v10878_v17 = vand.u32 4294901760, %v502_v14 }
 0x25b   : > { %4699 = vmatpush.msrb.mxu2 %v13386_v45  ;;  %4768 = vmatpush.msrb.mxu3 %v10536_v21  ;;  %v10864_v45 = vand.u32 4294901760, %v504_v63  ;;  %v10866_v21 = vpop.f32.mrf.mxu3 }
 0x25c   : > { %4625 = vmatpush.msrb.mxu0 %v10730_v16  ;;  %4662 = vmatpush.msrb.mxu1 %v10639_v36  ;;  %13388 = vst [vmem:[#allocation53_spill] sm:$0xff] %v10866_v21 }
 0x25d   : > { %4703 = vmatpush.msrb.mxu2 %v13387_v20  ;;  %4770 = vmatpush.msrb.mxu3 %v10547_v33  ;;  %v13390_v33 = vand.u32 4294901760, %v10576_v34  ;;  %v10883_v20 = vpop.f32.mrf.mxu2  ;;  %v10892_v34 = vand.u32 4294901760, %v500_v11  ;;  %v10896_v8 = vsub.f32 %v504_v63, %v10864_v45  ;;  %v496_v63 = vld [vmem:[%s12825_s2 + $0x598] sm:$0xff] }
 0x25e   : > { %4475 = vmatmul.f32.gmra.mxu2 %v13389_v52  ;;  %4628 = vmatpush.msrb.mxu0 %v10745_v3  ;;  %v498_v52 = vld [vmem:[%s12825_s2 + $0x5a8] sm:$0xff] }
 0x25f   : > { %4664 = vmatpush.msrb.mxu1 %v10649_v35  ;;  %4707 = vmatpush.msrb.mxu2 %v13390_v33  ;;  %v10905_v7 = vand.u32 4294901760, %v498_v52  ;;  %v10912_v33 = vsub.f32 %v502_v14, %v10878_v17  ;;  %v494_v14 = vld [vmem:[%s12825_s2 + $0x588] sm:$0xff]  ;;  %v10927_v15 = vsub.f32 %v500_v11, %v10892_v34  ;;  %v13401_v11 = vand.u32 4294901760, %v10896_v8 }
 0x260   : > { %4772 = vmatpush.msrb.mxu3 %v10570_v12  ;;  %4631 = vmatpush.msrb.mxu0 %v10757_v60  ;;  %v10901_v12 = vpop.f32.mrf.mxu1 }
 0x261   : > { %4580 = vmatmul.f32.gmra.mxu3 %v8777_v9  ;;  %4666 = vmatpush.msrb.mxu1 %v10673_v46  ;;  %v10946_v6 = vsub.f32 %v498_v52, %v10905_v7  ;;  %v4866_v52 = vsub.f32 %v10896_v8, %v13401_v11  ;;  %v13404_v62 = vand.u32 4294901760, %v10912_v33 }
 0x262   : > { %4711 = vmatpush.msrb.mxu2 %v13391_v31  ;;  %4774 = vmatpush.msrb.mxu3 %v10581_v23  ;;  %v13393_v31 = vand.u32 4294901760, %v10612_v26  ;;  %v10934_v26 = vand.u32 4294901760, %v496_v63  ;;  %v10955_v18 = vpop.f32.mrf.mxu0 }
 0x263   : > { %4634 = vmatmul.f32.vlgmr.msrb.gmra.mxu0 %v13392_v59  ;;  %4668 = vmatpush.msrb.mxu1 %v10686_v22  ;;  %v13394_v59 = vand.u32 4294901760, %v10862_v24  ;;  %v10929_v51 = vpop.f32.mrf.mxu3  ;;  %13400 = vst [vmem:[#allocation19_spill] sm:$0xff] %v10955_v18  ;;  %v4872_v18 = vsub.f32 %v10912_v33, %v13404_v62  ;;  %v13407_v62 = vand.u32 4294901760, %v10678_v56  ;;  %v13409_v56 = vand.u32 4294901760, %v10700_v19  ;;  %v484_v19 = vld [vmem:[%s12825_s2 + $0x538] sm:$0xff] }
 0x264   : > { %4803 = vmatpush.msra.mxu0 %v10839_v39  ;;  %4715 = vmatpush.msrb.mxu2 %v13393_v31  ;;  %13395 = vst [vmem:[#allocation15_spill] sm:$0xff] %v10929_v51  ;;  %v13397_v31 = vand.u32 4294901760, %v10881_v30  ;;  %v10969_v51 = vand.u32 4294901760, %v492_v44 }
 0x265   : > { %4776 = vmatpush.msrb.mxu3 %v10607_v53  ;;  %4670 = vmatpush.msrb.mxu1 %v10702_v49  ;;  %v4854_v23 = vsub.f32 %v10862_v24, %v13394_v59  ;;  %v13396_v53 = vand.u32 4294901760, %v10637_v48  ;;  %v10948_v48 = vpop.f32.mrf.mxu2 }
 0x266   : > { %4805 = vmatpush.msra.mxu0 %v10851_v27  ;;  %v4860_v59 = vsub.f32 %v10881_v30, %v13397_v31  ;;  %13398 = vst [vmem:[#allocation10_spill] sm:$0xff] %v10948_v48  ;;  %v13405_v48 = vld [vmem:[#allocation42_spill] sm:$0xff] }
 0x267   : > { %4719 = vmatpush.msrb.mxu2 %v13396_v53  ;;  %4778 = vmatpush.msrb.mxu3 %v10623_v47  ;;  %v13399_v47 = vand.u32 4294901760, %v10647_v28  ;;  %v10953_v53 = vand.u32 4294901760, %v494_v14  ;;  %v4855_v31 = vand.u32 4294901760, %v4854_v23  ;;  %v490_v28 = vld [vmem:[%s12825_s2 + $0x568] sm:$0xff] }
 0x268   : > { %4672 = vmatpush.msrb.mxu1 %v10720_v41  ;;  %4807 = vmatpush.msra.mxu0 %v10864_v45  ;;  %v13403_v23 = vld [vmem:[#allocation46_spill] sm:$0xff]  ;;  %v4861_v11 = vand.u32 4294901760, %v4860_v59  ;;  %v10990_v59 = vpop.f32.mrf.mxu1 }
 0x269   : > { %4723 = vmatpush.msrb.mxu2 %v13399_v47  ;;  %4780 = vmatpush.msrb.mxu3 %v10639_v36  ;;  %v13402_v47 = vand.u32 4294901760, %v10662_v38  ;;  %v10972_v36 = vsub.f32 %v496_v63, %v10934_v26  ;;  %v10982_v38 = vand.u32 4294901760, %v490_v28  ;;  %v488_v63 = vld [vmem:[%s12825_s2 + $0x558] sm:$0xff]  ;;  %13406 = vst [vmem:[#allocation13_spill] sm:$0xff] %v10990_v59 }
 0x26a   : > { %4674 = vmatpush.msrb.mxu1 %v10732_v50  ;;  %4809 = vmatpush.msra.mxu0 %v10878_v17 }
 0x26b   : > { %4727 = vmatpush.msrb.mxu2 %v13402_v47  ;;  %4782 = vmatpush.msrb.mxu3 %v10649_v35  ;;  %v10988_v35 = vsub.f32 %v494_v14, %v10953_v53  ;;  %v4867_v47 = vand.u32 4294901760, %v4866_v52  ;;  %v486_v14 = vld [vmem:[%s12825_s2 + $0x548] sm:$0xff]  ;;  %v4873_v52 = vand.u32 4294901760, %v4872_v18  ;;  %v11013_v59 = vpop.f32.mrf.mxu3  ;;  %v11022_v18 = vsub.f32 %v490_v28, %v10982_v38 }
 0x26c   : > { %4639 = vmatmul.f32.gmra.mxu0 %v13403_v23  ;;  %4678 = vmatmul.f32.vlgmr.msrb.gmra.mxu1 %v13405_v48  ;;  %v13408_v48 = vand.u32 4294901760, %v10927_v15  ;;  %13411 = vst [vmem:[#allocation11_spill] sm:$0xff] %v11013_v59 }
 0x26d   : > { %4811 = vmatpush.msra.mxu0 %v10892_v34  ;;  %4856 = vmatpush.msra.mxu1 %v4855_v31  ;;  %v11004_v31 = vsub.f32 %v492_v44, %v10969_v51  ;;  %v11028_v21 = vpop.f32.mrf.mxu2  ;;  %v13418_v28 = vand.u32 4294901760, %v10988_v35 }
 0x26e   : > { %4731 = vmatpush.msrb.mxu2 %v13407_v62  ;;  %v4878_v23 = vsub.f32 %v10927_v15, %v13408_v48  ;;  %4784 = vmatpush.msrb.mxu3 %v10673_v46  ;;  %v13410_v62 = vand.u32 4294901760, %v10946_v6  ;;  %v11011_v48 = vand.u32 4294901760, %v488_v63  ;;  %13413 = vst [vmem:[#allocation12_spill] sm:$0xff] %v11028_v21 }
 0x26f   : > { %4813 = vmatpush.msra.mxu0 %v10905_v7  ;;  %4862 = vmatpush.msra.mxu1 %v4861_v11  ;;  %v13412_v11 = vand.u32 4294901760, %v10718_v54  ;;  %v482_v54 = vld [vmem:[%s12825_s2 + $0x528] sm:$0xff]  ;;  %v4896_v21 = vsub.f32 %v10988_v35, %v13418_v28  ;;  %v13420_v28 = vand.u32 4294901760, %v11004_v31 }
 0x270   : > { %4735 = vmatpush.msrb.mxu2 %v13409_v56  ;;  %v4884_v46 = vsub.f32 %v10946_v6, %v13410_v62  ;;  %4786 = vmatpush.msrb.mxu3 %v10686_v22  ;;  %v4879_v56 = vand.u32 4294901760, %v4878_v23  ;;  %v11026_v62 = vand.u32 4294901760, %v486_v14  ;;  %v13414_v22 = vand.u32 4294901760, %v10972_v36 }
 0x271   : > { %4815 = vmatpush.msra.mxu0 %v10934_v26  ;;  %4868 = vmatpush.msra.mxu1 %v4867_v47  ;;  %v11039_v47 = vpop.f32.mrf.mxu0  ;;  %v13416_v23 = vand.u32 4294901760, %v10730_v16  ;;  %v11046_v59 = vsub.f32 %v488_v63, %v11011_v48  ;;  %v480_v16 = vld [vmem:[%s12825_s2 + $0x518] sm:$0xff] }
 0x272   : > { %4739 = vmatpush.msrb.mxu2 %v13412_v11  ;;  %4788 = vmatpush.msrb.mxu3 %v10702_v49  ;;  %v4890_v44 = vsub.f32 %v10972_v36, %v13414_v22  ;;  %13415 = vst [vmem:[#allocation14_spill] sm:$0xff] %v11039_v47  ;;  %v4885_v11 = vand.u32 4294901760, %v4884_v46  ;;  %v11043_v49 = vand.u32 4294901760, %v484_v19  ;;  %v13417_v22 = vld [vmem:[#allocation49_spill] sm:$0xff]  ;;  %v13025_v47 = vand.u32 4294901760, %v11022_v18 }
 0x273   : > { %4817 = vmatpush.msra.mxu0 %v10953_v53  ;;  %4874 = vmatpush.msra.mxu1 %v4873_v52  ;;  %v11058_v52 = vand.u32 4294901760, %v482_v54  ;;  %v11061_v63 = vsub.f32 %v486_v14, %v11026_v62  ;;  %v11075_v14 = vand.u32 4294901760, %v480_v16 }
 0x274   : > { %4743 = vmatpush.msrb.mxu2 %v13416_v23  ;;  %4790 = vmatpush.msrb.mxu3 %v10720_v41  ;;  %v13419_v41 = vand.u32 4294901760, %v10745_v3  ;;  %v4891_v46 = vand.u32 4294901760, %v4890_v44  ;;  %v4902_v23 = vsub.f32 %v11004_v31, %v13420_v28  ;;  %v13422_v44 = vand.u32 4294901760, %v10757_v60  ;;  %v11097_v60 = vpop.f32.mrf.mxu3 }
 0x275   : > { %4684 = vmatmul.f32.gmra.mxu1 %v13417_v22  ;;  %4819 = vmatpush.msra.mxu0 %v10969_v51  ;;  %v478_v22 = vld [vmem:[%s12825_s2 + $0x508] sm:$0xff]  ;;  %v4908_v28 = vsub.f32 %v11022_v18, %v13025_v47 }
 0x276   : > { %4880 = vmatpush.msra.mxu1 %v4879_v56  ;;  %4747 = vmatpush.msrb.mxu2 %v13419_v41  ;;  %v11072_v56 = vpop.f32.mrf.mxu1  ;;  %v4897_v41 = vand.u32 4294901760, %v4896_v21  ;;  %v11091_v3 = vand.u32 4294901760, %v478_v22  ;;  %v4903_v21 = vand.u32 4294901760, %v4902_v23  ;;  %v13424_v23 = vand.u32 4294901760, %v11061_v63 }
 0x277   : > { %4792 = vmatpush.msrb.mxu3 %v10732_v50  ;;  %13421 = vst [vmem:[#allocation16_spill] sm:$0xff] %v11072_v56  ;;  %4821 = vmatpush.msra.mxu0 %v10982_v38  ;;  %v11079_v50 = vsub.f32 %v484_v19, %v11043_v49  ;;  %v11095_v56 = vsub.f32 %v482_v54, %v11058_v52  ;;  %v11110_v19 = vpop.f32.mrf.mxu2 }
 0x278   : > { %4886 = vmatpush.msra.mxu1 %v4885_v11  ;;  %4751 = vmatpush.msrb.mxu2 %v13422_v44  ;;  %v2047_v11 = vadd.f32 %v10704_v37, %v9574_v0  ;;  %v13423_v0 = vand.u32 4294901760, %v11046_v59  ;;  %v11108_v54 = vsub.f32 %v480_v16, %v11075_v14  ;;  %v11122_v16 = vsub.f32 %v478_v22, %v11091_v3 }
 0x279   : > { %5016 = vmatpush.msra.mxu3 %v10839_v39  ;;  %4753 = vmatmul.f32.vlgmr.msrb.gmra.mxu2 %v8676_v1  ;;  %v13026_v47 = vand.u32 4294901760, %v11079_v50 }
 0x27a   : > { %4823 = vmatpush.msra.mxu0 %v11011_v48  ;;  %4892 = vmatpush.msra.mxu1 %v4891_v46  ;;  %v2156_v44 = vadd.f32 %v10734_v42, %v2047_v11  ;;  %v4914_v37 = vsub.f32 %v11046_v59, %v13423_v0  ;;  %v4909_v46 = vand.u32 4294901760, %v4908_v28  ;;  %v11113_v42 = vpop.f32.mrf.mxu0  ;;  %v4920_v11 = vsub.f32 %v11061_v63, %v13424_v23 }
 0x27b   : > { %4958 = vmatpush.msra.mxu2 %v10862_v24  ;;  %5018 = vmatpush.msra.mxu3 %v10851_v27  ;;  %v13027_v0 = vand.u32 4294901760, %v11095_v56  ;;  %v4926_v28 = vsub.f32 %v11079_v50, %v13026_v47  ;;  %v4937_v23 = vand.u32 4294901760, %v11108_v54 }
 0x27c   : > { %4825 = vmatpush.msra.mxu0 %v11026_v62  ;;  %4794 = vmatmul.f32.vlgmr.msrb.gmra.mxu3 %v8676_v1  ;;  %v2214_v1 = vadd.f32 %v10760_v57, %v2156_v44  ;;  %v4921_v57 = vand.u32 4294901760, %v4920_v11  ;;  %v11151_v44 = vpop.f32.mrf.mxu3 }
 0x27d   : > { %4898 = vmatpush.msra.mxu1 %v4897_v41  ;;  %4961 = vmatpush.msra.mxu2 %v10881_v30  ;;  %v4915_v41 = vand.u32 4294901760, %v4914_v37  ;;  %v2055_v37 = vadd.f32 %v10768_v25, %v9594_v29  ;;  %v4927_v47 = vand.u32 4294901760, %v4926_v28  ;;  %v4938_v11 = vsub.f32 %v11108_v54, %v4937_v23 }
 0x27e   : > { %5020 = vmatpush.msra.mxu3 %v10864_v45  ;;  %4827 = vmatpush.msra.mxu0 %v11043_v49  ;;  %v11133_v22 = vpop.f32.mrf.mxu1  ;;  %v13425_v25 = vand.u32 4294901760, %v11122_v16 }
 0x27f   : > { %4904 = vmatpush.msra.mxu1 %v4903_v21  ;;  %4964 = vmatpush.msra.mxu2 %v10896_v8  ;;  %v4932_v21 = vsub.f32 %v11095_v56, %v13027_v0  ;;  %v2160_v0 = vadd.f32 %v10783_v40, %v2055_v37  ;;  %v13426_v37 = vld [vmem:[#allocation59_spill] sm:$0xff] }
 0x280   : > { %5022 = vmatpush.msra.mxu3 %v10878_v17  ;;  %4829 = vmatpush.msra.mxu0 %v11058_v52 }
 0x281   : > { %4910 = vmatpush.msra.mxu1 %v4909_v46  ;;  %4967 = vmatpush.msra.mxu2 %v10912_v33  ;;  %v2258_v46 = vadd.f32 %v10748_v55, %v2214_v1  ;;  %v4933_v55 = vand.u32 4294901760, %v4932_v21  ;;  %v4944_v1 = vsub.f32 %v11122_v16, %v13425_v25  ;;  %v13427_v21 = vand.u32 4294901760, %v10862_v24 }
 0x282   : > { %5024 = vmatpush.msra.mxu3 %v10892_v34  ;;  %4757 = vmatmul.f32.gmra.mxu2 %v8777_v9  ;;  %v11165_v28 = vpop.f32.mrf.mxu0 }
 0x283   : > { %4831 = vmatpush.msra.mxu0 %v11075_v14  ;;  %4916 = vmatpush.msra.mxu1 %v4915_v41  ;;  %v2333_v29 = vadd.f32 %v10796_v4, %v2258_v46  ;;  %v11160_v41 = vpop.f32.mrf.mxu2  ;;  %v512_v4 = vld [vmem:[%s12825_s2 + $0x618] sm:$0xff]  ;;  %v13428_v46 = vand.u32 4294901760, %v10881_v30 }
 0x284   : > { %4970 = vmatpush.msra.mxu2 %v10927_v15  ;;  %5026 = vmatpush.msra.mxu3 %v10905_v7 }
 0x285   : > { %4833 = vmatpush.msra.mxu0 %v11091_v3  ;;  %4798 = vmatmul.f32.gmra.mxu3 %v8777_v9  ;;  %v2374_v40 = vadd.f32 %v10806_v61, %v2333_v29  ;;  %v4939_v9 = vand.u32 4294901760, %v4938_v11  ;;  %v4945_v61 = vand.u32 4294901760, %v4944_v1  ;;  %v11182_v11 = vand.u32 4294901760, %v512_v4  ;;  %v11189_v29 = vpop.f32.mrf.mxu3 }
 0x286   : > { %4922 = vmatpush.msra.mxu1 %v4921_v57  ;;  %4973 = vmatpush.msra.mxu2 %v10946_v6  ;;  %v2219_v57 = vadd.f32 %v10800_v2, %v2160_v0  ;;  %v11185_v24 = vpop.f32.mrf.mxu1  ;;  %v13430_v1 = vand.u32 4294901760, %v10912_v33 }
 0x287   : > { %5028 = vmatpush.msra.mxu3 %v10934_v26  ;;  %4839 = vmatmul.f32.vlgmr.msra.gmra.mxu0 %v13426_v37  ;;  %v2419_v2 = vadd.f32 %v10819_v58, %v2374_v40  ;;  %v13431_v40 = vld [vmem:[#allocation33_spill] sm:$0xff] }
 0x288   : > { %4928 = vmatpush.msra.mxu1 %v4927_v47  ;;  %5063 = vmatpush.msrb.mxu0 %v13427_v21  ;;  %v510_v47 = vld [vmem:[%s12825_s2 + $0x608] sm:$0xff]  ;;  %v2264_v0 = vadd.f32 %v10793_v13, %v2219_v57  ;;  %v11204_v13 = vsub.f32 %v512_v4, %v11182_v11 }
 0x289   : > { %4976 = vmatpush.msra.mxu2 %v10972_v36  ;;  %5030 = vmatpush.msra.mxu3 %v10953_v53  ;;  %v11194_v30 = vand.u32 4294901760, %v510_v47 }
 0x28a   : > { %4934 = vmatpush.msra.mxu1 %v4933_v55  ;;  %5067 = vmatpush.msrb.mxu0 %v13428_v46  ;;  %v13429_v55 = vand.u32 4294901760, %v10896_v8  ;;  %v2337_v58 = vadd.f32 %v10827_v43, %v2264_v0  ;;  %v2528_v8 = vadd.f32 %v10813_v5, %v2419_v2  ;;  %v13433_v43 = vand.u32 4294901760, %v10927_v15  ;;  %v11217_v4 = vpop.f32.mrf.mxu0  ;;  %v13439_v2 = vld [vmem:[#allocation57_spill] sm:$0xff] }
 0x28b   : > { %4979 = vmatpush.msra.mxu2 %v10988_v35  ;;  %5032 = vmatpush.msra.mxu3 %v10969_v51  ;;  %v11198_v25 = vpop.f32.mrf.mxu2  ;;  %v11214_v33 = vsub.f32 %v510_v47, %v11194_v30  ;;  %v13434_v5 = vand.u32 4294901760, %v10946_v6 }
 0x28c   : > { %4940 = vmatpush.msra.mxu1 %v4939_v9  ;;  %5071 = vmatpush.msrb.mxu0 %v13429_v55  ;;  %v2378_v37 = vadd.f32 %v10846_v10, %v2337_v58  ;;  %v13432_v9 = vld [vmem:[#allocation54_spill] sm:$0xff]  ;;  %v2586_v57 = vadd.f32 %v10873_v32, %v2528_v8  ;;  %v5225_v10 = vand.u32 4294901760, %v11204_v13  ;;  %v13440_v55 = vand.u32 4294901760, %v11004_v31  ;;  %v13442_v8 = vld [vmem:[#allocation15_spill] sm:$0xff] }
 0x28d   : > { %4982 = vmatpush.msra.mxu2 %v11004_v31  ;;  %5034 = vmatpush.msra.mxu3 %v10982_v38  ;;  %v5231_v21 = vand.u32 4294901760, %v11214_v33  ;;  %v11237_v6 = vpop.f32.mrf.mxu3  ;;  %v13446_v31 = vld [vmem:[#allocation14_spill] sm:$0xff] }
 0x28e   : > { %4946 = vmatpush.msra.mxu1 %v4945_v61  ;;  %5075 = vmatpush.msrb.mxu0 %v13430_v1  ;;  %v2630_v15 = vadd.f32 %v10901_v12, %v2586_v57  ;;  %v2427_v32 = vadd.f32 %v10883_v20, %v2378_v37  ;;  %v11233_v61 = vpop.f32.mrf.mxu1  ;;  %v5226_v20 = vsub.f32 %v11204_v13, %v5225_v10  ;;  %v13437_v12 = vld [vmem:[#allocation10_spill] sm:$0xff]  ;;  %v13443_v37 = vld [vmem:[#allocation56_spill] sm:$0xff]  ;;  %v13445_v57 = vld [vmem:[#allocation13_spill] sm:$0xff] }
 0x28f   : > { %4985 = vmatpush.msra.mxu2 %v11022_v18  ;;  %5036 = vmatpush.msra.mxu3 %v11011_v48 }
 0x290   : > { %4847 = vmatmul.f32.gmra.mxu0 %v13431_v40  ;;  %4948 = vmatmul.f32.vlgmr.msra.gmra.mxu1 %v13432_v9  ;;  %v5227_v1 = vand.u32 4294901760, %v5226_v20 }
 0x291   : > { %5079 = vmatpush.msrb.mxu0 %v13433_v43  ;;  %5134 = vmatpush.msrb.mxu1 %v10839_v39  ;;  %v13435_v39 = vand.u32 4294901760, %v10972_v36  ;;  %v2705_v36 = vadd.f32 %v13437_v12, %v2630_v15  ;;  %v13444_v43 = vand.u32 4294901760, %v11022_v18  ;;  %v13449_v18 = vld [vmem:[#allocation16_spill] sm:$0xff]  ;;  %v13450_v12 = vand.u32 4294901760, %v11061_v63 }
 0x292   : > { %4988 = vmatpush.msra.mxu2 %v11046_v59  ;;  %5038 = vmatpush.msra.mxu3 %v11026_v62  ;;  %v11256_v0 = vpop.f32.mrf.mxu0 }
 0x293   : > { %5083 = vmatpush.msrb.mxu0 %v13434_v5  ;;  %5136 = vmatpush.msrb.mxu1 %v10851_v27  ;;  %v13436_v27 = vand.u32 4294901760, %v10988_v35  ;;  %v11249_v46 = vpop.f32.mrf.mxu2  ;;  %v5232_v35 = vsub.f32 %v11214_v33, %v5231_v21  ;;  %v2746_v40 = vadd.f32 %v13442_v8, %v2705_v36  ;;  %v13451_v36 = vld [vmem:[#allocation12_spill] sm:$0xff] }
 0x294   : > { %4991 = vmatpush.msra.mxu2 %v11061_v63  ;;  %5040 = vmatpush.msra.mxu3 %v11043_v49 }
 0x295   : > { %5087 = vmatpush.msrb.mxu0 %v13435_v39  ;;  %5138 = vmatpush.msrb.mxu1 %v10864_v45  ;;  %v13438_v45 = vld [vmem:[#allocation53_spill] sm:$0xff]  ;;  %v2777_v15 = vadd.f32 %v13446_v31, %v2746_v40  ;;  %v13447_v39 = vld [vmem:[#allocation55_spill] sm:$0xff] }
 0x296   : > { %4994 = vmatpush.msra.mxu2 %v11079_v50  ;;  %5042 = vmatpush.msra.mxu3 %v11058_v52  ;;  %v2532_v47 = vadd.f32 %v13438_v45, %v2427_v32  ;;  %v11272_v32 = vpop.f32.mrf.mxu1 }
 0x297   : > { %5091 = vmatpush.msrb.mxu0 %v13436_v27  ;;  %5140 = vmatpush.msrb.mxu1 %v10878_v17  ;;  %v13441_v17 = vld [vmem:[#allocation19_spill] sm:$0xff]  ;;  %v13448_v27 = vand.u32 4294901760, %v11046_v59  ;;  %v2816_v20 = vadd.f32 %v13449_v18, %v2777_v15 }
 0x298   : > { %4997 = vmatpush.msra.mxu2 %v11095_v56  ;;  %5044 = vmatpush.msra.mxu3 %v11075_v14  ;;  %v2591_v58 = vadd.f32 %v13441_v17, %v2532_v47  ;;  %v11286_v47 = vpop.f32.mrf.mxu3  ;;  %v13454_v17 = vand.u32 4294901760, %v11095_v56 }
 0x299   : > { %4952 = vmatmul.f32.gmra.mxu1 %v13439_v2  ;;  %5095 = vmatpush.msrb.mxu0 %v13440_v55 }
 0x29a   : > { %5142 = vmatpush.msrb.mxu1 %v10892_v34  ;;  %5000 = vmatpush.msra.mxu2 %v11108_v54  ;;  %v2636_v5 = vadd.f32 %v13445_v57, %v2591_v58  ;;  %v5233_v34 = vand.u32 4294901760, %v5232_v35  ;;  %v5415_v35 = vld [vmem:[%s12827_s4 + $0xe0] sm:$0xff]  ;;  %v11302_v55 = vpop.f32.mrf.mxu0  ;;  %v13455_v58 = vld [vmem:[#allocation11_spill] sm:$0xff] }
 0x29b   : > { %5046 = vmatpush.msra.mxu3 %v11091_v3  ;;  %5099 = vmatpush.msrb.mxu0 %v13444_v43  ;;  %v11292_v59 = vpop.f32.mrf.mxu2  ;;  %v11319_v56 = vand.u32 4294901760, %v5415_v35 }
 0x29c   : > { %5050 = vmatmul.f32.vlgmr.msra.gmra.mxu3 %v13443_v37  ;;  %5144 = vmatpush.msrb.mxu1 %v10905_v7  ;;  %v5417_v7 = vld [vmem:[%s12827_s4 + $0xf0] sm:$0xff]  ;;  %v2709_v45 = vadd.f32 %v13451_v36, %v2636_v5  ;;  %v13457_v37 = vand.u32 4294901760, %v11122_v16 }
 0x29d   : > { %5003 = vmatpush.msra.mxu2 %v11122_v16  ;;  %5103 = vmatpush.msrb.mxu0 %v13448_v27  ;;  %v11296_v63 = vand.u32 4294901760, %v5417_v7  ;;  %v11347_v16 = vsub.f32 %v5415_v35, %v11319_v56  ;;  %v5405_v27 = vld [vmem:[%s12827_s4 + $0x90] sm:$0xff] }
 0x29e   : > { %5006 = vmatmul.f32.vlgmr.msra.gmra.mxu2 %v13447_v39  ;;  %5146 = vmatpush.msrb.mxu1 %v10934_v26  ;;  %v13452_v26 = vand.u32 4294901760, %v11079_v50  ;;  %v13453_v50 = vld [vmem:[#allocation24_spill] sm:$0xff]  ;;  %v11328_v40 = vpop.f32.mrf.mxu1  ;;  %v11416_v35 = vand.u32 4294901760, %v5405_v27 }
 0x29f   : > { %5228 = vmatpush.msrb.mxu3 %v5227_v1  ;;  %5107 = vmatpush.msrb.mxu0 %v13450_v12  ;;  %v2750_v1 = vadd.f32 %v13455_v58, %v2709_v45  ;;  %v13033_v15 = vand.u32 4294901760, %v11347_v16 }
 0x2a0   : > { %5189 = vmatpush.msrb.mxu2 %v11182_v11  ;;  %5148 = vmatpush.msrb.mxu1 %v10953_v53  ;;  %v2846_v53 = vadd.f32 %v11110_v19, %v2816_v20  ;;  %v13456_v19 = vld [vmem:[#allocation58_spill] sm:$0xff] }
 0x2a1   : > { %5234 = vmatpush.msrb.mxu3 %v5233_v34  ;;  %5111 = vmatpush.msrb.mxu0 %v13452_v26  ;;  %v2785_v8 = vadd.f32 %v11113_v42, %v2750_v1  ;;  %v11366_v34 = vstv %s11308_s15  ;;  %v5509_v26 = vsub.f32 %v11347_v16, %v13033_v15 }
 0x2a2   : > { %5150 = vmatpush.msrb.mxu1 %v10969_v51  ;;  %5191 = vmatpush.msrb.mxu2 %v11194_v30  ;;  %v5413_v51 = vld [vmem:[%s12827_s4 + $0xd0] sm:$0xff]  ;;  %13459 = vst [vmem:[#allocation5_spill] sm:$0xff] %v11366_v34  ;;  %v11380_v31 = vpop.f32.mrf.mxu0 }
 0x2a3   : > { %5352 = vmatpush.msra.mxu3 %v11182_v11  ;;  %5115 = vmatpush.msrb.mxu0 %v13454_v17  ;;  %v11334_v54 = vand.u32 4294901760, %v5413_v51  ;;  %v2820_v42 = vadd.f32 %v11133_v22, %v2785_v8  ;;  %v11352_v43 = vpop.f32.mrf.mxu2 }
 0x2a4   : > { %5056 = vmatmul.f32.gmra.mxu3 %v13453_v50  ;;  %5152 = vmatpush.msrb.mxu1 %v10982_v38  ;;  %v11325_v38 = vsub.f32 %v5417_v7, %v11296_v63 }
 0x2a5   : > { %5323 = vmatpush.msra.mxu2 %v5225_v10  ;;  %5119 = vmatpush.msrb.mxu0 %v4937_v23  ;;  %v2876_v10 = vadd.f32 %v11097_v60, %v2846_v53  ;;  %v11340_v23 = vpop.f32.mrf.mxu3  ;;  %v2851_v5 = vadd.f32 %v11160_v41, %v2820_v42  ;;  %v13460_v41 = vld [vmem:[#allocation48_spill] sm:$0xff] }
 0x2a6   : > { %5011 = vmatmul.f32.gmra.mxu2 %v13456_v19  ;;  %5154 = vmatpush.msrb.mxu1 %v11011_v48  ;;  %v5411_v48 = vld [vmem:[%s12827_s4 + $0xc0] sm:$0xff]  ;;  %v11409_v45 = vpop.f32.mrf.mxu1 }
 0x2a7   : > { %5354 = vmatpush.msra.mxu3 %v11194_v30  ;;  %5123 = vmatpush.msrb.mxu0 %v13457_v37  ;;  %v2909_v60 = vadd.f32 %v11165_v28, %v2876_v10  ;;  %v11355_v22 = vand.u32 4294901760, %v5411_v48  ;;  %v13458_v28 = vld [vmem:[#allocation26_spill] sm:$0xff]  ;;  %v2882_v7 = vadd.f32 %v11151_v44, %v2851_v5  ;;  %v5510_v37 = vand.u32 4294901760, %v5509_v26 }
 0x2a8   : > { %5327 = vmatpush.msra.mxu2 %v5231_v21  ;;  %5156 = vmatpush.msrb.mxu1 %v11026_v62  ;;  %v5409_v21 = vld [vmem:[%s12827_s4 + $0xb0] sm:$0xff]  ;;  %v13034_v62 = vand.u32 4294901760, %v11325_v38 }
 0x2a9   : > { %5125 = vmatmul.f32.vlgmr.msrb.gmra.mxu0 %v13432_v9  ;;  %v2936_v57 = vadd.f32 %v11185_v24, %v2909_v60  ;;  %v11375_v24 = vand.u32 4294901760, %v5409_v21  ;;  %v11391_v39 = vsub.f32 %v5411_v48, %v11355_v22  ;;  %v2913_v44 = vadd.f32 %v11217_v4, %v2882_v7  ;;  %v5399_v60 = vld [vmem:[%s12827_s4 + $0x60] sm:$0xff] }
 0x2aa   : > { %5260 = vmatpush.msra.mxu0 %v11204_v13  ;;  %5158 = vmatpush.msrb.mxu1 %v11043_v49  ;;  %v11362_v13 = vsub.f32 %v5413_v51, %v11334_v54  ;;  %v11371_v49 = vld [vmem:[%s12826_s3] sm:$0x3]  ;;  %v11448_v10 = vpop.f32.mrf.mxu0  ;;  %v11453_v48 = vsub.f32 %v5405_v27, %v11416_v35  ;;  %v11482_v26 = vand.u32 4294901760, %v5399_v60 }
 0x2ab   : > { %v5365_v18 = vmul.f32 %v11366_v34, %v2936_v57  ;;  %v5371_v20 = vperm.slane %v11371_v49, 0  ;;  %v11407_v36 = vsub.f32 %v5409_v21, %v11375_v24  ;;  %v2940_v1 = vadd.f32 %v11233_v61, %v2913_v44  ;;  %v11441_v51 = vpop.f32.mrf.mxu2  ;;  %v13462_v61 = vld [vmem:[#allocation45_spill] sm:$0xff] }
 0x2ac   : > { %5263 = vmatpush.msra.mxu0 %v11214_v33  ;;  %5236 = vmatmul.f32.vlgmr.msrb.gmra.mxu3 %v13458_v28  ;;  %v5407_v33 = vld [vmem:[%s12827_s4 + $0xa0] sm:$0xff]  ;;  %v13032_v12 = vand.u32 4294901760, %v11362_v13  ;;  %13465 = vst [vmem:[#allocation20_spill] sm:$0xff] %v11482_v26  ;;  %v13030_v44 = vand.u32 4294901760, %v11453_v48  ;;  %v11512_v49 = vsub.f32 %v5399_v60, %v11482_v26 }
 0x2ad   : > { %5160 = vmatpush.msrb.mxu1 %v11058_v52  ;;  %5665 = vmatpush.msrb.mxu3 %v11296_v63  ;;  %v5503_v52 = vsub.f32 %v11325_v38, %v13034_v62  ;;  %v11422_v53 = vpop.f32.mrf.mxu3  ;;  %v5375_v17 = vadd.f32 %v5371_v20, %v5365_v18  ;;  %v13028_v8 = vand.u32 4294901760, %v11407_v36  ;;  %v5397_v18 = vld [vmem:[%s12827_s4 + $0x50] sm:$0xff] }
 0x2ae   : > { %5452 = vmatpush.msrb.mxu0 %v11296_v63  ;;  %5197 = vmatmul.f32.vlgmr.msrb.gmra.mxu2 %v13460_v41  ;;  %v5515_v4 = vsub.f32 %v11362_v13, %v13032_v12  ;;  %v13464_v41 = vld [vmem:[#allocation51_spill] sm:$0xff]  ;;  %v11479_v7 = vpop.f32.mrf.mxu1  ;;  %v13475_v62 = vand.u32 4294901760, %v11512_v49 }
 0x2af   : > { %5162 = vmatpush.msrb.mxu1 %v11075_v14  ;;  %5607 = vmatpush.msrb.mxu2 %v11325_v38  ;;  %v11400_v14 = vand.u32 4294901760, %v5407_v33  ;;  %v5504_v50 = vand.u32 4294901760, %v5503_v52  ;;  %v5379_v21 = vmul.f32 0.2, %v5375_v17  ;;  %v5527_v52 = vsub.f32 %v11407_v36, %v13028_v8 }
 0x2b0   : > { %5454 = vmatpush.msrb.mxu0 %v11319_v56  ;;  %5667 = vmatpush.msrb.mxu3 %v11319_v56  ;;  %v5516_v57 = vand.u32 4294901760, %v5515_v4  ;;  %v5395_v4 = vld [vmem:[%s12827_s4 + $0x40] sm:$0xff]  ;;  %v11497_v8 = vand.u32 4294901760, %v5397_v18 }
 0x2b1   : > { %5164 = vmatpush.msrb.mxu1 %v11091_v3  ;;  %5129 = vmatmul.f32.gmra.mxu0 %v13439_v2  ;;  %v5403_v3 = vld [vmem:[%s12827_s4 + $0x80] sm:$0xff]  ;;  %v11435_v58 = vsub.f32 %v5407_v33, %v11400_v14  ;;  %v5367_v33 = vmul.f32 %v11366_v34, %v2940_v1  ;;  %v5383_v1 = vmax.f32 %v5375_v17, %v5379_v21 }
 0x2b2   : > { %5456 = vmatpush.msrb.mxu0 %v11334_v54  ;;  %5166 = vmatmul.f32.vlgmr.msrb.gmra.mxu1 %v13432_v9  ;;  %v13029_v9 = vand.u32 4294901760, %v11391_v39  ;;  %v11445_v19 = vand.u32 4294901760, %v5403_v3  ;;  %13467 = vst [vmem:[#allocation7_spill] sm:$0xff] %v11497_v8  ;;  %v5539_v21 = vsub.f32 %v11453_v48, %v13030_v44  ;;  %v11530_v44 = vsub.f32 %v5397_v18, %v11497_v8 }
 0x2b3   : > { %5290 = vmatpush.msra.mxu1 %v11182_v11  ;;  %5610 = vmatpush.msrb.mxu2 %v11347_v16  ;;  %v5401_v11 = vld [vmem:[%s12827_s4 + $0x70] sm:$0xff]  ;;  %v13031_v5 = vand.u32 4294901760, %v11435_v58 }
 0x2b4   : > { %5669 = vmatpush.msrb.mxu3 %v11334_v54  ;;  %5458 = vmatpush.msrb.mxu0 %v11355_v22  ;;  %13461 = vst [vmem:[#allocation17_spill] sm:$0xff] %v11445_v19  ;;  %v11459_v42 = vand.u32 4294901760, %v5401_v11  ;;  %v11474_v27 = vsub.f32 %v5403_v3, %v11445_v19  ;;  %v5540_v18 = vand.u32 4294901760, %v5539_v21 }
 0x2b5   : > { %5292 = vmatpush.msra.mxu1 %v11194_v30  ;;  %5613 = vmatpush.msrb.mxu2 %v11362_v13  ;;  %v5521_v30 = vsub.f32 %v11391_v39, %v13029_v9  ;;  %v11501_v9 = vpop.f32.mrf.mxu3 }
 0x2b6   : > { %5671 = vmatpush.msrb.mxu3 %v11355_v22  ;;  %5460 = vmatpush.msrb.mxu0 %v11375_v24  ;;  %13463 = vst [vmem:[#allocation18_spill] sm:$0xff] %v11459_v42  ;;  %v11488_v3 = vsub.f32 %v5401_v11, %v11459_v42  ;;  %v5528_v11 = vand.u32 4294901760, %v5527_v52  ;;  %v13035_v17 = vand.u32 4294901760, %v11474_v27  ;;  %v11523_v52 = vand.u32 4294901760, %v5383_v1 }
 0x2b7   : > { %5240 = vmatmul.f32.gmra.mxu3 %v13462_v61  ;;  %5505 = vmatpush.msrb.mxu1 %v5504_v50  ;;  %v5522_v50 = vand.u32 4294901760, %v5521_v30  ;;  %v5377_v30 = vadd.f32 %v5371_v20, %v5367_v33  ;;  %13468 = vst [vmem:[#allocation6_spill] sm:$0xff] %v11501_v9  ;;  %v11514_v20 = vand.u32 4294901760, %v5395_v4 }
 0x2b8   : > { %5616 = vmatpush.msrb.mxu2 %v11391_v39  ;;  %5673 = vmatpush.msrb.mxu3 %v11375_v24  ;;  %v13039_v33 = vand.u32 4294901760, %v11488_v3  ;;  %v5545_v12 = vsub.f32 %v11474_v27, %v13035_v17  ;;  %v11558_v21 = vsub.f32 %v5383_v1, %v11523_v52 }
 0x2b9   : > { %5205 = vmatmul.f32.gmra.mxu2 %v13464_v41  ;;  %5462 = vmatpush.msrb.mxu0 %v11400_v14  ;;  %v5533_v41 = vsub.f32 %v11435_v58, %v13031_v5  ;;  %v5381_v5 = vmul.f32 0.2, %v5377_v30 }
 0x2ba   : > { %5511 = vmatpush.msrb.mxu1 %v5510_v37  ;;  %5619 = vmatpush.msrb.mxu2 %v11407_v36  ;;  %v13466_v37 = vld [vmem:[#allocation44_spill] sm:$0xff]  ;;  %v5551_v17 = vsub.f32 %v11488_v3, %v13039_v33  ;;  %13471 = vst [vmem:[#allocation32_spill] sm:$0xff] %v11558_v21  ;;  %v5546_v1 = vand.u32 4294901760, %v5545_v12 }
 0x2bb   : > { %5675 = vmatpush.msrb.mxu3 %v11400_v14  ;;  %5464 = vmatpush.msrb.mxu0 %v11416_v35  ;;  %v5534_v60 = vand.u32 4294901760, %v5533_v41  ;;  %v11544_v41 = vsub.f32 %v5395_v4, %v11514_v20  ;;  %v11560_v4 = vpop.f32.mrf.mxu1  ;;  %v5385_v9 = vmax.f32 %v5377_v30, %v5381_v5  ;;  %v3090_v30 = vadd.f32 %v11189_v29, %v11198_v25  ;;  %v13476_v12 = vld [vmem:[#allocation28_spill] sm:$0xff] }
 0x2bc   : > { %5517 = vmatpush.msrb.mxu1 %v5516_v57  ;;  %5266 = vmatmul.f32.vlgmr.msra.gmra.mxu0 %v13466_v37  ;;  %v11519_v57 = vpop.f32.mrf.mxu2  ;;  %v11525_v37 = vpop.f32.mrf.mxu0 }
 0x2bd   : > { %5170 = vmatmul.f32.gmra.mxu1 %v13439_v2  ;;  %5622 = vmatpush.msrb.mxu2 %v11435_v58  ;;  %v5393_v2 = vld [vmem:[%s12827_s4 + $0x30] sm:$0xff]  ;;  %13469 = vst [vmem:[#allocation8_spill] sm:$0xff] %v11519_v57  ;;  %v11597_v25 = vand.u32 4294901760, %v5385_v9 }
 0x2be   : > { %5677 = vmatpush.msrb.mxu3 %v11416_v35  ;;  %5466 = vmatpush.msrb.mxu0 %v11445_v19  ;;  %v11539_v15 = vand.u32 4294901760, %v5393_v2  ;;  %v13474_v57 = vld [vmem:[#allocation43_spill] sm:$0xff] }
 0x2bf   : > { %5523 = vmatpush.msrb.mxu1 %v5522_v50  ;;  %5625 = vmatpush.msrb.mxu2 %v11453_v48  ;;  %v5391_v50 = vld [vmem:[%s12827_s4 + $0x20] sm:$0xff]  ;;  %13478 = vst [vmem:[#allocation29_spill] sm:$0xff] %v11597_v25 }
 0x2c0   : > { %5679 = vmatpush.msrb.mxu3 %v11445_v19  ;;  %5468 = vmatpush.msrb.mxu0 %v11459_v42  ;;  %v11555_v34 = vand.u32 4294901760, %v5391_v50  ;;  %v11572_v33 = vsub.f32 %v5393_v2, %v11539_v15  ;;  %v5557_v19 = vsub.f32 %v11512_v49, %v13475_v62  ;;  %v5552_v2 = vand.u32 4294901760, %v5551_v17 }
 0x2c1   : > { %5356 = vmatmul.f32.vlgmr.msra.gmra.mxu3 %v13458_v28  ;;  %5529 = vmatpush.msrb.mxu1 %v5528_v11  ;;  %v5389_v11 = vld [vmem:[%s12827_s4 + $0x10] sm:$0xff]  ;;  %v13477_v62 = vand.u32 4294901760, %v11530_v44  ;;  %v11601_v17 = vand.u32 4294901760, %v11558_v21 }
 0x2c2   : > { %5628 = vmatpush.msrb.mxu2 %v11474_v27  ;;  %5681 = vmatpush.msrb.mxu3 %v11459_v42  ;;  %13470 = vst [vmem:[#allocation9_spill] sm:$0xff] %v11555_v34  ;;  %v11567_v42 = vpop.f32.mrf.mxu3 }
 0x2c3   : > { %5329 = vmatmul.f32.vlgmr.msra.gmra.mxu2 %v13458_v28  ;;  %5470 = vmatpush.msrb.mxu0 %v11482_v26  ;;  %v5387_v28 = vld [vmem:[%s12827_s4] sm:$0xff]  ;;  %13472 = vst [vmem:[#allocation21_spill] sm:$0xff] %v11567_v42  ;;  %v5563_v29 = vsub.f32 %v11530_v44, %v13477_v62  ;;  %v5558_v62 = vand.u32 4294901760, %v5557_v19  ;;  %v11623_v19 = vsub.f32 %v5385_v9, %v11597_v25 }
 0x2c4   : > { %5535 = vmatpush.msrb.mxu1 %v5534_v60  ;;  %5631 = vmatpush.msrb.mxu2 %v11488_v3  ;;  %v11574_v60 = vand.u32 4294901760, %v5389_v11  ;;  %v11583_v42 = vpop.f32.mrf.mxu2  ;;  %13479 = vst [vmem:[#allocation23_spill] sm:$0xff] %v11601_v17  ;;  %v11607_v5 = vpop.f32.mrf.mxu0 }
 0x2c5   : > { %5683 = vmatpush.msrb.mxu3 %v11482_v26  ;;  %5472 = vmatpush.msrb.mxu0 %v11497_v8  ;;  %13480 = vst [vmem:[#allocation31_spill] sm:$0xff] %v11607_v5  ;;  %v3148_v26 = vadd.f32 %v11256_v0, %v3090_v30  ;;  %v5564_v5 = vand.u32 4294901760, %v5563_v29  ;;  %v5486_v0 = vsub.f32 %v11558_v21, %v11601_v17 }
 0x2c6   : > { %13473 = vst [vmem:[#allocation35_spill] sm:$0xff] %v11574_v60  ;;  %5541 = vmatpush.msrb.mxu1 %v5540_v18  ;;  %5271 = vmatmul.f32.gmra.mxu0 %v13474_v57  ;;  %v11588_v18 = vsub.f32 %v5391_v50, %v11555_v34  ;;  %v11590_v57 = vand.u32 4294901760, %v5387_v28  ;;  %v11604_v50 = vsub.f32 %v5389_v11, %v11574_v60 }
 0x2c7   : > { %5296 = vmatmul.f32.vlgmr.msra.gmra.mxu1 %v13476_v12  ;;  %5634 = vmatpush.msrb.mxu2 %v11512_v49  ;;  %13482 = vst [vmem:[#allocation27_spill] sm:$0xff] %v11623_v19  ;;  %v3192_v29 = vadd.f32 %v11272_v32, %v3148_v26  ;;  %v11650_v32 = vand.u32 4294901760, %v5486_v0 }
 0x2c8   : > { %5685 = vmatpush.msrb.mxu3 %v11497_v8  ;;  %5474 = vmatpush.msrb.mxu0 %v11514_v20  ;;  %v13481_v8 = vand.u32 4294901760, %v11544_v41  ;;  %v11617_v11 = vsub.f32 %v5387_v28, %v11590_v57  ;;  %v13044_v12 = vand.u32 4294901760, %v11588_v18 }
 0x2c9   : > { %5547 = vmatpush.msrb.mxu1 %v5546_v1  ;;  %5637 = vmatpush.msrb.mxu2 %v11530_v44 }
 0x2ca   : > { %5687 = vmatpush.msrb.mxu3 %v11514_v20  ;;  %5476 = vmatpush.msrb.mxu0 %v11539_v15  ;;  %v5569_v1 = vsub.f32 %v11544_v41, %v13481_v8  ;;  %v13483_v8 = vand.u32 4294901760, %v11572_v33 }
 0x2cb   : > { %5360 = vmatmul.f32.gmra.mxu3 %v13462_v61  ;;  %5553 = vmatpush.msrb.mxu1 %v5552_v2  ;;  %v11633_v2 = vpop.f32.mrf.mxu1 }
 0x2cc   : > { %5640 = vmatpush.msrb.mxu2 %v11544_v41  ;;  %5689 = vmatpush.msrb.mxu3 %v11539_v15  ;;  %v5575_v28 = vsub.f32 %v11572_v33, %v13483_v8  ;;  %v5570_v9 = vand.u32 4294901760, %v5569_v1  ;;  %v5581_v8 = vsub.f32 %v11588_v18, %v13044_v12  ;;  %v13485_v1 = vld [vmem:[#allocation50_spill] sm:$0xff]  ;;  %v11656_v12 = vand.u32 4294901760, %v11623_v19  ;;  %v11658_v30 = vpop.f32.mrf.mxu0 }
 0x2cd   : > { %5333 = vmatmul.f32.gmra.mxu2 %v13462_v61  ;;  %5478 = vmatpush.msrb.mxu0 %v11555_v34  ;;  %v11637_v61 = vpop.f32.mrf.mxu3 }
 0x2ce   : > { %5559 = vmatpush.msrb.mxu1 %v5558_v62  ;;  %5643 = vmatpush.msrb.mxu2 %v11572_v33  ;;  %13484 = vst [vmem:[#allocation34_spill] sm:$0xff] %v11637_v61  ;;  %v11646_v62 = vpop.f32.mrf.mxu2  ;;  %v5576_v26 = vand.u32 4294901760, %v5575_v28  ;;  %v13486_v61 = vand.u32 4294901760, %v11604_v50  ;;  %v5582_v0 = vand.u32 4294901760, %v5581_v8  ;;  %v13488_v28 = vand.u32 4294901760, %v11617_v11 }
 0x2cf   : > { %5691 = vmatpush.msrb.mxu3 %v11555_v34  ;;  %5480 = vmatpush.msrb.mxu0 %v11574_v60  ;;  %13487 = vst [vmem:[#allocation41_spill] sm:$0xff] %v11656_v12 }
 0x2d0   : > { %5565 = vmatpush.msrb.mxu1 %v5564_v5  ;;  %5646 = vmatpush.msrb.mxu2 %v11588_v18  ;;  %v5587_v34 = vsub.f32 %v11604_v50, %v13486_v61  ;;  %v3094_v5 = vadd.f32 %v11237_v6, %v11249_v46  ;;  %v5593_v61 = vsub.f32 %v11617_v11, %v13488_v28 }
 0x2d1   : > { %5302 = vmatmul.f32.gmra.mxu1 %v13485_v1  ;;  %5693 = vmatpush.msrb.mxu3 %v11574_v60  ;;  %v3267_v1 = vadd.f32 %v11292_v59, %v3192_v29  ;;  %v13489_v60 = vand.u32 4294901760, %v11325_v38  ;;  %v5494_v46 = vsub.f32 %v11623_v19, %v11656_v12 }
 0x2d2   : > { %5482 = vmatpush.msrb.mxu0 %v11590_v57  ;;  %5571 = vmatpush.msrb.mxu1 %v5570_v9  ;;  %v5588_v6 = vand.u32 4294901760, %v5587_v34  ;;  %v13490_v9 = vand.u32 4294901760, %v11347_v16  ;;  %v3153_v29 = vadd.f32 %v11302_v55, %v3094_v5  ;;  %v5594_v34 = vand.u32 4294901760, %v5593_v61 }
 0x2d3   : > { %5488 = vmatmul.f32.vlgmr.msrb.gmra.mxu0 %v11650_v32  ;;  %5649 = vmatpush.msrb.mxu2 %v11604_v50  ;;  %v11675_v59 = vpop.f32.mrf.mxu1  ;;  %v3308_v8 = vadd.f32 %v11286_v47, %v3267_v1  ;;  %v11689_v28 = vand.u32 4294901760, %v5494_v46  ;;  %v13492_v16 = vand.u32 4294901760, %v11391_v39  ;;  %v13494_v39 = vand.u32 4294901760, %v11435_v58 }
 0x2d4   : > { %5695 = vmatpush.msrb.mxu3 %v11590_v57  ;;  %5712 = vmatpush.msra.mxu0 %v13489_v60  ;;  %v13491_v60 = vand.u32 4294901760, %v11362_v13  ;;  %v3198_v55 = vadd.f32 %v11328_v40, %v3153_v29  ;;  %v11696_v5 = vpop.f32.mrf.mxu0  ;;  %v13493_v13 = vand.u32 4294901760, %v11407_v36  ;;  %v13495_v36 = vand.u32 4294901760, %v11453_v48 }
 0x2d5   : > { %5577 = vmatpush.msrb.mxu1 %v5576_v26  ;;  %5699 = vmatmul.f32.vlgmr.msrb.gmra.mxu3 %v11601_v17  ;;  %v11682_v38 = vpop.f32.mrf.mxu3  ;;  %v3353_v47 = vadd.f32 %v11380_v31, %v3308_v8  ;;  %v13496_v58 = vand.u32 4294901760, %v11474_v27  ;;  %v13497_v48 = vand.u32 4294901760, %v11488_v3  ;;  %v13507_v29 = vand.u32 4294901760, %v11604_v50 }
 0x2d6   : > { %5652 = vmatpush.msrb.mxu2 %v11617_v11  ;;  %5716 = vmatpush.msra.mxu0 %v13490_v9  ;;  %v11687_v26 = vpop.f32.mrf.mxu2  ;;  %v3271_v31 = vadd.f32 %v11352_v43, %v3198_v55  ;;  %v13504_v9 = vld [vmem:[#allocation18_spill] sm:$0xff]  ;;  %v13509_v55 = vld [vmem:[#allocation21_spill] sm:$0xff] }
 0x2d7   : > { %5583 = vmatpush.msrb.mxu1 %v5582_v0  ;;  %5655 = vmatmul.f32.vlgmr.msrb.gmra.mxu2 %v11558_v21  ;;  %v3462_v40 = vadd.f32 %v11409_v45, %v3353_v47 }
 0x2d8   : > { %5720 = vmatpush.msra.mxu0 %v13491_v60  ;;  %v3312_v43 = vadd.f32 %v11340_v23, %v3271_v31  ;;  %v13508_v60 = vld [vmem:[#allocation6_spill] sm:$0xff] }
 0x2d9   : > { %5589 = vmatpush.msrb.mxu1 %v5588_v6  ;;  %v13503_v6 = vld [vmem:[#allocation8_spill] sm:$0xff] }
 0x2da   : > { %5724 = vmatpush.msra.mxu0 %v13492_v16  ;;  %v3361_v23 = vadd.f32 %v11448_v10, %v3312_v43 }
 0x2db   : > { %5595 = vmatpush.msrb.mxu1 %v5594_v34  ;;  %5496 = vmatmul.f32.gmra.mxu0 %v11689_v28  ;;  %v11709_v1 = vpop.f32.mrf.mxu1 }
 0x2dc   : > { %5597 = vmatmul.f32.vlgmr.msrb.gmra.mxu1 %v11523_v52  ;;  %5728 = vmatpush.msra.mxu0 %v13493_v13  ;;  %v13510_v13 = vld [vmem:[#allocation7_spill] sm:$0xff] }
 0x2dd   : > { %5783 = vmatpush.msra.mxu1 %v11296_v63  ;;  %5705 = vmatmul.f32.gmra.mxu3 %v11656_v12  ;;  %v3520_v63 = vadd.f32 %v11441_v51, %v3462_v40  ;;  %v11714_v0 = vpop.f32.mrf.mxu3  ;;  %v13511_v40 = vand.u32 4294901760, %v11617_v11 }
 0x2de   : > { %5732 = vmatpush.msra.mxu0 %v13494_v39  ;;  %v11720_v45 = vpop.f32.mrf.mxu2 }
 0x2df   : > { %5785 = vmatpush.msra.mxu1 %v11319_v56  ;;  %5660 = vmatmul.f32.gmra.mxu2 %v11623_v19  ;;  %v11723_v56 = vpop.f32.mrf.mxu0  ;;  %v3564_v51 = vadd.f32 %v11422_v53, %v3520_v63  ;;  %v3466_v53 = vadd.f32 %v11479_v7, %v3361_v23  ;;  %v13506_v7 = vld [vmem:[#allocation20_spill] sm:$0xff] }
 0x2e0   : > { %5736 = vmatpush.msra.mxu0 %v13495_v36 }
 0x2e1   : > { %5787 = vmatpush.msra.mxu1 %v11334_v54  ;;  %v13498_v54 = vand.u32 4294901760, %v11512_v49  ;;  %v3639_v61 = vadd.f32 %v11525_v37, %v3564_v51  ;;  %v3525_v37 = vadd.f32 %v13503_v6, %v3466_v53  ;;  %v5443_v53 = vld [vmem:[%s12827_s4 + $0x1c0] sm:$0xff] }
 0x2e2   : > { %5740 = vmatpush.msra.mxu0 %v13496_v58 }
 0x2e3   : > { %5789 = vmatpush.msra.mxu1 %v11355_v22  ;;  %v11734_v27 = vpop.f32.mrf.mxu1  ;;  %v13499_v22 = vand.u32 4294901760, %v11530_v44  ;;  %v3680_v10 = vadd.f32 %v11560_v4, %v3639_v61  ;;  %v13502_v44 = vand.u32 4294901760, %v11572_v33  ;;  %v5449_v4 = vld [vmem:[%s12827_s4 + $0x1f0] sm:$0xff]  ;;  %v5447_v33 = vld [vmem:[%s12827_s4 + $0x1e0] sm:$0xff]  ;;  %v3570_v16 = vadd.f32 %v13508_v60, %v3525_v37 }
 0x2e4   : > { %5601 = vmatmul.f32.gmra.mxu1 %v11597_v25  ;;  %5744 = vmatpush.msra.mxu0 %v13497_v48  ;;  %v11770_v8 = vand.u32 4294901760, %v5449_v4  ;;  %v13512_v48 = vld [vmem:[#allocation31_spill] sm:$0xff] }
 0x2e5   : > { %5791 = vmatpush.msra.mxu1 %v11375_v24  ;;  %v11739_v3 = vpop.f32.mrf.mxu3  ;;  %v13500_v24 = vand.u32 4294901760, %v11544_v41  ;;  %v3725_v46 = vadd.f32 %v11583_v42, %v3680_v10  ;;  %v13505_v41 = vand.u32 4294901760, %v11588_v18  ;;  %v5445_v42 = vld [vmem:[%s12827_s4 + $0x1d0] sm:$0xff]  ;;  %v11772_v18 = vand.u32 4294901760, %v5447_v33 }
 0x2e6   : > { %5748 = vmatpush.msra.mxu0 %v13498_v54  ;;  %v11746_v49 = vpop.f32.mrf.mxu2  ;;  %v11774_v34 = vand.u32 4294901760, %v5445_v42  ;;  %v11784_v50 = vsub.f32 %v5449_v4, %v11770_v8  ;;  %5824 = vmatpush.msra.mxu2 %v11770_v8  ;;  %v3643_v51 = vadd.f32 %v13512_v48, %v3570_v16  ;;  %v5441_v10 = vld [vmem:[%s12827_s4 + $0x1b0] sm:$0xff] }
 0x2e7   : > { %5793 = vmatpush.msra.mxu1 %v11400_v14  ;;  %v13501_v14 = vld [vmem:[#allocation17_spill] sm:$0xff]  ;;  %v3834_v47 = vadd.f32 %v13509_v55, %v3725_v46  ;;  %v11787_v31 = vsub.f32 %v5447_v33, %v11772_v18  ;;  %v11832_v46 = vand.u32 4294901760, %v5443_v53 }
 0x2e8   : > { %5752 = vmatpush.msra.mxu0 %v13499_v22  ;;  %v11790_v36 = vsub.f32 %v5445_v42, %v11774_v34  ;;  %v13057_v11 = vand.u32 4294901760, %v11784_v50  ;;  %5826 = vmatpush.msra.mxu2 %v11772_v18 }
 0x2e9   : > { %5795 = vmatpush.msra.mxu1 %v11416_v35  ;;  %v11754_v35 = vpop.f32.mrf.mxu0  ;;  %v13055_v58 = vand.u32 4294901760, %v11787_v31  ;;  %v3892_v54 = vadd.f32 %v11658_v30, %v3834_v47  ;;  %v13513_v30 = vld [vmem:[#allocation9_spill] sm:$0xff]  ;;  %v11850_v60 = vsub.f32 %v5443_v53, %v11832_v46 }
 0x2ea   : > { %5756 = vmatpush.msra.mxu0 %v13500_v24  ;;  %v13053_v43 = vand.u32 4294901760, %v11790_v36  ;;  %v5875_v22 = vsub.f32 %v11784_v50, %v13057_v11  ;;  %5828 = vmatpush.msra.mxu2 %v11774_v34 }
 0x2eb   : > { %5797 = vmatpush.msra.mxu1 %v13501_v14  ;;  %v11779_v39 = vpop.f32.mrf.mxu1  ;;  %v5881_v61 = vsub.f32 %v11787_v31, %v13055_v58  ;;  %v5439_v14 = vld [vmem:[%s12827_s4 + $0x1a0] sm:$0xff]  ;;  %v13052_v47 = vand.u32 4294901760, %v11850_v60 }
 0x2ec   : > { %5760 = vmatpush.msra.mxu0 %v13502_v44  ;;  %v5887_v24 = vsub.f32 %v11790_v36, %v13053_v43  ;;  %v3936_v44 = vadd.f32 %v11675_v59, %v3892_v54  ;;  %v5876_v6 = vand.u32 4294901760, %v5875_v22  ;;  %v11842_v4 = vand.u32 4294901760, %v5439_v14  ;;  %5830 = vmatpush.msra.mxu2 %v11832_v46 }
 0x2ed   : > { %5799 = vmatpush.msra.mxu1 %v13504_v9  ;;  %v11793_v63 = vpop.f32.mrf.mxu3  ;;  %v5882_v37 = vand.u32 4294901760, %v5881_v61  ;;  %v5893_v22 = vsub.f32 %v11850_v60, %v13052_v47 }
 0x2ee   : > { %5764 = vmatpush.msra.mxu0 %v13505_v41  ;;  %v11804_v23 = vpop.f32.mrf.mxu2  ;;  %v13514_v41 = vld [vmem:[#allocation35_spill] sm:$0xff]  ;;  %v4011_v59 = vadd.f32 %v11687_v26, %v3936_v44  ;;  %5877 = vmatpush.msra.mxu3 %v5876_v6  ;;  %v11861_v26 = vsub.f32 %v5439_v14, %v11842_v4 }
 0x2ef   : > { %5801 = vmatpush.msra.mxu1 %v13506_v7  ;;  %v11840_v7 = vand.u32 4294901760, %v5441_v10 }
 0x2f0   : > { %5768 = vmatpush.msra.mxu0 %v13507_v29  ;;  %v5888_v29 = vand.u32 4294901760, %v5887_v24  ;;  %5883 = vmatpush.msra.mxu3 %v5882_v37  ;;  %v4052_v61 = vadd.f32 %v11682_v38, %v4011_v59  ;;  %v5433_v37 = vld [vmem:[%s12827_s4 + $0x170] sm:$0xff] }
 0x2f1   : > { %5803 = vmatpush.msra.mxu1 %v13510_v13  ;;  %v11858_v16 = vsub.f32 %v5441_v10, %v11840_v7  ;;  %v13515_v13 = vld [vmem:[#allocation34_spill] sm:$0xff]  ;;  %5832 = vmatpush.msra.mxu2 %v11840_v7  ;;  %v5894_v10 = vand.u32 4294901760, %v5893_v22 }
 0x2f2   : > { %5772 = vmatpush.msra.mxu0 %v13511_v40  ;;  %5889 = vmatpush.msra.mxu3 %v5888_v29  ;;  %v4097_v29 = vadd.f32 %v11723_v56, %v4052_v61 }
 0x2f3   : > { %5805 = vmatpush.msra.mxu1 %v11514_v20  ;;  %5774 = vmatmul.f32.vlgmr.msra.gmra.mxu0 %v11523_v52  ;;  %v11807_v20 = vpop.f32.mrf.mxu0  ;;  %v11847_v42 = vpop.f32.mrf.mxu1 }
 0x2f4   : > { %5979 = vmatpush.msrb.mxu0 %v11784_v50  ;;  %5834 = vmatpush.msra.mxu2 %v11842_v4  ;;  %v4206_v56 = vadd.f32 %v11734_v27, %v4097_v29 }
 0x2f5   : > { %5807 = vmatpush.msra.mxu1 %v11539_v15  ;;  %v3684_v15 = vadd.f32 %v11633_v2, %v3643_v51  ;;  %v5437_v2 = vld [vmem:[%s12827_s4 + $0x190] sm:$0xff]  ;;  %v13050_v51 = vand.u32 4294901760, %v11861_v26  ;;  %5895 = vmatpush.msra.mxu3 %v5894_v10 }
 0x2f6   : > { %5982 = vmatpush.msrb.mxu0 %v11787_v31  ;;  %v11844_v33 = vand.u32 4294901760, %v5437_v2  ;;  %v11869_v48 = vpop.f32.mrf.mxu2  ;;  %v5429_v10 = vld [vmem:[%s12827_s4 + $0x150] sm:$0xff] }
 0x2f7   : > { %5809 = vmatpush.msra.mxu1 %v13513_v30  ;;  %v3733_v9 = vadd.f32 %v11646_v62, %v3684_v15  ;;  %v11853_v62 = vpop.f32.mrf.mxu3  ;;  %v5905_v15 = vsub.f32 %v11861_v26, %v13050_v51  ;;  %v5435_v30 = vld [vmem:[%s12827_s4 + $0x180] sm:$0xff] }
 0x2f8   : > { %5985 = vmatpush.msrb.mxu0 %v11790_v36  ;;  %v11864_v55 = vsub.f32 %v5437_v2, %v11844_v33  ;;  %v11897_v14 = vand.u32 4294901760, %v5435_v30  ;;  %5836 = vmatpush.msra.mxu2 %v11844_v33 }
 0x2f9   : > { %5811 = vmatpush.msra.mxu1 %v13514_v41  ;;  %v3838_v40 = vadd.f32 %v13515_v13, %v3733_v9  ;;  %v5906_v2 = vand.u32 4294901760, %v5905_v15  ;;  %v11909_v41 = vand.u32 4294901760, %v5433_v37 }
 0x2fa   : > { %5988 = vmatpush.msrb.mxu0 %v11850_v60  ;;  %v13048_v54 = vand.u32 4294901760, %v11864_v55  ;;  %v11907_v9 = vsub.f32 %v5435_v30, %v11897_v14  ;;  %5838 = vmatpush.msra.mxu2 %v11897_v14 }
 0x2fb   : > { %5813 = vmatpush.msra.mxu1 %v11590_v57  ;;  %5778 = vmatmul.f32.gmra.mxu0 %v11597_v25  ;;  %v13051_v57 = vand.u32 4294901760, %v11858_v16  ;;  %v11892_v53 = vpop.f32.mrf.mxu0  ;;  %v3897_v44 = vadd.f32 %v11696_v5, %v3838_v40  ;;  %v5431_v5 = vld [vmem:[%s12827_s4 + $0x160] sm:$0xff]  ;;  %v11921_v40 = vpop.f32.mrf.mxu1  ;;  %v11926_v15 = vsub.f32 %v5433_v37, %v11909_v41 }
 0x2fc   : > { %5815 = vmatmul.f32.vlgmr.msra.gmra.mxu1 %v11523_v52  ;;  %5991 = vmatpush.msrb.mxu0 %v11858_v16  ;;  %v5911_v38 = vsub.f32 %v11864_v55, %v13048_v54  ;;  %v11919_v13 = vand.u32 4294901760, %v5431_v5 }
 0x2fd   : > { %6037 = vmatpush.msrb.mxu1 %v11770_v8  ;;  %v5899_v24 = vsub.f32 %v11858_v16, %v13051_v57  ;;  %v3942_v59 = vadd.f32 %v11709_v1, %v3897_v44  ;;  %v13047_v27 = vand.u32 4294901760, %v11926_v15  ;;  %v4264_v44 = vadd.f32 %v11746_v49, %v4206_v56  ;;  %5840 = vmatpush.msra.mxu2 %v11909_v41 }
 0x2fe   : > { %5994 = vmatpush.msrb.mxu0 %v11861_v26  ;;  %v5912_v22 = vand.u32 4294901760, %v5911_v38  ;;  %v11935_v30 = vsub.f32 %v5431_v5, %v11919_v13  ;;  %v11944_v38 = vand.u32 4294901760, %v5429_v10 }
 0x2ff   : > { %6039 = vmatpush.msrb.mxu1 %v11772_v18  ;;  %v5900_v6 = vand.u32 4294901760, %v5899_v24  ;;  %v13046_v24 = vand.u32 4294901760, %v11907_v9  ;;  %v4015_v1 = vadd.f32 %v11720_v45, %v3942_v59  ;;  %v11930_v61 = vpop.f32.mrf.mxu3  ;;  %v5923_v49 = vsub.f32 %v11926_v15, %v13047_v27  ;;  %5842 = vmatpush.msra.mxu2 %v11919_v13 }
 0x300   : > { %5997 = vmatpush.msrb.mxu0 %v11864_v55  ;;  %v13049_v37 = vand.u32 4294901760, %v11935_v30  ;;  %v11962_v29 = vsub.f32 %v5429_v10, %v11944_v38 }
 0x301   : > { %6041 = vmatpush.msrb.mxu1 %v11774_v34  ;;  %5901 = vmatpush.msra.mxu3 %v5900_v6  ;;  %v5917_v45 = vsub.f32 %v11907_v9, %v13046_v24  ;;  %v11948_v6 = vpop.f32.mrf.mxu2  ;;  %v4056_v24 = vadd.f32 %v11714_v0, %v4015_v1  ;;  %v5924_v10 = vand.u32 4294901760, %v5923_v49  ;;  %v5423_v0 = vld [vmem:[%s12827_s4 + $0x120] sm:$0xff]  ;;  %v4308_v49 = vadd.f32 %v11739_v3, %v4264_v44  ;;  %v5421_v44 = vld [vmem:[%s12827_s4 + $0x110] sm:$0xff] }
 0x302   : > { %6000 = vmatpush.msrb.mxu0 %v11907_v9  ;;  %v13054_v27 = vand.u32 4294901760, %v11962_v29  ;;  %5844 = vmatpush.msra.mxu2 %v11944_v38 }
 0x303   : > { %6043 = vmatpush.msrb.mxu1 %v11832_v46  ;;  %5907 = vmatpush.msra.mxu3 %v5906_v2  ;;  %v5427_v2 = vld [vmem:[%s12827_s4 + $0x140] sm:$0xff]  ;;  %v11956_v5 = vpop.f32.mrf.mxu0  ;;  %v5918_v59 = vand.u32 4294901760, %v5917_v45  ;;  %v5425_v45 = vld [vmem:[%s12827_s4 + $0x130] sm:$0xff]  ;;  %v11991_v51 = vpop.f32.mrf.mxu1 }
 0x304   : > { %5819 = vmatmul.f32.gmra.mxu1 %v11597_v25  ;;  %6003 = vmatpush.msrb.mxu0 %v11926_v15  ;;  %v11964_v56 = vand.u32 4294901760, %v5427_v2 }
 0x305   : > { %6045 = vmatpush.msrb.mxu1 %v11840_v7  ;;  %5913 = vmatpush.msra.mxu3 %v5912_v22  ;;  %v5929_v22 = vsub.f32 %v11935_v30, %v13049_v37  ;;  %v11986_v37 = vand.u32 4294901760, %v5425_v45 }
 0x306   : > { %6006 = vmatpush.msrb.mxu0 %v11935_v30  ;;  %v11978_v54 = vsub.f32 %v5427_v2, %v11964_v56  ;;  %v5935_v2 = vsub.f32 %v11962_v29, %v13054_v27  ;;  %5846 = vmatpush.msra.mxu2 %v11964_v56 }
 0x307   : > { %6047 = vmatpush.msrb.mxu1 %v11842_v4  ;;  %5919 = vmatpush.msra.mxu3 %v5918_v59  ;;  %v5930_v1 = vand.u32 4294901760, %v5929_v22  ;;  %v11988_v59 = vand.u32 4294901760, %v5423_v0  ;;  %v4105_v22 = vadd.f32 %v11754_v35, %v4056_v24  ;;  %v11999_v47 = vpop.f32.mrf.mxu3  ;;  %v12003_v43 = vsub.f32 %v5425_v45, %v11986_v37 }
 0x308   : > { %6009 = vmatpush.msrb.mxu0 %v11962_v29  ;;  %v13056_v57 = vand.u32 4294901760, %v11978_v54  ;;  %v12015_v24 = vand.u32 4294901760, %v5421_v44  ;;  %5848 = vmatpush.msra.mxu2 %v11986_v37 }
 0x309   : > { %6049 = vmatpush.msrb.mxu1 %v11844_v33  ;;  %5925 = vmatpush.msra.mxu3 %v5924_v10  ;;  %v12007_v3 = vsub.f32 %v5423_v0, %v11988_v59  ;;  %v5936_v10 = vand.u32 4294901760, %v5935_v2  ;;  %v4210_v45 = vadd.f32 %v11779_v39, %v4105_v22  ;;  %v12019_v27 = vpop.f32.mrf.mxu2  ;;  %v13059_v0 = vand.u32 4294901760, %v12003_v43 }
 0x30a   : > { %6012 = vmatpush.msrb.mxu0 %v11978_v54  ;;  %v5941_v35 = vsub.f32 %v11978_v54, %v13056_v57  ;;  %v4383_v2 = vadd.f32 %v11807_v20, %v4308_v49  ;;  %v12030_v39 = vsub.f32 %v5421_v44, %v12015_v24  ;;  %5850 = vmatpush.msra.mxu2 %v11988_v59 }
 0x30b   : > { %6051 = vmatpush.msrb.mxu1 %v11897_v14  ;;  %5931 = vmatpush.msra.mxu3 %v5930_v1  ;;  %v13060_v58 = vand.u32 4294901760, %v12007_v3  ;;  %v5419_v1 = vld [vmem:[%s12827_s4 + $0x100] sm:$0xff]  ;;  %v5947_v11 = vsub.f32 %v12003_v43, %v13059_v0  ;;  %v4269_v20 = vadd.f32 %v11804_v23, %v4210_v45  ;;  %v12045_v44 = vpop.f32.mrf.mxu0  ;;  %v5418_v0 = vld [vmem:[%s12827_s4 + $0xf8] sm:$0xff]  ;;  %v5416_v23 = vld [vmem:[%s12827_s4 + $0xe8] sm:$0xff]  ;;  %v12075_v21 = vpop.f32.mrf.mxu1 }
 0x30c   : > { %6015 = vmatpush.msrb.mxu0 %v12003_v43  ;;  %v5942_v57 = vand.u32 4294901760, %v5941_v35  ;;  %v12032_v22 = vand.u32 4294901760, %v5419_v1  ;;  %v4424_v49 = vadd.f32 %v11847_v42, %v4383_v2  ;;  %5852 = vmatpush.msra.mxu2 %v12015_v24 }
 0x30d   : > { %6053 = vmatpush.msrb.mxu1 %v11909_v41  ;;  %5937 = vmatpush.msra.mxu3 %v5936_v10  ;;  %v5953_v19 = vsub.f32 %v12007_v3, %v13060_v58  ;;  %v13064_v10 = vand.u32 4294901760, %v12030_v39  ;;  %v5948_v45 = vand.u32 4294901760, %v5947_v11  ;;  %v12072_v11 = vand.u32 4294901760, %v5416_v23 }
 0x30e   : > { %6018 = vmatpush.msrb.mxu0 %v12007_v3  ;;  %v12049_v35 = vsub.f32 %v5419_v1, %v12032_v22  ;;  %v4469_v1 = vadd.f32 %v11869_v48, %v4424_v49  ;;  %v4314_v12 = vadd.f32 %v11793_v63, %v4269_v20  ;;  %5854 = vmatpush.msra.mxu2 %v12032_v22 }
 0x30f   : > { %6055 = vmatpush.msrb.mxu1 %v11919_v13  ;;  %5943 = vmatpush.msra.mxu3 %v5942_v57  ;;  %v5954_v42 = vand.u32 4294901760, %v5953_v19  ;;  %v12060_v57 = vand.u32 4294901760, %v5418_v0  ;;  %v5959_v2 = vsub.f32 %v12030_v39, %v13064_v10 }
 0x310   : > { %6021 = vmatpush.msrb.mxu0 %v12030_v39  ;;  %v13063_v58 = vand.u32 4294901760, %v12049_v35  ;;  %v4578_v63 = vadd.f32 %v11853_v62, %v4469_v1  ;;  %v12102_v1 = vsub.f32 %v5416_v23, %v12072_v11 }
 0x311   : > { %6057 = vmatpush.msrb.mxu1 %v11944_v38  ;;  %5949 = vmatpush.msra.mxu3 %v5948_v45  ;;  %v12070_v19 = vsub.f32 %v5418_v0, %v12060_v57  ;;  %v5960_v48 = vand.u32 4294901760, %v5959_v2  ;;  %v12082_v45 = vpop.f32.mrf.mxu3  ;;  %v5414_v2 = vld [vmem:[%s12827_s4 + $0xd8] sm:$0xff]  ;;  %v12093_v10 = vpop.f32.mrf.mxu2 }
 0x312   : > { %v5965_v49 = vsub.f32 %v12049_v35, %v13063_v58  ;;  %6024 = vmatpush.msrb.mxu0 %v12049_v35  ;;  %v13516_v58 = vand.u32 4294901760, %v11784_v50  ;;  %v12099_v62 = vand.u32 4294901760, %v5414_v2  ;;  %v5412_v50 = vld [vmem:[%s12827_s4 + $0xc8] sm:$0xff]  ;;  %v13069_v23 = vand.u32 4294901760, %v12102_v1 }
 0x313   : > { %6059 = vmatpush.msrb.mxu1 %v11964_v56  ;;  %5955 = vmatpush.msra.mxu3 %v5954_v42  ;;  %v13066_v0 = vand.u32 4294901760, %v12070_v19  ;;  %v12105_v17 = vpop.f32.mrf.mxu0  ;;  %v4636_v25 = vadd.f32 %v11956_v5, %v4578_v63  ;;  %v5408_v5 = vld [vmem:[%s12827_s4 + $0xa8] sm:$0xff] }
 0x314   : > { %v5966_v20 = vand.u32 4294901760, %v5965_v49  ;;  %6196 = vmatpush.msra.mxu0 %v12060_v57  ;;  %6084 = vmatpush.msrb.mxu2 %v13516_v58  ;;  %v4387_v49 = vadd.f32 %v11892_v53, %v4314_v12  ;;  %v13517_v58 = vand.u32 4294901760, %v11787_v31  ;;  %v12118_v12 = vsub.f32 %v5414_v2, %v12099_v62  ;;  %v5410_v31 = vld [vmem:[%s12827_s4 + $0xb8] sm:$0xff] }
 0x315   : > { %6061 = vmatpush.msrb.mxu1 %v11986_v37  ;;  %5961 = vmatpush.msra.mxu3 %v5960_v48  ;;  %v6247_v42 = vsub.f32 %v12070_v19, %v13066_v0  ;;  %v12115_v0 = vand.u32 4294901760, %v5412_v50 }
 0x316   : > { %6198 = vmatpush.msra.mxu0 %v12072_v11  ;;  %6088 = vmatpush.msrb.mxu2 %v13517_v58  ;;  %v4428_v53 = vadd.f32 %v11921_v40, %v4387_v49  ;;  %v6258_v2 = vand.u32 4294901760, %v12118_v12  ;;  %v4680_v49 = vadd.f32 %v11991_v51, %v4636_v25  ;;  %v12143_v58 = vpop.f32.mrf.mxu1  ;;  %v13519_v25 = vand.u32 4294901760, %v11850_v60  ;;  %v5406_v51 = vld [vmem:[%s12827_s4 + $0x98] sm:$0xff] }
 0x317   : > { %6063 = vmatpush.msrb.mxu1 %v11988_v59  ;;  %5967 = vmatpush.msra.mxu3 %v5966_v20  ;;  %v6248_v48 = vand.u32 4294901760, %v6247_v42  ;;  %v6253_v20 = vsub.f32 %v12102_v1, %v13069_v23  ;;  %v12131_v42 = vand.u32 4294901760, %v5410_v31  ;;  %v12134_v40 = vsub.f32 %v5412_v50, %v12115_v0 }
 0x318   : > { %6200 = vmatpush.msra.mxu0 %v12099_v62  ;;  %v4477_v63 = vadd.f32 %v11948_v6, %v4428_v53 }
 0x319   : > { %6065 = vmatpush.msrb.mxu1 %v12015_v24  ;;  %6155 = vmatpush.msrb.mxu3 %v11770_v8  ;;  %v13518_v8 = vand.u32 4294901760, %v11790_v36  ;;  %v6254_v36 = vand.u32 4294901760, %v6253_v20  ;;  %v13074_v23 = vand.u32 4294901760, %v12134_v40  ;;  %v12156_v6 = vsub.f32 %v5410_v31, %v12131_v42 }
 0x31a   : > { %6202 = vmatpush.msra.mxu0 %v12115_v0 }
 0x31b   : > { %6067 = vmatpush.msrb.mxu1 %v12032_v22  ;;  %6092 = vmatpush.msrb.mxu2 %v13518_v8  ;;  %v6259_v8 = vsub.f32 %v12118_v12, %v6258_v2  ;;  %v6265_v31 = vsub.f32 %v12134_v40, %v13074_v23  ;;  %v13070_v60 = vand.u32 4294901760, %v12156_v6 }
 0x31c   : > { %6157 = vmatpush.msrb.mxu3 %v11772_v18  ;;  %v4755_v18 = vadd.f32 %v12019_v27, %v4680_v49  ;;  %6204 = vmatpush.msra.mxu0 %v12131_v42  ;;  %v4582_v27 = vadd.f32 %v11930_v61, %v4477_v63  ;;  %v12196_v63 = vpop.f32.mrf.mxu0 }
 0x31d   : > { %6249 = vmatpush.msra.mxu1 %v6248_v48  ;;  %v12147_v48 = vand.u32 4294901760, %v5408_v5  ;;  %6096 = vmatpush.msrb.mxu2 %v13519_v25  ;;  %v6260_v20 = vand.u32 4294901760, %v6259_v8  ;;  %v12172_v25 = vand.u32 4294901760, %v5406_v51  ;;  %v6266_v8 = vand.u32 4294901760, %v6265_v31  ;;  %v5402_v31 = vld [vmem:[%s12827_s4 + $0x78] sm:$0xff] }
 0x31e   : > { %6159 = vmatpush.msrb.mxu3 %v11774_v34  ;;  %v13520_v34 = vand.u32 4294901760, %v11858_v16  ;;  %v6271_v16 = vsub.f32 %v12156_v6, %v13070_v60 }
 0x31f   : > { %v12149_v50 = vpop.f32.mrf.mxu3  ;;  %6255 = vmatpush.msra.mxu1 %v6254_v36  ;;  %6206 = vmatpush.msra.mxu0 %v12147_v48  ;;  %v12180_v49 = vsub.f32 %v5408_v5, %v12147_v48  ;;  %v5404_v36 = vld [vmem:[%s12827_s4 + $0x88] sm:$0xff]  ;;  %v12191_v61 = vsub.f32 %v5406_v51, %v12172_v25  ;;  %v4796_v5 = vadd.f32 %v11999_v47, %v4755_v18  ;;  %v13522_v18 = vand.u32 4294901760, %v11864_v55 }
 0x320   : > { %6100 = vmatpush.msrb.mxu2 %v13520_v34  ;;  %6161 = vmatpush.msrb.mxu3 %v11832_v46  ;;  %v12188_v34 = vand.u32 4294901760, %v5404_v36  ;;  %v13521_v46 = vand.u32 4294901760, %v11861_v26  ;;  %v6272_v51 = vand.u32 4294901760, %v6271_v16  ;;  %v12205_v26 = vand.u32 4294901760, %v5402_v31 }
 0x321   : > { %v12166_v53 = vpop.f32.mrf.mxu2  ;;  %6261 = vmatpush.msra.mxu1 %v6260_v20  ;;  %6208 = vmatpush.msra.mxu0 %v12172_v25  ;;  %v13072_v20 = vand.u32 4294901760, %v12180_v49  ;;  %v13071_v60 = vand.u32 4294901760, %v12191_v61  ;;  %v4841_v16 = vadd.f32 %v12105_v17, %v4796_v5 }
 0x322   : > { %6104 = vmatpush.msrb.mxu2 %v13521_v46  ;;  %6163 = vmatpush.msrb.mxu3 %v11840_v7  ;;  %v12208_v47 = vsub.f32 %v5404_v36, %v12188_v34  ;;  %v4641_v7 = vadd.f32 %v12045_v44, %v4582_v27 }
 0x323   : > { %6267 = vmatpush.msra.mxu1 %v6266_v8  ;;  %v6277_v46 = vsub.f32 %v12180_v49, %v13072_v20  ;;  %6210 = vmatpush.msra.mxu0 %v12188_v34  ;;  %v5400_v8 = vld [vmem:[%s12827_s4 + $0x68] sm:$0xff]  ;;  %v6283_v55 = vsub.f32 %v12191_v61, %v13071_v60  ;;  %v12236_v60 = vsub.f32 %v5402_v31, %v12205_v26  ;;  %v5398_v20 = vld [vmem:[%s12827_s4 + $0x58] sm:$0xff]  ;;  %v13524_v31 = vand.u32 4294901760, %v11926_v15 }
 0x324   : > { %6108 = vmatpush.msrb.mxu2 %v13522_v18  ;;  %6165 = vmatpush.msrb.mxu3 %v11842_v4  ;;  %v13073_v36 = vand.u32 4294901760, %v12208_v47  ;;  %v12225_v44 = vand.u32 4294901760, %v5400_v8  ;;  %v13523_v4 = vand.u32 4294901760, %v11907_v9  ;;  %v4686_v27 = vadd.f32 %v12075_v21, %v4641_v7  ;;  %v12231_v18 = vpop.f32.mrf.mxu1 }
 0x325   : > { %6273 = vmatpush.msra.mxu1 %v6272_v51  ;;  %v6278_v51 = vand.u32 4294901760, %v6277_v46  ;;  %6212 = vmatpush.msra.mxu0 %v12205_v26  ;;  %v6284_v21 = vand.u32 4294901760, %v6283_v55  ;;  %v4950_v46 = vadd.f32 %v12143_v58, %v4841_v16  ;;  %v6294_v55 = vand.u32 4294901760, %v12236_v60 }
 0x326   : > { %6112 = vmatpush.msrb.mxu2 %v13523_v4  ;;  %6167 = vmatpush.msrb.mxu3 %v11844_v33  ;;  %v6289_v17 = vsub.f32 %v12208_v47, %v13073_v36  ;;  %v12248_v33 = vand.u32 4294901760, %v5398_v20  ;;  %v12251_v5 = vsub.f32 %v5400_v8, %v12225_v44  ;;  %v4759_v7 = vadd.f32 %v12093_v10, %v4686_v27  ;;  %v5396_v36 = vld [vmem:[%s12827_s4 + $0x48] sm:$0xff] }
 0x327   : > { %v12241_v9 = vpop.f32.mrf.mxu3  ;;  %6279 = vmatpush.msra.mxu1 %v6278_v51  ;;  %6214 = vmatpush.msra.mxu0 %v12225_v44  ;;  %v12264_v15 = vand.u32 4294901760, %v5396_v36  ;;  %v13525_v10 = vand.u32 4294901760, %v11935_v30  ;;  %v5008_v58 = vadd.f32 %v12166_v53, %v4950_v46  ;;  %v6295_v27 = vsub.f32 %v12236_v60, %v6294_v55  ;;  %v5394_v51 = vld [vmem:[%s12827_s4 + $0x38] sm:$0xff]  ;;  %v5392_v46 = vld [vmem:[%s12827_s4 + $0x28] sm:$0xff] }
 0x328   : > { %6116 = vmatpush.msrb.mxu2 %v13524_v31  ;;  %6169 = vmatpush.msrb.mxu3 %v11897_v14  ;;  %v6290_v23 = vand.u32 4294901760, %v6289_v17  ;;  %v13075_v8 = vand.u32 4294901760, %v12251_v5  ;;  %v5126_v14 = vpop.f32.mrf.mxu0  ;;  %v12274_v16 = vsub.f32 %v5398_v20, %v12248_v33  ;;  %v12283_v53 = vand.u32 4294901760, %v5394_v51 }
 0x329   : > { %v12243_v4 = vpop.f32.mrf.mxu2  ;;  %6285 = vmatpush.msra.mxu1 %v6284_v21  ;;  %6216 = vmatpush.msra.mxu0 %v12248_v33  ;;  %v13526_v21 = vand.u32 4294901760, %v11962_v29  ;;  %v4800_v20 = vadd.f32 %v12082_v45, %v4759_v7  ;;  %v6296_v17 = vand.u32 4294901760, %v6295_v27  ;;  %v5052_v45 = vadd.f32 %v12149_v50, %v5008_v58  ;;  %v5390_v27 = vld [vmem:[%s12827_s4 + $0x18] sm:$0xff] }
 0x32a   : > { %6120 = vmatpush.msrb.mxu2 %v13525_v10  ;;  %6171 = vmatpush.msrb.mxu3 %v11909_v41  ;;  %v6301_v30 = vsub.f32 %v12251_v5, %v13075_v8  ;;  %v12286_v41 = vsub.f32 %v5396_v36, %v12264_v15  ;;  %v13077_v31 = vand.u32 4294901760, %v12274_v16  ;;  %v12298_v8 = vand.u32 4294901760, %v5392_v46 }
 0x32b   : > { %6291 = vmatpush.msra.mxu1 %v6290_v23  ;;  %6218 = vmatpush.msra.mxu0 %v12264_v15  ;;  %v12301_v29 = vsub.f32 %v5394_v51, %v12283_v53  ;;  %v12318_v58 = vand.u32 4294901760, %v5390_v27  ;;  %v13528_v51 = vand.u32 4294901760, %v12003_v43 }
 0x32c   : > { %6124 = vmatpush.msrb.mxu2 %v13526_v21  ;;  %6173 = vmatpush.msrb.mxu3 %v11919_v13  ;;  %v6302_v10 = vand.u32 4294901760, %v6301_v30  ;;  %v13076_v36 = vand.u32 4294901760, %v12286_v41  ;;  %v13527_v13 = vand.u32 4294901760, %v11978_v54  ;;  %v6307_v7 = vsub.f32 %v12274_v16, %v13077_v31 }
 0x32d   : > { %6297 = vmatpush.msra.mxu1 %v6296_v17  ;;  %6220 = vmatpush.msra.mxu0 %v12283_v53  ;;  %v13078_v50 = vand.u32 4294901760, %v12301_v29  ;;  %v4849_v30 = vadd.f32 %v12196_v63, %v4800_v20 }
 0x32e   : > { %6128 = vmatpush.msrb.mxu2 %v13527_v13  ;;  %6175 = vmatpush.msrb.mxu3 %v11944_v38  ;;  %v6313_v54 = vsub.f32 %v12286_v41, %v13076_v36  ;;  %v12321_v38 = vsub.f32 %v5392_v46, %v12298_v8  ;;  %v6308_v17 = vand.u32 4294901760, %v6307_v7  ;;  %v5388_v13 = vld [vmem:[%s12827_s4 + $0x8] sm:$0xff]  ;;  %v5127_v7 = vadd.f32 %v5126_v14, %v5052_v45 }
 0x32f   : > { %v5167_v23 = vpop.f32.mrf.mxu1  ;;  %6303 = vmatpush.msra.mxu1 %v6302_v10  ;;  %v5237_v36 = vpop.f32.mrf.mxu3  ;;  %6222 = vmatpush.msra.mxu0 %v12298_v8  ;;  %v6319_v43 = vsub.f32 %v12301_v29, %v13078_v50  ;;  %v12335_v63 = vand.u32 4294901760, %v5388_v13  ;;  %v4954_v20 = vadd.f32 %v12231_v18, %v4849_v30  ;;  %v12342_v10 = vsub.f32 %v5390_v27, %v12318_v58 }
 0x330   : > { %6132 = vmatpush.msrb.mxu2 %v13528_v51  ;;  %6177 = vmatpush.msrb.mxu3 %v11964_v56  ;;  %v6314_v31 = vand.u32 4294901760, %v6313_v54  ;;  %v13081_v46 = vand.u32 4294901760, %v12321_v38  ;;  %v13529_v56 = vand.u32 4294901760, %v12007_v3  ;;  %v13530_v3 = vand.u32 4294901760, %v12030_v39  ;;  %v5130_v18 = vpop.f32.mrf.mxu0 }
 0x331   : > { %v5198_v21 = vpop.f32.mrf.mxu2  ;;  %6309 = vmatpush.msra.mxu1 %v6308_v17  ;;  %v6320_v54 = vand.u32 4294901760, %v6319_v43  ;;  %6224 = vmatpush.msra.mxu0 %v12318_v58  ;;  %v12349_v50 = vsub.f32 %v5388_v13, %v12335_v63  ;;  %v5013_v14 = vadd.f32 %v12243_v4, %v4954_v20  ;;  %v5168_v45 = vadd.f32 %v5167_v23, %v5127_v7 }
 0x332   : > { %6136 = vmatpush.msrb.mxu2 %v13529_v56  ;;  %6179 = vmatpush.msrb.mxu3 %v11986_v37  ;;  %v6325_v51 = vsub.f32 %v12321_v38, %v13081_v46  ;;  %v13080_v37 = vand.u32 4294901760, %v12342_v10  ;;  %v13531_v17 = vand.u32 4294901760, %v12049_v35 }
 0x333   : > { %6315 = vmatpush.msra.mxu1 %v6314_v31  ;;  %6226 = vmatpush.msra.mxu0 %v12335_v63  ;;  %v13079_v30 = vand.u32 4294901760, %v12349_v50  ;;  %v5058_v23 = vadd.f32 %v12241_v9, %v5013_v14  ;;  %v5199_v35 = vadd.f32 %v5198_v21, %v5168_v45  ;;  %v7135_v9 = vld [vmem:[%s12826_s3] sm:$0x3] }
 0x334   : > { %6140 = vmatpush.msrb.mxu2 %v13530_v3  ;;  %6181 = vmatpush.msrb.mxu3 %v11988_v59  ;;  %v6326_v27 = vand.u32 4294901760, %v6325_v51  ;;  %v6331_v59 = vsub.f32 %v12342_v10, %v13080_v37  ;;  %v5372_v21 = vperm.slane %v7135_v9, 1  ;;  %v13532_v45 = vld [vmem:[#allocation5_spill] sm:$0xff]  ;;  %v13534_v9 = vand.u32 4294901760, %v12102_v1 }
 0x335   : > { %6321 = vmatpush.msra.mxu1 %v6320_v54  ;;  %v6337_v39 = vsub.f32 %v12349_v50, %v13079_v30  ;;  %v5131_v56 = vadd.f32 %v5130_v18, %v5058_v23  ;;  %v5238_v20 = vadd.f32 %v5237_v36, %v5199_v35 }
 0x336   : > { %6144 = vmatpush.msrb.mxu2 %v13531_v17  ;;  %6183 = vmatpush.msrb.mxu3 %v12015_v24  ;;  %v6332_v31 = vand.u32 4294901760, %v6331_v59 }
 0x337   : > { %6327 = vmatpush.msra.mxu1 %v6326_v27  ;;  %v6338_v13 = vand.u32 4294901760, %v6337_v39 }
 0x338   : > { %6185 = vmatpush.msrb.mxu3 %v12032_v22 }
 0x339   : > { %6333 = vmatpush.msra.mxu1 %v6332_v31  ;;  %v5267_v7 = vpop.f32.mrf.mxu0 }
 0x33a   : > { %v5171_v4 = vpop.f32.mrf.mxu1  ;;  %v5241_v24 = vpop.f32.mrf.mxu3  ;;  %v5268_v51 = vadd.f32 %v5267_v7, %v5238_v20 }
 0x33b   : > { %6339 = vmatpush.msra.mxu1 %v6338_v13  ;;  %v5172_v54 = vadd.f32 %v5171_v4, %v5131_v56 }
 0x33c   : > { %v5206_v43 = vpop.f32.mrf.mxu2 }
 0x33d   : > { %v5207_v17 = vadd.f32 %v5206_v43, %v5172_v54 }
 0x33f   : > { %v5242_v59 = vadd.f32 %v5241_v24, %v5207_v17 }
 0x343   : > { %v5272_v14 = vpop.f32.mrf.mxu0 }
 0x344   : > { %v5297_v3 = vpop.f32.mrf.mxu1  ;;  %v5357_v22 = vpop.f32.mrf.mxu3  ;;  %v5273_v36 = vadd.f32 %v5272_v14, %v5242_v59 }
 0x345   : > { %v5298_v30 = vadd.f32 %v5297_v3, %v5268_v51  ;;  %v13533_v51 = vand.u32 4294901760, %v12070_v19 }
 0x346   : > { %v5330_v37 = vpop.f32.mrf.mxu2 }
 0x347   : > { %v5331_v27 = vadd.f32 %v5330_v37, %v5298_v30 }
 0x349   : > { %v5358_v46 = vadd.f32 %v5357_v22, %v5331_v27 }
 0x34b   : > { %v5366_v18 = vmul.f32 %v13532_v45, %v5358_v46 }
 0x34d   : > { %v5376_v39 = vadd.f32 %v5372_v21, %v5366_v18 }
 0x34e   : > { %v5303_v4 = vpop.f32.mrf.mxu1  ;;  %v5361_v43 = vpop.f32.mrf.mxu3 }
 0x34f   : > { %v5380_v31 = vmul.f32 0.2, %v5376_v39  ;;  %v5304_v23 = vadd.f32 %v5303_v4, %v5273_v36 }
 0x350   : > { %v5334_v35 = vpop.f32.mrf.mxu2  ;;  %v5489_v46 = vpop.f32.mrf.mxu0 }
 0x351   : > { %v5384_v13 = vmax.f32 %v5376_v39, %v5380_v31  ;;  %v5335_v56 = vadd.f32 %v5334_v35, %v5304_v23  ;;  %v13536_v35 = vand.u32 4294901760, %v12156_v6 }
 0x353   : > { %v12373_v37 = vand.u32 4294901760, %v5384_v13  ;;  %v5362_v30 = vadd.f32 %v5361_v43, %v5335_v56  ;;  %v5450_v43 = vld [vmem:[%s12827_s4 + $0x1f8] sm:$0xff] }
 0x355   : > { %v12376_v24 = vsub.f32 %v5384_v13, %v12373_v37  ;;  %v5368_v20 = vmul.f32 %v13532_v45, %v5362_v30  ;;  %5969 = vmatmul.f32.vlgmr.msra.gmra.mxu3 %v12373_v37  ;;  %v13537_v13 = vand.u32 4294901760, %v12180_v49 }
 0x356   : > { %6409 = vmatpush.msra.mxu3 %v12060_v57 }
 0x357   : > { %v5378_v7 = vadd.f32 %v5372_v21, %v5368_v20  ;;  %6027 = vmatmul.f32.vlgmr.msrb.gmra.mxu0 %v12376_v24  ;;  %v12383_v54 = vand.u32 4294901760, %v12376_v24  ;;  %v12445_v20 = vand.u32 4294901760, %v5450_v43 }
 0x358   : > { %6411 = vmatpush.msra.mxu3 %v12072_v11  ;;  %6456 = vmatpush.msrb.mxu0 %v13533_v51  ;;  %v5700_v14 = vpop.f32.mrf.mxu3  ;;  %v13541_v51 = vand.u32 4294901760, %v12274_v16 }
 0x359   : > { %v5382_v3 = vmul.f32 0.2, %v5378_v7  ;;  %v5598_v17 = vpop.f32.mrf.mxu1  ;;  %6071 = vmatmul.f32.vlgmr.msrb.gmra.mxu1 %v12383_v54  ;;  %v5858_v22 = vsub.f32 %v12376_v24, %v12383_v54 }
 0x35a   : > { %v5599_v27 = vadd.f32 %v5598_v17, %v5489_v46  ;;  %v5656_v59 = vpop.f32.mrf.mxu2  ;;  %6413 = vmatpush.msra.mxu3 %v12099_v62  ;;  %6460 = vmatpush.msrb.mxu0 %v13534_v9  ;;  %v5446_v46 = vld [vmem:[%s12827_s4 + $0x1d8] sm:$0xff] }
 0x35b   : > { %v5386_v21 = vmax.f32 %v5378_v7, %v5382_v3  ;;  %6527 = vmatpush.msrb.mxu1 %v12060_v57  ;;  %v12395_v45 = vand.u32 4294901760, %v5858_v22  ;;  %v13535_v57 = vand.u32 4294901760, %v12134_v40 }
 0x35c   : > { %v5657_v18 = vadd.f32 %v5656_v59, %v5599_v27  ;;  %6415 = vmatpush.msra.mxu3 %v12115_v0  ;;  %6464 = vmatpush.msrb.mxu0 %v6258_v2 }
 0x35d   : > { %v12400_v36 = vand.u32 4294901760, %v5386_v21  ;;  %6529 = vmatpush.msrb.mxu1 %v12072_v11  ;;  %5860 = vmatmul.f32.vlgmr.msra.gmra.mxu2 %v12395_v45  ;;  %v5497_v11 = vpop.f32.mrf.mxu0 }
 0x35e   : > { %6351 = vmatpush.msra.mxu2 %v12070_v19  ;;  %6417 = vmatpush.msra.mxu3 %v12131_v42  ;;  %v12406_v39 = vadd.f32 %v5700_v14, %v5657_v18  ;;  %v13543_v14 = vand.u32 4294901760, %v12301_v29 }
 0x35f   : > { %5973 = vmatmul.f32.gmra.mxu3 %v12400_v36  ;;  %6468 = vmatpush.msrb.mxu0 %v13535_v57  ;;  %v12412_v4 = vsub.f32 %v5386_v21, %v12400_v36 }
 0x360   : > { %6531 = vmatpush.msrb.mxu1 %v12099_v62  ;;  %6354 = vmatpush.msra.mxu2 %v12102_v1  ;;  %v5706_v56 = vpop.f32.mrf.mxu3 }
 0x361   : > { %v5602_v2 = vpop.f32.mrf.mxu1  ;;  %6032 = vmatmul.f32.gmra.mxu0 %v12412_v4  ;;  %6419 = vmatpush.msra.mxu3 %v12147_v48  ;;  %v12419_v19 = vand.u32 4294901760, %v12412_v4 }
 0x362   : > { %v5603_v31 = vadd.f32 %v5602_v2, %v5497_v11  ;;  %v5661_v23 = vpop.f32.mrf.mxu2  ;;  %6472 = vmatpush.msrb.mxu0 %v13536_v35  ;;  %6533 = vmatpush.msrb.mxu1 %v12115_v0  ;;  %v5434_v35 = vld [vmem:[%s12827_s4 + $0x178] sm:$0xff] }
 0x363   : > { %6077 = vmatmul.f32.gmra.mxu1 %v12419_v19  ;;  %6357 = vmatpush.msra.mxu2 %v12118_v12  ;;  %v5866_v62 = vsub.f32 %v12412_v4, %v12419_v19  ;;  %v13538_v12 = vand.u32 4294901760, %v12191_v61 }
 0x364   : > { %v5662_v1 = vadd.f32 %v5661_v23, %v5603_v31  ;;  %6421 = vmatpush.msra.mxu3 %v12172_v25  ;;  %6476 = vmatpush.msrb.mxu0 %v13537_v13  ;;  %v5432_v13 = vld [vmem:[%s12827_s4 + $0x168] sm:$0xff] }
 0x365   : > { %6535 = vmatpush.msrb.mxu1 %v12131_v42  ;;  %6360 = vmatpush.msra.mxu2 %v12134_v40  ;;  %v12436_v0 = vand.u32 4294901760, %v5866_v62  ;;  %v5448_v42 = vld [vmem:[%s12827_s4 + $0x1e8] sm:$0xff]  ;;  %v13539_v40 = vand.u32 4294901760, %v12208_v47 }
 0x366   : > { %6423 = vmatpush.msra.mxu3 %v12188_v34  ;;  %6480 = vmatpush.msrb.mxu0 %v13538_v12  ;;  %v12441_v30 = vadd.f32 %v5706_v56, %v5662_v1  ;;  %v12575_v56 = vand.u32 4294901760, %v5434_v35 }
 0x367   : > { %6537 = vmatpush.msrb.mxu1 %v12147_v48  ;;  %5868 = vmatmul.f32.gmra.mxu2 %v12436_v0  ;;  %v12457_v48 = vand.u32 4294901760, %v5448_v42 }
 0x368   : > { %6187 = vmatmul.f32.vlgmr.msrb.gmra.mxu3 %v12373_v37  ;;  %6363 = vmatpush.msra.mxu2 %v12156_v6  ;;  %v12465_v6 = vsub.f32 %v5450_v43, %v12445_v20  ;;  %v13547_v43 = vld [vmem:[#allocation23_spill] sm:$0xff] }
 0x369   : > { %6425 = vmatpush.msra.mxu3 %v12205_v26  ;;  %6484 = vmatpush.msrb.mxu0 %v13539_v40  ;;  %v12481_v7 = vsub.f32 %v5448_v42, %v12457_v48 }
 0x36a   : > { %6539 = vmatpush.msrb.mxu1 %v12172_v25  ;;  %6232 = vmatmul.f32.vlgmr.msra.gmra.mxu0 %v11650_v32  ;;  %v5444_v32 = vld [vmem:[%s12827_s4 + $0x1c8] sm:$0xff]  ;;  %v12475_v25 = vand.u32 4294901760, %v5446_v46 }
 0x36b   : > { %6366 = vmatpush.msra.mxu2 %v12180_v49  ;;  %6427 = vmatpush.msra.mxu3 %v12225_v44  ;;  %v13540_v49 = vand.u32 4294901760, %v12251_v5 }
 0x36c   : > { %6488 = vmatpush.msrb.mxu0 %v6294_v55  ;;  %6541 = vmatpush.msrb.mxu1 %v12188_v34  ;;  %v5442_v34 = vld [vmem:[%s12827_s4 + $0x1b8] sm:$0xff]  ;;  %v12489_v55 = vand.u32 4294901760, %v5444_v32  ;;  %v12497_v3 = vsub.f32 %v5446_v46, %v12475_v25 }
 0x36d   : > { %6341 = vmatmul.f32.vlgmr.msra.gmra.mxu1 %v11523_v52  ;;  %6369 = vmatpush.msra.mxu2 %v12191_v61  ;;  %v6618_v61 = vand.u32 4294901760, %v12465_v6  ;;  %v12499_v17 = vand.u32 4294901760, %v5442_v34 }
 0x36e   : > { %6429 = vmatpush.msra.mxu3 %v12248_v33  ;;  %6492 = vmatpush.msrb.mxu0 %v13540_v49  ;;  %v12514_v27 = vsub.f32 %v5444_v32, %v12489_v55  ;;  %v6630_v59 = vand.u32 4294901760, %v12497_v3  ;;  %v5430_v32 = vld [vmem:[%s12827_s4 + $0x158] sm:$0xff] }
 0x36f   : > { %6543 = vmatpush.msrb.mxu1 %v12205_v26  ;;  %6372 = vmatpush.msra.mxu2 %v12208_v47  ;;  %v6624_v26 = vand.u32 4294901760, %v12481_v7  ;;  %v5440_v47 = vld [vmem:[%s12827_s4 + $0x1a8] sm:$0xff]  ;;  %v6619_v22 = vsub.f32 %v12465_v6, %v6618_v61  ;;  %v12525_v9 = vsub.f32 %v5442_v34, %v12499_v17 }
 0x370   : > { %6431 = vmatpush.msra.mxu3 %v12264_v15  ;;  %6496 = vmatpush.msrb.mxu0 %v13541_v51  ;;  %v12527_v21 = vand.u32 4294901760, %v5440_v47  ;;  %v6636_v57 = vand.u32 4294901760, %v12514_v27  ;;  %v6631_v2 = vsub.f32 %v12497_v3, %v6630_v59  ;;  %v5428_v51 = vld [vmem:[%s12827_s4 + $0x148] sm:$0xff] }
 0x371   : > { %6545 = vmatpush.msrb.mxu1 %v12225_v44  ;;  %6146 = vmatmul.f32.vlgmr.msrb.gmra.mxu2 %v12373_v37  ;;  %v13542_v44 = vand.u32 4294901760, %v12286_v41  ;;  %v6620_v18 = vand.u32 4294901760, %v6619_v22 }
 0x372   : > { %6191 = vmatmul.f32.gmra.mxu3 %v12400_v36  ;;  %6375 = vmatpush.msra.mxu2 %v12236_v60  ;;  %v5438_v60 = vld [vmem:[%s12827_s4 + $0x198] sm:$0xff]  ;;  %v12553_v31 = vsub.f32 %v5440_v47, %v12527_v21  ;;  %v6637_v62 = vsub.f32 %v12514_v27, %v6636_v57  ;;  %v6632_v12 = vand.u32 4294901760, %v6631_v2  ;;  %v12604_v47 = vand.u32 4294901760, %v5430_v32 }
 0x373   : > { %6433 = vmatpush.msra.mxu3 %v12283_v53  ;;  %6500 = vmatpush.msrb.mxu0 %v13542_v44  ;;  %v12541_v11 = vand.u32 4294901760, %v5438_v60 }
 0x374   : > { %6547 = vmatpush.msrb.mxu1 %v12248_v33  ;;  %6240 = vmatmul.f32.gmra.mxu0 %v11689_v28  ;;  %v6625_v28 = vsub.f32 %v12481_v7, %v6624_v26  ;;  %v5436_v33 = vld [vmem:[%s12827_s4 + $0x188] sm:$0xff]  ;;  %v6648_v40 = vand.u32 4294901760, %v12553_v31  ;;  %v6638_v49 = vand.u32 4294901760, %v6637_v62  ;;  %v13549_v62 = vld [vmem:[#allocation32_spill] sm:$0xff] }
 0x375   : > { %6378 = vmatpush.msra.mxu2 %v12251_v5  ;;  %6435 = vmatpush.msra.mxu3 %v12298_v8  ;;  %v13544_v5 = vld [vmem:[#allocation29_spill] sm:$0xff]  ;;  %v12555_v23 = vand.u32 4294901760, %v5436_v33  ;;  %v12568_v1 = vsub.f32 %v5438_v60, %v12541_v11  ;;  %v5426_v60 = vld [vmem:[%s12827_s4 + $0x138] sm:$0xff] }
 0x376   : > { %6504 = vmatpush.msrb.mxu0 %v13543_v14  ;;  %6549 = vmatpush.msrb.mxu1 %v12264_v15  ;;  %v13545_v15 = vand.u32 4294901760, %v12321_v38  ;;  %v6649_v44 = vsub.f32 %v12553_v31, %v6648_v40  ;;  %v12619_v14 = vand.u32 4294901760, %v5428_v51 }
 0x377   : > { %6345 = vmatmul.f32.gmra.mxu1 %v13544_v5  ;;  %6381 = vmatpush.msra.mxu2 %v12274_v16  ;;  %v6642_v16 = vand.u32 4294901760, %v12525_v9  ;;  %v12585_v46 = vsub.f32 %v5436_v33, %v12555_v23  ;;  %v6654_v34 = vand.u32 4294901760, %v12568_v1  ;;  %v5424_v33 = vld [vmem:[%s12827_s4 + $0x128] sm:$0xff] }
 0x378   : > { %6437 = vmatpush.msra.mxu3 %v12318_v58  ;;  %6508 = vmatpush.msrb.mxu0 %v13545_v15  ;;  %v12634_v15 = vand.u32 4294901760, %v5426_v60 }
 0x379   : > { %6551 = vmatpush.msrb.mxu1 %v12283_v53  ;;  %6384 = vmatpush.msra.mxu2 %v12286_v41  ;;  %v13546_v53 = vand.u32 4294901760, %v12342_v10  ;;  %v6626_v41 = vand.u32 4294901760, %v6625_v28  ;;  %v6643_v42 = vsub.f32 %v12525_v9, %v6642_v16  ;;  %v6660_v22 = vand.u32 4294901760, %v12585_v46 }
 0x37a   : > { %6439 = vmatpush.msra.mxu3 %v12335_v63  ;;  %6150 = vmatmul.f32.gmra.mxu2 %v12400_v36  ;;  %v6655_v28 = vsub.f32 %v12568_v1, %v6654_v34 }
 0x37b   : > { %6512 = vmatpush.msrb.mxu0 %v13546_v53  ;;  %6553 = vmatpush.msrb.mxu1 %v12298_v8  ;;  %v13548_v8 = vand.u32 4294901760, %v12349_v50  ;;  %v6661_v2 = vsub.f32 %v12585_v46, %v6660_v22 }
 0x37c   : > { %6621 = vmatpush.msrb.mxu3 %v6620_v18  ;;  %6387 = vmatpush.msra.mxu2 %v12301_v29  ;;  %v12591_v29 = vand.u32 4294901760, %v5432_v13  ;;  %v12632_v18 = vsub.f32 %v5430_v32, %v12604_v47  ;;  %v12663_v32 = vsub.f32 %v5426_v60, %v12634_v15 }
 0x37d   : > { %6443 = vmatmul.f32.vlgmr.msra.gmra.mxu3 %v13547_v43  ;;  %6516 = vmatpush.msrb.mxu0 %v13548_v8  ;;  %v5420_v43 = vld [vmem:[%s12827_s4 + $0x108] sm:$0xff]  ;;  %v13550_v8 = vld [vmem:[#allocation41_spill] sm:$0xff] }
 0x37e   : > { %6555 = vmatpush.msrb.mxu1 %v12318_v58  ;;  %6627 = vmatpush.msrb.mxu3 %v6626_v41  ;;  %v12602_v58 = vsub.f32 %v5434_v35, %v12575_v56  ;;  %v5422_v35 = vld [vmem:[%s12827_s4 + $0x118] sm:$0xff]  ;;  %v12647_v41 = vsub.f32 %v5428_v51, %v12619_v14  ;;  %v6662_v51 = vand.u32 4294901760, %v6661_v2  ;;  %v12677_v60 = vand.u32 4294901760, %v5420_v43 }
 0x37f   : > { %6723 = vmatpush.msra.mxu0 %v12465_v6  ;;  %6390 = vmatpush.msra.mxu2 %v12321_v38  ;;  %v6644_v38 = vand.u32 4294901760, %v6643_v42  ;;  %v13082_v42 = vand.u32 4294901760, %v12632_v18 }
 0x380   : > { %6518 = vmatmul.f32.vlgmr.msrb.gmra.mxu0 %v11523_v52  ;;  %6557 = vmatpush.msrb.mxu1 %v12335_v63  ;;  %v12617_v63 = vsub.f32 %v5432_v13, %v12591_v29  ;;  %v6656_v13 = vand.u32 4294901760, %v6655_v28 }
 0x381   : > { %6633 = vmatpush.msrb.mxu3 %v6632_v12  ;;  %6726 = vmatpush.msra.mxu0 %v12481_v7  ;;  %v6679_v2 = vsub.f32 %v12632_v18, %v13082_v42  ;;  %v12697_v42 = vsub.f32 %v5420_v43, %v12677_v60 }
 0x382   : > { %6781 = vmatpush.msra.mxu1 %v12445_v20  ;;  %6393 = vmatpush.msra.mxu2 %v12342_v10  ;;  %v6666_v10 = vand.u32 4294901760, %v12602_v58  ;;  %v6672_v53 = vand.u32 4294901760, %v12617_v63 }
 0x383   : > { %6559 = vmatmul.f32.vlgmr.msrb.gmra.mxu1 %v11523_v52  ;;  %6639 = vmatpush.msrb.mxu3 %v6638_v49  ;;  %v6650_v52 = vand.u32 4294901760, %v6649_v44  ;;  %v12665_v49 = vand.u32 4294901760, %v5422_v35  ;;  %v6684_v44 = vand.u32 4294901760, %v12647_v41 }
 0x384   : > { %6729 = vmatpush.msra.mxu0 %v12497_v3  ;;  %6783 = vmatpush.msra.mxu1 %v12457_v48  ;;  %v6667_v12 = vsub.f32 %v12602_v58, %v6666_v10 }
 0x385   : > { %6396 = vmatpush.msra.mxu2 %v12349_v50  ;;  %6645 = vmatpush.msrb.mxu3 %v6644_v38  ;;  %v12649_v50 = vand.u32 4294901760, %v5424_v33  ;;  %v6673_v38 = vsub.f32 %v12617_v63, %v6672_v53 }
 0x386   : > { %6732 = vmatpush.msra.mxu0 %v12514_v27  ;;  %6785 = vmatpush.msra.mxu1 %v12475_v25 }
 0x387   : > { %6568 = vmatpush.msrb.mxu2 %v12445_v20  ;;  %6449 = vmatmul.f32.gmra.mxu3 %v13550_v8  ;;  %v12675_v28 = vsub.f32 %v5424_v33, %v12649_v50  ;;  %v12687_v8 = vsub.f32 %v5422_v35, %v12665_v49  ;;  %v6674_v33 = vand.u32 4294901760, %v6673_v38  ;;  %v13551_v38 = vld [vmem:[#allocation27_spill] sm:$0xff] }
 0x388   : > { %6399 = vmatmul.f32.vlgmr.msra.gmra.mxu2 %v13549_v62  ;;  %6651 = vmatpush.msrb.mxu3 %v6650_v52  ;;  %v6668_v52 = vand.u32 4294901760, %v6667_v12  ;;  %v13083_v62 = vand.u32 4294901760, %v12663_v32 }
 0x389   : > { %6570 = vmatpush.msrb.mxu2 %v12457_v48  ;;  %6735 = vmatpush.msra.mxu0 %v12525_v9  ;;  %v6696_v12 = vand.u32 4294901760, %v12675_v28 }
 0x38a   : > { %6787 = vmatpush.msra.mxu1 %v12489_v55  ;;  %6522 = vmatmul.f32.gmra.mxu0 %v13544_v5  ;;  %v6691_v35 = vsub.f32 %v12663_v32, %v13083_v62 }
 0x38b   : > { %6572 = vmatpush.msrb.mxu2 %v12475_v25  ;;  %6657 = vmatpush.msrb.mxu3 %v6656_v13  ;;  %v6685_v13 = vsub.f32 %v12647_v41, %v6684_v44 }
 0x38c   : > { %6738 = vmatpush.msra.mxu0 %v12553_v31  ;;  %6789 = vmatpush.msra.mxu1 %v12499_v17  ;;  %v6692_v62 = vand.u32 4294901760, %v6691_v35 }
 0x38d   : > { %6563 = vmatmul.f32.gmra.mxu1 %v13544_v5  ;;  %6574 = vmatpush.msrb.mxu2 %v12489_v55  ;;  %v6680_v5 = vand.u32 4294901760, %v6679_v2  ;;  %v6686_v43 = vand.u32 4294901760, %v6685_v13  ;;  %v6708_v2 = vand.u32 4294901760, %v12697_v42 }
 0x38e   : > { %6663 = vmatpush.msrb.mxu3 %v6662_v51  ;;  %6741 = vmatpush.msra.mxu0 %v12568_v1  ;;  %v6702_v51 = vand.u32 4294901760, %v12687_v8 }
 0x38f   : > { %6791 = vmatpush.msra.mxu1 %v12527_v21  ;;  %6576 = vmatpush.msrb.mxu2 %v12499_v17  ;;  %v6709_v13 = vsub.f32 %v12697_v42, %v6708_v2 }
 0x390   : > { %6669 = vmatpush.msrb.mxu3 %v6668_v52  ;;  %6744 = vmatpush.msra.mxu0 %v12585_v46  ;;  %v6697_v52 = vsub.f32 %v12675_v28, %v6696_v12 }
 0x391   : > { %6793 = vmatpush.msra.mxu1 %v12541_v11  ;;  %6404 = vmatmul.f32.gmra.mxu2 %v13551_v38  ;;  %v6703_v38 = vsub.f32 %v12687_v8, %v6702_v51  ;;  %v6710_v35 = vand.u32 4294901760, %v6709_v13 }
 0x392   : > { %6578 = vmatpush.msrb.mxu2 %v12527_v21  ;;  %6675 = vmatpush.msrb.mxu3 %v6674_v33  ;;  %v6698_v33 = vand.u32 4294901760, %v6697_v52 }
 0x393   : > { %6747 = vmatpush.msra.mxu0 %v12602_v58  ;;  %6795 = vmatpush.msra.mxu1 %v12555_v23 }
 0x394   : > { %6580 = vmatpush.msrb.mxu2 %v12541_v11  ;;  %6681 = vmatpush.msrb.mxu3 %v6680_v5  ;;  %v6704_v5 = vand.u32 4294901760, %v6703_v38  ;;  %v6939_v38 = vstv %s7102_s18 }
 0x395   : > { %6750 = vmatpush.msra.mxu0 %v12617_v63  ;;  %6797 = vmatpush.msra.mxu1 %v12575_v56 }
 0x396   : > { %6582 = vmatpush.msrb.mxu2 %v12555_v23  ;;  %6687 = vmatpush.msrb.mxu3 %v6686_v43 }
 0x397   : > { %6753 = vmatpush.msra.mxu0 %v12632_v18  ;;  %6799 = vmatpush.msra.mxu1 %v12591_v29 }
 0x398   : > { %6584 = vmatpush.msrb.mxu2 %v12575_v56  ;;  %6693 = vmatpush.msrb.mxu3 %v6692_v62 }
 0x399   : > { %6756 = vmatpush.msra.mxu0 %v12647_v41  ;;  %6801 = vmatpush.msra.mxu1 %v12604_v47 }
 0x39a   : > { %6586 = vmatpush.msrb.mxu2 %v12591_v29  ;;  %6699 = vmatpush.msrb.mxu3 %v6698_v33  ;;  %v6944_v33 = vld [vmem:[%s12828_s5] sm:$0x3] }
 0x39b   : > { %6759 = vmatpush.msra.mxu0 %v12663_v32  ;;  %6803 = vmatpush.msra.mxu1 %v12619_v14 }
 0x39c   : > { %6588 = vmatpush.msrb.mxu2 %v12604_v47  ;;  %6705 = vmatpush.msrb.mxu3 %v6704_v5 }
 0x39d   : > { %6762 = vmatpush.msra.mxu0 %v12675_v28  ;;  %6805 = vmatpush.msra.mxu1 %v12634_v15 }
 0x39e   : > { %6590 = vmatpush.msrb.mxu2 %v12619_v14  ;;  %6711 = vmatpush.msrb.mxu3 %v6710_v35 }
 0x39f   : > { %6765 = vmatpush.msra.mxu0 %v12687_v8  ;;  %6807 = vmatpush.msra.mxu1 %v12649_v50 }
 0x3a0   : > { %6713 = vmatmul.f32.vlgmr.msrb.gmra.mxu3 %v12373_v37  ;;  %6592 = vmatpush.msrb.mxu2 %v12634_v15 }
 0x3a1   : > { %6899 = vmatpush.msra.mxu3 %v12445_v20  ;;  %6768 = vmatpush.msra.mxu0 %v12697_v42 }
 0x3a2   : > { %6809 = vmatpush.msra.mxu1 %v12665_v49  ;;  %6771 = vmatmul.f32.vlgmr.msra.gmra.mxu0 %v12376_v24  ;;  %v13552_v24 = vand.u32 4294901760, %v12632_v18 }
 0x3a3   : > { %6901 = vmatpush.msra.mxu3 %v12457_v48  ;;  %6594 = vmatpush.msrb.mxu2 %v12649_v50 }
 0x3a4   : > { %6811 = vmatpush.msra.mxu1 %v12677_v60 }
 0x3a5   : > { %6815 = vmatmul.f32.vlgmr.msra.gmra.mxu1 %v12383_v54  ;;  %6903 = vmatpush.msra.mxu3 %v12475_v25  ;;  %v13553_v54 = vand.u32 4294901760, %v12663_v32 }
 0x3a6   : > { %6596 = vmatpush.msrb.mxu2 %v12665_v49 }
 0x3a7   : > { %6905 = vmatpush.msra.mxu3 %v12489_v55 }
 0x3a8   : > { %6598 = vmatpush.msrb.mxu2 %v12677_v60  ;;  %6717 = vmatmul.f32.gmra.mxu3 %v12400_v36 }
 0x3a9   : > { %6604 = vmatmul.f32.vlgmr.msrb.gmra.mxu2 %v12395_v45  ;;  %6907 = vmatpush.msra.mxu3 %v12499_v17  ;;  %v5775_v45 = vpop.f32.mrf.mxu0 }
 0x3aa   : > { %6828 = vmatpush.msra.mxu2 %v6618_v61  ;;  %6776 = vmatmul.f32.gmra.mxu0 %v12412_v4  ;;  %v5816_v4 = vpop.f32.mrf.mxu1 }
 0x3ab   : > { %6909 = vmatpush.msra.mxu3 %v12527_v21 }
 0x3ac   : > { %6832 = vmatpush.msra.mxu2 %v6624_v26 }
 0x3ad   : > { %6821 = vmatmul.f32.gmra.mxu1 %v12419_v19  ;;  %6911 = vmatpush.msra.mxu3 %v12541_v11 }
 0x3ae   : > { %6836 = vmatpush.msra.mxu2 %v6630_v59 }
 0x3af   : > { %6913 = vmatpush.msra.mxu3 %v12555_v23 }
 0x3b0   : > { %6840 = vmatpush.msra.mxu2 %v6636_v57 }
 0x3b1   : > { %6612 = vmatmul.f32.gmra.mxu2 %v12436_v0  ;;  %6915 = vmatpush.msra.mxu3 %v12575_v56  ;;  %v5779_v20 = vpop.f32.mrf.mxu0 }
 0x3b2   : > { %6844 = vmatpush.msra.mxu2 %v6642_v16  ;;  %v5820_v48 = vpop.f32.mrf.mxu1  ;;  %v5776_v16 = vadd.f32 %v5775_v45, %v12406_v39  ;;  %v6946_v45 = vperm.slane %v6944_v33, 0 }
 0x3b3   : > { %6917 = vmatpush.msra.mxu3 %v12591_v29 }
 0x3b4   : > { %6848 = vmatpush.msra.mxu2 %v6648_v40  ;;  %v5817_v23 = vadd.f32 %v5816_v4, %v5776_v16 }
 0x3b5   : > { %6919 = vmatpush.msra.mxu3 %v12604_v47 }
 0x3b6   : > { %6852 = vmatpush.msra.mxu2 %v6654_v34 }
 0x3b7   : > { %6921 = vmatpush.msra.mxu3 %v12619_v14 }
 0x3b8   : > { %6856 = vmatpush.msra.mxu2 %v6660_v22  ;;  %v5780_v22 = vadd.f32 %v5779_v20, %v12441_v30 }
 0x3b9   : > { %6923 = vmatpush.msra.mxu3 %v12634_v15 }
 0x3ba   : > { %6860 = vmatpush.msra.mxu2 %v6666_v10  ;;  %v5821_v14 = vadd.f32 %v5820_v48, %v5780_v22 }
 0x3bb   : > { %6925 = vmatpush.msra.mxu3 %v12649_v50 }
 0x3bc   : > { %6864 = vmatpush.msra.mxu2 %v6672_v53 }
 0x3bd   : > { %6927 = vmatpush.msra.mxu3 %v12665_v49 }
 0x3be   : > { %6868 = vmatpush.msra.mxu2 %v13552_v24 }
 0x3bf   : > { %6929 = vmatpush.msra.mxu3 %v12677_v60 }
 0x3c0   : > { %6872 = vmatpush.msra.mxu2 %v6684_v44  ;;  %6931 = vmatmul.f32.vlgmr.msra.gmra.mxu3 %v12373_v37 }
 0x3c2   : > { %6876 = vmatpush.msra.mxu2 %v13553_v54 }
 0x3c4   : > { %6880 = vmatpush.msra.mxu2 %v6696_v12 }
 0x3c6   : > { %6884 = vmatpush.msra.mxu2 %v6702_v51 }
 0x3c8   : > { %6888 = vmatpush.msra.mxu2 %v6708_v2  ;;  %6935 = vmatmul.f32.gmra.mxu3 %v12400_v36 }
 0x3c9   : > { %6890 = vmatmul.f32.vlgmr.msra.gmra.mxu2 %v12373_v37 }
 0x3d1   : > { %6894 = vmatmul.f32.gmra.mxu2 %v12400_v36 }
 0x3d4   : > { %v6028_v6 = vpop.f32.mrf.mxu0 }
 0x3d6   : > { %v6072_v61 = vpop.f32.mrf.mxu1 }
 0x3d8   : > { %v5970_v19 = vpop.f32.mrf.mxu3 }
 0x3de   : > { %v6033_v55 = vpop.f32.mrf.mxu0 }
 0x3e0   : > { %v5861_v0 = vpop.f32.mrf.mxu2  ;;  %v6078_v26 = vpop.f32.mrf.mxu1 }
 0x3e1   : > { %v5862_v40 = vadd.f32 %v5861_v0, %v5817_v23 }
 0x3e2   : > { %v5974_v25 = vpop.f32.mrf.mxu3 }
 0x3e3   : > { %v5971_v58 = vadd.f32 %v5970_v19, %v5862_v40 }
 0x3e5   : > { %v6029_v15 = vadd.f32 %v6028_v6, %v5971_v58 }
 0x3e7   : > { %v6233_v27 = vpop.f32.mrf.mxu0  ;;  %v6073_v49 = vadd.f32 %v6072_v61, %v6029_v15 }
 0x3ea   : > { %v5869_v7 = vpop.f32.mrf.mxu2  ;;  %v6342_v37 = vpop.f32.mrf.mxu1 }
 0x3eb   : > { %v6188_v3 = vpop.f32.mrf.mxu3  ;;  %v6343_v31 = vadd.f32 %v6342_v37, %v6233_v27  ;;  %v5870_v39 = vadd.f32 %v5869_v7, %v5821_v14  ;;  %v6947_v27 = vperm.slane %v6944_v33, 1 }
 0x3ed   : > { %v5975_v44 = vadd.f32 %v5974_v25, %v5870_v39 }
 0x3ef   : > { %v6034_v12 = vadd.f32 %v6033_v55, %v5975_v44 }
 0x3f1   : > { %v6241_v21 = vpop.f32.mrf.mxu0  ;;  %v6079_v5 = vadd.f32 %v6078_v26, %v6034_v12 }
 0x3f4   : > { %v6147_v17 = vpop.f32.mrf.mxu2  ;;  %v6346_v11 = vpop.f32.mrf.mxu1 }
 0x3f5   : > { %v6192_v59 = vpop.f32.mrf.mxu3  ;;  %v6347_v63 = vadd.f32 %v6346_v11, %v6241_v21  ;;  %v6148_v60 = vadd.f32 %v6147_v17, %v6073_v49 }
 0x3f7   : > { %v6189_v43 = vadd.f32 %v6188_v3, %v6148_v60 }
 0x3f9   : > { %v6940_v54 = vmul.f32 %v6939_v38, %v6189_v43 }
 0x3fb   : > { %v6950_v25 = vadd.f32 %v6946_v45, %v6940_v54 }
 0x3fd   : > { %v6151_v9 = vpop.f32.mrf.mxu2  ;;  %v6519_v1 = vpop.f32.mrf.mxu0  ;;  %v6954_v37 = vmul.f32 0.2, %v6950_v25 }
 0x3fe   : > { %v6152_v19 = vadd.f32 %v6151_v9, %v6079_v5 }
 0x400   : > { %v6444_v36 = vpop.f32.mrf.mxu3  ;;  %v6560_v47 = vpop.f32.mrf.mxu1  ;;  %v6193_v7 = vadd.f32 %v6192_v59, %v6152_v19 }
 0x402   : > { %v6942_v21 = vmul.f32 %v6939_v38, %v6193_v7 }
 0x407   : > { %v6523_v50 = vpop.f32.mrf.mxu0 }
 0x40a   : > { %v6450_v46 = vpop.f32.mrf.mxu3  ;;  %v6564_v62 = vpop.f32.mrf.mxu1 }
 0x40b   : > { %v6400_v57 = vpop.f32.mrf.mxu2 }
 0x40c   : > { %v6401_v56 = vadd.f32 %v6400_v57, %v6343_v31  ;;  %v6958_v31 = vmax.f32 %v6950_v25, %v6954_v37 }
 0x40e   : > { %v6445_v34 = vadd.f32 %v6444_v36, %v6401_v56  ;;  %v6962_v36 = vld [vmem:[%s12829_s6] sm:$0x3] }
 0x40f   : > { %v6964_v23 = vperm.slane %v6962_v36, 0  ;;  %v6965_v40 = vperm.slane %v6962_v36, 1 }
 0x410   : > { %v6520_v18 = vadd.f32 %v6519_v1, %v6445_v34  ;;  %v6952_v1 = vadd.f32 %v6946_v45, %v6942_v21 }
 0x412   : > { %v6561_v32 = vadd.f32 %v6560_v47, %v6520_v18  ;;  %v6968_v47 = vmul.f32 %v6964_v23, %v6958_v31 }
 0x414   : > { %v6405_v29 = vpop.f32.mrf.mxu2 }
 0x415   : > { %v6406_v10 = vadd.f32 %v6405_v29, %v6347_v63  ;;  %v6956_v63 = vmul.f32 0.2, %v6952_v1 }
 0x417   : > { %v6451_v42 = vadd.f32 %v6450_v46, %v6406_v10  ;;  %v6960_v15 = vmax.f32 %v6952_v1, %v6956_v63 }
 0x419   : > { %v6524_v8 = vadd.f32 %v6523_v50, %v6451_v42  ;;  %v6978_v42 = vstv %s7103_s23 }
 0x41b   : > { %v6565_v13 = vadd.f32 %v6564_v62, %v6524_v8 }
 0x41f   : > { %v6772_v30 = vpop.f32.mrf.mxu0 }
 0x422   : > { %v6816_v4 = vpop.f32.mrf.mxu1 }
 0x423   : > { %v6714_v53 = vpop.f32.mrf.mxu3 }
 0x427   : > { %v6777_v55 = vpop.f32.mrf.mxu0 }
 0x42a   : > { %v6822_v57 = vpop.f32.mrf.mxu1 }
 0x42b   : > { %v6718_v52 = vpop.f32.mrf.mxu3 }
 0x42c   : > { %v6605_v41 = vpop.f32.mrf.mxu2 }
 0x42d   : > { %v6606_v28 = vadd.f32 %v6605_v41, %v6561_v32  ;;  %v6970_v41 = vmul.f32 %v6964_v23, %v6960_v15  ;;  %v6981_v32 = vstv %s7104_s28 }
 0x42f   : > { %v6715_v51 = vadd.f32 %v6714_v53, %v6606_v28 }
 0x431   : > { %v6773_v24 = vadd.f32 %v6772_v30, %v6715_v51 }
 0x433   : > { %v6817_v20 = vadd.f32 %v6816_v4, %v6773_v24 }
 0x434   : > { %v6613_v2 = vpop.f32.mrf.mxu2 }
 0x435   : > { %v6614_v35 = vadd.f32 %v6613_v2, %v6565_v13 }
 0x437   : > { %v6719_v0 = vadd.f32 %v6718_v52, %v6614_v35 }
 0x439   : > { %v6778_v17 = vadd.f32 %v6777_v55, %v6719_v0 }
 0x43b   : > { %v6823_v9 = vadd.f32 %v6822_v57, %v6778_v17 }
 0x443   : > { %v6932_v48 = vpop.f32.mrf.mxu3 }
 0x44b   : > { %v6936_v46 = vpop.f32.mrf.mxu3 }
 0x44c   : > { %v6891_v6 = vpop.f32.mrf.mxu2 }
 0x44d   : > { %v6892_v61 = vadd.f32 %v6891_v6, %v6817_v20 }
 0x44f   : > { %v6933_v3 = vadd.f32 %v6932_v48, %v6892_v61 }
 0x451   : > { %v6941_v26 = vmul.f32 %v6939_v38, %v6933_v3 }
 0x453   : > { %v6951_v11 = vadd.f32 %v6947_v27, %v6941_v26 }
 0x454   : > { %v6895_v16 = vpop.f32.mrf.mxu2 }
 0x455   : > { %v6896_v59 = vadd.f32 %v6895_v16, %v6823_v9  ;;  %v6955_v56 = vmul.f32 0.2, %v6951_v11 }
 0x457   : > { %v6937_v29 = vadd.f32 %v6936_v46, %v6896_v59  ;;  %v6959_v34 = vmax.f32 %v6951_v11, %v6955_v56 }
 0x459   : > { %v6943_v58 = vmul.f32 %v6939_v38, %v6937_v29  ;;  %v6969_v22 = vmul.f32 %v6965_v40, %v6959_v34 }
 0x45b   : > { %v6953_v14 = vadd.f32 %v6947_v27, %v6943_v58  ;;  %v6972_v10 = vadd.f32 %v6969_v22, %v6968_v47 }
 0x45d   : > { %6973 = vadd.xlane.f32.xlu0 %v6972_v10  ;;  %v6957_v18 = vmul.f32 0.2, %v6953_v14 }
 0x45f   : > { %v6961_v53 = vmax.f32 %v6953_v14, %v6957_v18 }
 0x461   : > { %v6971_v39 = vmul.f32 %v6965_v40, %v6961_v53 }
 0x463   : > { %v6975_v50 = vadd.f32 %v6971_v39, %v6970_v41 }
 0x465   : > { %6976 = vadd.xlane.f32.xlu0 %v6975_v50 }
 0x4d0   : > { %v6974_v49 = vpop.xlane.xlu0 %6973 }
 0x4d1   : > { %v6979_v44 = vmul.f32 %v6978_v42, %v6974_v49 }
 0x4d3   : > { %v6982_v28 = vadd.f32 %v6981_v32, %v6979_v44 }
 0x4d5   : > { %v6984_v60 = vsub.f32 0.0, %v6982_v28 }
 0x4d7   : > { %v6986_v62 = vmul.f32 1.442695, %v6984_v60 }
 0x4d8   : > { %v6977_v8 = vpop.xlane.xlu0 %6976 }
 0x4d9   : > { %7127 = vpow2.f32 %v6986_v62  ;;  %v6980_v12 = vmul.f32 %v6978_v42, %v6977_v8 }
 0x4db   : > { %v6983_v30 = vadd.f32 %v6981_v32, %v6980_v12 }
 0x4dd   : > { %v6985_v51 = vsub.f32 0.0, %v6983_v30 }
 0x4df   : > { %v7128_v43 = vpop.eup %7127  ;;  %v6988_v52 = vmul.f32 1.442695, %v6985_v51 }
 0x4e0   : > { %v6990_v2 = vadd.f32 1.0, %v7128_v43 }
 0x4e1   : > { %7129 = vpow2.f32 %v6988_v52 }
 0x4e2   : > { %7131 = vrcp.f32 %v6990_v2  ;;  %v7003_v24 = vand.u32 2147483648, %v6990_v2  ;;  %v7001_v45 = vand.u32 2147483647, %v6990_v2  ;;  %vm6997_vm2 = vweird.f32 %v6990_v2 }
 0x4e4   : > { %v7004_v0 = vor.u32 1.1754944e-38, %v7003_v24  ;;  %vm7002_vm5 = vcmp.eq.f32.partialorder %v7001_v45, 8.507059e+37 }
 0x4e7   : > { %v7130_v38 = vpop.eup %7129 }
 0x4e8   : > { %v7132_v33 = vpop.eup %7131  ;;  %v6991_v13 = vadd.f32 1.0, %v7130_v38 }
 0x4e9   : > { %v6993_v5 = vmul.f32 %v7132_v33, %v6990_v2  ;;  %vm6998_vm1 = vweird.f32 %v7132_v33 }
 0x4ea   : > { %7133 = vrcp.f32 %v6991_v13  ;;  %vm6999_vm4 = vmor %vm6997_vm2, %vm6998_vm1  ;;  %v7017_v7 = vand.u32 2147483648, %v6991_v13  ;;  %v7015_v55 = vand.u32 2147483647, %v6991_v13  ;;  %vm7011_vm7 = vweird.f32 %v6991_v13 }
 0x4eb   : > { %v6994_v35 = vsub.f32 1.0, %v6993_v5 }
 0x4ec   : > { %v7018_v17 = vor.u32 1.1754944e-38, %v7017_v7  ;;  %vm7016_vm9 = vcmp.eq.f32.partialorder %v7015_v55, 8.507059e+37 }
 0x4ed   : > { %v6995_v54 = vmul.f32 %v7132_v33, %v6994_v35 }
 0x4ef   : > { %v6996_v4 = vadd.f32 %v7132_v33, %v6995_v54 }
 0x4f0   : > { %v7134_v19 = vpop.eup %7133 }
 0x4f1   : > { %v7000_v20 = vsel %vm6999_vm4, %v7132_v33, %v6996_v4  ;;  %v7007_v48 = vmul.f32 %v7134_v19, %v6991_v13  ;;  %vm7012_vm6 = vweird.f32 %v7134_v19 }
 0x4f2   : > { %v7005_v6 = vsel %vm7002_vm5, %v7004_v0, %v7000_v20  ;;  %vm7013_vm8 = vmor %vm7011_vm7, %vm7012_vm6 }
 0x4f3   : > { %7021 = vst.msk [vmem:[%s297_s8] sm:$0xff] %vm7020_vm3, %v7005_v6  ;;  %v7008_v25 = vsub.f32 1.0, %v7007_v48 }
 0x4f5   : > { %v7009_v61 = vmul.f32 %v7134_v19, %v7008_v25 }
 0x4f7   : > { %v7010_v3 = vadd.f32 %v7134_v19, %v7009_v61 }
 0x4f9   : > { %v7014_v27 = vsel %vm7013_vm8, %v7134_v19, %v7010_v3 }
 0x4fa   : > { %v7019_v37 = vsel %vm7016_vm9, %v7018_v17, %v7014_v27 }
 0x4fb   : > { %7022 = vst.msk [vmem:[%s297_s8 + $0x8] sm:$0xff] %vm7020_vm3, %v7019_v37 }
 0x4fc PF: > { %s18_s24 = sadd.s32 1, %s7161_s24  }
 0x4fd   : > { %p15_p7 = scmp.ge.s32.totalorder %s18_s24, 6  }
 0x4ff   :  { %17 = sbr.rel (!%p15_p7) target bundleno = 1 (0x1), region = 83 }
 0x504   :  { %7045 = vsyncpa [#allocation3], 1 }
 0x505   :  { %7047 = vsyncpa [#allocation3 + $0x1], 1 }

</bundles_post_ra>
